<compile_context>
chip_gen: v5e
topology: v5e:2x2
jax: 0.10.0
libtpu: 0.0.40
codegen_flags: <defaults>
</compile_context>

<pallas_src>
import jax
import jax.numpy as jnp
from jax.experimental import pallas as pl
from jax.experimental.pallas import tpu as pltpu

HIDDEN = 512          # fixed by the module: feature_projector = nn.Linear(512, output_dim)
OUTPUT_DIM = 512      # default output_dim
NUM_CLASSES = 50      # default num_classes
LOGITS_PAD = 128      # lane-dense padded classifier width
TB_MAX = 128          # batch tile (128 rows saturates the MXU on v5e/v6e/v7x)


def _round_up(n, m):
    return ((n + m - 1) // m) * m


def _iris_kernel(x_ref,
                 wo_ref, bo_ref,     # ORACLE stand-in  (512 -> 512) + ReLU
                 wc_ref, bc_ref,     # CASTLE stand-in  (512 -> 512) + ReLU
                 wn_ref, bn_ref,     # NEXUS  stand-in  (512 -> 512) + ReLU
                 wp_ref, bp_ref,     # feature_projector (512 -> OUTPUT_DIM)
                 wl_ref, bl_ref,     # classifier (OUTPUT_DIM -> LOGITS_PAD, zero-padded)
                 feat_ref, logits_ref):
    # bf16 matmuls on the MXU, f32 accumulation, f32 bias-add / ReLU.
    x = x_ref[...].astype(jnp.bfloat16)

    # ORACLE
    h = jnp.dot(x, wo_ref[...], preferred_element_type=jnp.float32) + bo_ref[...]
    h = jnp.maximum(h, 0.0).astype(jnp.bfloat16)
    # CASTLE
    h = jnp.dot(h, wc_ref[...], preferred_element_type=jnp.float32) + bc_ref[...]
    h = jnp.maximum(h, 0.0).astype(jnp.bfloat16)
    # NEXUS
    h = jnp.dot(h, wn_ref[...], preferred_element_type=jnp.float32) + bn_ref[...]
    h = jnp.maximum(h, 0.0).astype(jnp.bfloat16)

    # feature_projector (no nonlinearity in the reference forward)
    proj = jnp.dot(h, wp_ref[...], preferred_element_type=jnp.float32) + bp_ref[...]
    feat_ref[...] = proj.astype(feat_ref.dtype)

    # classifier (lane-dense padded to 128 output columns)
    logits = jnp.dot(proj.astype(jnp.bfloat16), wl_ref[...],
                     preferred_element_type=jnp.float32) + bl_ref[...]
    logits_ref[...] = logits.astype(logits_ref.dtype)


def prepare_params(params):
    """Pack f32 params for the kernel: bf16 weights, lane-dense classifier."""
    pk = {
        "wo": params["wo"].astype(jnp.bfloat16), "bo": params["bo"],
        "wc": params["wc"].astype(jnp.bfloat16), "bc": params["bc"],
        "wn": params["wn"].astype(jnp.bfloat16), "bn": params["bn"],
        "wp": params["wp"].astype(jnp.bfloat16), "bp": params["bp"],
    }
    wl = params["wl"].astype(jnp.bfloat16)
    bl = params["bl"]
    pad = LOGITS_PAD - wl.shape[1]
    pk["wl"] = jnp.pad(wl, ((0, 0), (0, pad)))
    pk["bl"] = jnp.pad(bl, ((0, 0), (0, pad)))
    return pk


def iris_forward(x, packed):
    """Fused IRIS forward. x: (B, 512) f32. Returns (features, logits)."""
    B = x.shape[0]

    # Batch tiling: pad B to a multiple of the tile, tile over the batch axis.
    B_pad = _round_up(B, 8)
    TB = min(TB_MAX, B_pad)
    B_pad = _round_up(B_pad, TB)
    if B_pad != B:
        x = jnp.pad(x, ((0, B_pad - B), (0, 0)))
    n_tiles = B_pad // TB

    def tiled(shape):            # batch-tiled operand/output
        return pl.BlockSpec(shape, lambda i: (i, 0))

    def resident(shape):         # VMEM-resident across batch tiles
        return pl.BlockSpec(shape, lambda i: (0, 0))

    args = (x,
            packed["wo"], packed["bo"],
            packed["wc"], packed["bc"],
            packed["wn"], packed["bn"],
            packed["wp"], packed["bp"],
            packed["wl"], packed["bl"])

    in_specs = [tiled((TB, HIDDEN))] + [resident(a.shape) for a in args[1:]]
    out_specs = (tiled((TB, OUTPUT_DIM)), tiled((TB, LOGITS_PAD)))

    weight_bytes = sum(int(packed[k].size) * packed[k].dtype.itemsize
                       for k in ("wo", "wc", "wn", "wp", "wl"))
    bias_bytes = sum(int(packed[k].size) * 4 for k in ("bo", "bc", "bn", "bp", "bl"))
    io_bytes = 4 * B_pad * (HIDDEN + OUTPUT_DIM + LOGITS_PAD)
    flops = 2 * B_pad * HIDDEN * (3 * HIDDEN + OUTPUT_DIM) \
        + 2 * B_pad * OUTPUT_DIM * LOGITS_PAD

    feats, logits = pl.pallas_call(
        _iris_kernel,
        grid=(n_tiles,),
        in_specs=in_specs,
        out_specs=out_specs,
        out_shape=(jax.ShapeDtypeStruct((B_pad, OUTPUT_DIM), jnp.float32),
                   jax.ShapeDtypeStruct((B_pad, LOGITS_PAD), jnp.float32)),
        compiler_params=pltpu.CompilerParams(
            dimension_semantics=("parallel",),
            vmem_limit_bytes=32 << 20),
        cost_estimate=pl.CostEstimate(
            flops=flops, transcendentals=0,
            bytes_accessed=weight_bytes + bias_bytes + io_bytes),
    )(*args)

    return feats[:B], logits[:B, :NUM_CLASSES]


def init_params(key):
    """Deterministic f32 parameter init. Weights stored (in, out) = PyTorch W.T."""
    ks = jax.random.split(key, 10)

    def lin(kw, kb, fan_in, fan_out):
        scale = 1.0 / jnp.sqrt(jnp.float32(fan_in))
        w = jax.random.uniform(kw, (fan_in, fan_out), jnp.float32, -scale, scale)
        b = jax.random.uniform(kb, (1, fan_out), jnp.float32, -scale, scale)
        return w, b

    wo, bo = lin(ks[0], ks[1], HIDDEN, HIDDEN)
    wc, bc = lin(ks[2], ks[3], HIDDEN, HIDDEN)
    wn, bn = lin(ks[4], ks[5], HIDDEN, HIDDEN)
    wp, bp = lin(ks[6], ks[7], HIDDEN, OUTPUT_DIM)
    wl, bl = lin(ks[8], ks[9], OUTPUT_DIM, NUM_CLASSES)
    return dict(wo=wo, bo=bo, wc=wc, bc=bc, wn=wn, bn=bn,
                wp=wp, bp=bp, wl=wl, bl=bl)


def _reference_f32(x, p):
    h = jnp.maximum(x @ p["wo"] + p["bo"], 0.0)
    h = jnp.maximum(h @ p["wc"] + p["bc"], 0.0)
    h = jnp.maximum(h @ p["wn"] + p["bn"], 0.0)
    proj = h @ p["wp"] + p["bp"]
    return proj, proj @ p["wl"] + p["bl"]


def _reference_bf16(x, p):
    """Mirrors the kernel's bf16-operand / f32-accumulate arithmetic."""
    def mm(a, w):
        return jnp.dot(a.astype(jnp.bfloat16), w.astype(jnp.bfloat16),
                       preferred_element_type=jnp.float32)
    h = jnp.maximum(mm(x, p["wo"]) + p["bo"], 0.0)
    h = jnp.maximum(mm(h, p["wc"]) + p["bc"], 0.0)
    h = jnp.maximum(mm(h, p["wn"]) + p["bn"], 0.0)
    proj = mm(h, p["wp"]) + p["bp"]
    return proj, mm(proj, p["wl"]) + p["bl"]


if __name__ == "__main__":
    key = jax.random.PRNGKey(0)
    k_x, k_p = jax.random.split(key)

    B = 8
    x = jax.random.normal(k_x, (B, HIDDEN), jnp.float32)
    params = init_params(k_p)
    packed = prepare_params(params)

    feats, logits = iris_forward(x, packed)
    feats = jax.block_until_ready(feats)
    logits = jax.block_until_ready(logits)

    assert feats.shape == (B, OUTPUT_DIM)
    assert logits.shape == (B, NUM_CLASSES)

    # Semantics check vs a bf16-emulating JAX reference (same arithmetic).
    ref_feats, ref_logits = _reference_bf16(x, params)
    assert jnp.allclose(feats, ref_feats, atol=2e-3, rtol=2e-3), "features mismatch (bf16 ref)"
    assert jnp.allclose(logits, ref_logits, atol=2e-3, rtol=2e-3), "logits mismatch (bf16 ref)"

    # Sanity check vs full-f32 reference (bf16 weight rounding → loose tol).
    f32_feats, f32_logits = _reference_f32(x, params)
    assert jnp.allclose(logits, f32_logits, atol=5e-2, rtol=5e-2), "logits mismatch (f32 ref)"

    print("KERNEL_OK")
</pallas_src>

<mosaic_0001>
module attributes {stable_mosaic.version = 11 : i64} {
  func.func @_iris_kernel(%arg0: i32, %arg1: memref<8x512xf32, #tpu.memory_space<vmem>>, %arg2: memref<512x512xbf16, #tpu.memory_space<vmem>>, %arg3: memref<1x512xf32, #tpu.memory_space<vmem>>, %arg4: memref<512x512xbf16, #tpu.memory_space<vmem>>, %arg5: memref<1x512xf32, #tpu.memory_space<vmem>>, %arg6: memref<512x512xbf16, #tpu.memory_space<vmem>>, %arg7: memref<1x512xf32, #tpu.memory_space<vmem>>, %arg8: memref<512x512xbf16, #tpu.memory_space<vmem>>, %arg9: memref<1x512xf32, #tpu.memory_space<vmem>>, %arg10: memref<512x128xbf16, #tpu.memory_space<vmem>>, %arg11: memref<1x128xf32, #tpu.memory_space<vmem>>, %arg12: memref<8x512xf32, #tpu.memory_space<vmem>>, %arg13: memref<8x128xf32, #tpu.memory_space<vmem>>) attributes {dimension_semantics = [#tpu.dimension_semantics<parallel>], iteration_bounds = array<i64: 1>, scalar_prefetch = 0 : i64, scratch_operands = 0 : i64, tpu.core_type = #tpu.core_type<tc>, window_params = [{transform_indices = @transform_0, window_bounds = array<i64: 8, 512>}, {pipeline_mode = #tpu.pipeline_mode<synchronous>, transform_indices = @transform_1, window_bounds = array<i64: 512, 512>}, {pipeline_mode = #tpu.pipeline_mode<synchronous>, transform_indices = @transform_2, window_bounds = array<i64: 1, 512>}, {pipeline_mode = #tpu.pipeline_mode<synchronous>, transform_indices = @transform_3, window_bounds = array<i64: 512, 512>}, {pipeline_mode = #tpu.pipeline_mode<synchronous>, transform_indices = @transform_4, window_bounds = array<i64: 1, 512>}, {pipeline_mode = #tpu.pipeline_mode<synchronous>, transform_indices = @transform_5, window_bounds = array<i64: 512, 512>}, {pipeline_mode = #tpu.pipeline_mode<synchronous>, transform_indices = @transform_6, window_bounds = array<i64: 1, 512>}, {pipeline_mode = #tpu.pipeline_mode<synchronous>, transform_indices = @transform_7, window_bounds = array<i64: 512, 512>}, {pipeline_mode = #tpu.pipeline_mode<synchronous>, transform_indices = @transform_8, window_bounds = array<i64: 1, 512>}, {pipeline_mode = #tpu.pipeline_mode<synchronous>, transform_indices = @transform_9, window_bounds = array<i64: 512, 128>}, {pipeline_mode = #tpu.pipeline_mode<synchronous>, transform_indices = @transform_10, window_bounds = array<i64: 1, 128>}, {transform_indices = @transform_11, window_bounds = array<i64: 8, 512>}, {transform_indices = @transform_12, window_bounds = array<i64: 8, 128>}]} {
    %c0 = arith.constant 0 : index
    %c0_0 = arith.constant 0 : index
    %0 = vector.load %arg1[%c0, %c0_0] : memref<8x512xf32, #tpu.memory_space<vmem>>, vector<8x512xf32>
    %1 = arith.truncf %0 : vector<8x512xf32> to vector<8x512xbf16>
    %c0_1 = arith.constant 0 : index
    %c0_2 = arith.constant 0 : index
    %2 = vector.load %arg2[%c0_1, %c0_2] : memref<512x512xbf16, #tpu.memory_space<vmem>>, vector<512x512xbf16>
    %cst = arith.constant dense<0.000000e+00> : vector<8x512xf32>
    %3 = tpu.matmul %1, %2, %cst {dimension_numbers = #tpu.dot_dimension_numbers<[1], [0], [0], [1], [0, 0, 1, 1], [], []>} : vector<8x512xbf16>, vector<512x512xbf16>, vector<8x512xf32> -> vector<8x512xf32>
    %c0_3 = arith.constant 0 : index
    %c0_4 = arith.constant 0 : index
    %4 = vector.load %arg3[%c0_3, %c0_4] : memref<1x512xf32, #tpu.memory_space<vmem>>, vector<1x512xf32>
    %5 = vector.broadcast %4 : vector<1x512xf32> to vector<8x512xf32>
    %6 = arith.addf %3, %5 : vector<8x512xf32>
    %cst_5 = arith.constant 0.000000e+00 : f32
    %7 = vector.broadcast %cst_5 : f32 to vector<8x512xf32>
    %8 = arith.maximumf %6, %7 : vector<8x512xf32>
    %9 = arith.truncf %8 : vector<8x512xf32> to vector<8x512xbf16>
    %c0_6 = arith.constant 0 : index
    %c0_7 = arith.constant 0 : index
    %10 = vector.load %arg4[%c0_6, %c0_7] : memref<512x512xbf16, #tpu.memory_space<vmem>>, vector<512x512xbf16>
    %cst_8 = arith.constant dense<0.000000e+00> : vector<8x512xf32>
    %11 = tpu.matmul %9, %10, %cst_8 {dimension_numbers = #tpu.dot_dimension_numbers<[1], [0], [0], [1], [0, 0, 1, 1], [], []>} : vector<8x512xbf16>, vector<512x512xbf16>, vector<8x512xf32> -> vector<8x512xf32>
    %c0_9 = arith.constant 0 : index
    %c0_10 = arith.constant 0 : index
    %12 = vector.load %arg5[%c0_9, %c0_10] : memref<1x512xf32, #tpu.memory_space<vmem>>, vector<1x512xf32>
    %13 = vector.broadcast %12 : vector<1x512xf32> to vector<8x512xf32>
    %14 = arith.addf %11, %13 : vector<8x512xf32>
    %cst_11 = arith.constant 0.000000e+00 : f32
    %15 = vector.broadcast %cst_11 : f32 to vector<8x512xf32>
    %16 = arith.maximumf %14, %15 : vector<8x512xf32>
    %17 = arith.truncf %16 : vector<8x512xf32> to vector<8x512xbf16>
    %c0_12 = arith.constant 0 : index
    %c0_13 = arith.constant 0 : index
    %18 = vector.load %arg6[%c0_12, %c0_13] : memref<512x512xbf16, #tpu.memory_space<vmem>>, vector<512x512xbf16>
    %cst_14 = arith.constant dense<0.000000e+00> : vector<8x512xf32>
    %19 = tpu.matmul %17, %18, %cst_14 {dimension_numbers = #tpu.dot_dimension_numbers<[1], [0], [0], [1], [0, 0, 1, 1], [], []>} : vector<8x512xbf16>, vector<512x512xbf16>, vector<8x512xf32> -> vector<8x512xf32>
    %c0_15 = arith.constant 0 : index
    %c0_16 = arith.constant 0 : index
    %20 = vector.load %arg7[%c0_15, %c0_16] : memref<1x512xf32, #tpu.memory_space<vmem>>, vector<1x512xf32>
    %21 = vector.broadcast %20 : vector<1x512xf32> to vector<8x512xf32>
    %22 = arith.addf %19, %21 : vector<8x512xf32>
    %cst_17 = arith.constant 0.000000e+00 : f32
    %23 = vector.broadcast %cst_17 : f32 to vector<8x512xf32>
    %24 = arith.maximumf %22, %23 : vector<8x512xf32>
    %25 = arith.truncf %24 : vector<8x512xf32> to vector<8x512xbf16>
    %c0_18 = arith.constant 0 : index
    %c0_19 = arith.constant 0 : index
    %26 = vector.load %arg8[%c0_18, %c0_19] : memref<512x512xbf16, #tpu.memory_space<vmem>>, vector<512x512xbf16>
    %cst_20 = arith.constant dense<0.000000e+00> : vector<8x512xf32>
    %27 = tpu.matmul %25, %26, %cst_20 {dimension_numbers = #tpu.dot_dimension_numbers<[1], [0], [0], [1], [0, 0, 1, 1], [], []>} : vector<8x512xbf16>, vector<512x512xbf16>, vector<8x512xf32> -> vector<8x512xf32>
    %c0_21 = arith.constant 0 : index
    %c0_22 = arith.constant 0 : index
    %28 = vector.load %arg9[%c0_21, %c0_22] : memref<1x512xf32, #tpu.memory_space<vmem>>, vector<1x512xf32>
    %29 = vector.broadcast %28 : vector<1x512xf32> to vector<8x512xf32>
    %30 = arith.addf %27, %29 : vector<8x512xf32>
    %c0_23 = arith.constant 0 : index
    %c0_24 = arith.constant 0 : index
    %31 = vector.load %arg12[%c0_23, %c0_24] : memref<8x512xf32, #tpu.memory_space<vmem>>, vector<8x512xf32>
    tpu.vector_store %arg12[%c0_23, %c0_24], %30 {strides = array<i32>} : memref<8x512xf32, #tpu.memory_space<vmem>>, vector<8x512xf32>,
    %32 = arith.truncf %30 : vector<8x512xf32> to vector<8x512xbf16>
    %c0_25 = arith.constant 0 : index
    %c0_26 = arith.constant 0 : index
    %33 = vector.load %arg10[%c0_25, %c0_26] : memref<512x128xbf16, #tpu.memory_space<vmem>>, vector<512x128xbf16>
    %cst_27 = arith.constant dense<0.000000e+00> : vector<8x128xf32>
    %34 = tpu.matmul %32, %33, %cst_27 {dimension_numbers = #tpu.dot_dimension_numbers<[1], [0], [0], [1], [0, 0, 1, 1], [], []>} : vector<8x512xbf16>, vector<512x128xbf16>, vector<8x128xf32> -> vector<8x128xf32>
    %c0_28 = arith.constant 0 : index
    %c0_29 = arith.constant 0 : index
    %35 = vector.load %arg11[%c0_28, %c0_29] : memref<1x128xf32, #tpu.memory_space<vmem>>, vector<1x128xf32>
    %36 = vector.broadcast %35 : vector<1x128xf32> to vector<8x128xf32>
    %37 = arith.addf %34, %36 : vector<8x128xf32>
    %c0_30 = arith.constant 0 : index
    %c0_31 = arith.constant 0 : index
    %38 = vector.load %arg13[%c0_30, %c0_31] : memref<8x128xf32, #tpu.memory_space<vmem>>, vector<8x128xf32>
    tpu.vector_store %arg13[%c0_30, %c0_31], %37 {strides = array<i32>} : memref<8x128xf32, #tpu.memory_space<vmem>>, vector<8x128xf32>,
    return
  }
  func.func @transform_0(%arg0: i32) -> (i32, i32) {
    %c0_i32 = arith.constant 0 : i32
    %c0_i32_0 = arith.constant 0 : i32
    return %arg0, %c0_i32 : i32, i32
  }
  func.func @transform_1(%arg0: i32) -> (i32, i32) {
    %c0_i32 = arith.constant 0 : i32
    %c0_i32_0 = arith.constant 0 : i32
    %c0_i32_1 = arith.constant 0 : i32
    return %c0_i32, %c0_i32_0 : i32, i32
  }
  func.func @transform_2(%arg0: i32) -> (i32, i32) {
    %c0_i32 = arith.constant 0 : i32
    %c0_i32_0 = arith.constant 0 : i32
    %c0_i32_1 = arith.constant 0 : i32
    return %c0_i32, %c0_i32_0 : i32, i32
  }
  func.func @transform_3(%arg0: i32) -> (i32, i32) {
    %c0_i32 = arith.constant 0 : i32
    %c0_i32_0 = arith.constant 0 : i32
    %c0_i32_1 = arith.constant 0 : i32
    return %c0_i32, %c0_i32_0 : i32, i32
  }
  func.func @transform_4(%arg0: i32) -> (i32, i32) {
    %c0_i32 = arith.constant 0 : i32
    %c0_i32_0 = arith.constant 0 : i32
    %c0_i32_1 = arith.constant 0 : i32
    return %c0_i32, %c0_i32_0 : i32, i32
  }
  func.func @transform_5(%arg0: i32) -> (i32, i32) {
    %c0_i32 = arith.constant 0 : i32
    %c0_i32_0 = arith.constant 0 : i32
    %c0_i32_1 = arith.constant 0 : i32
    return %c0_i32, %c0_i32_0 : i32, i32
  }
  func.func @transform_6(%arg0: i32) -> (i32, i32) {
    %c0_i32 = arith.constant 0 : i32
    %c0_i32_0 = arith.constant 0 : i32
    %c0_i32_1 = arith.constant 0 : i32
    return %c0_i32, %c0_i32_0 : i32, i32
  }
  func.func @transform_7(%arg0: i32) -> (i32, i32) {
    %c0_i32 = arith.constant 0 : i32
    %c0_i32_0 = arith.constant 0 : i32
    %c0_i32_1 = arith.constant 0 : i32
    return %c0_i32, %c0_i32_0 : i32, i32
  }
  func.func @transform_8(%arg0: i32) -> (i32, i32) {
    %c0_i32 = arith.constant 0 : i32
    %c0_i32_0 = arith.constant 0 : i32
    %c0_i32_1 = arith.constant 0 : i32
    return %c0_i32, %c0_i32_0 : i32, i32
  }
  func.func @transform_9(%arg0: i32) -> (i32, i32) {
    %c0_i32 = arith.constant 0 : i32
    %c0_i32_0 = arith.constant 0 : i32
    %c0_i32_1 = arith.constant 0 : i32
    return %c0_i32, %c0_i32_0 : i32, i32
  }
  func.func @transform_10(%arg0: i32) -> (i32, i32) {
    %c0_i32 = arith.constant 0 : i32
    %c0_i32_0 = arith.constant 0 : i32
    %c0_i32_1 = arith.constant 0 : i32
    return %c0_i32, %c0_i32_0 : i32, i32
  }
  func.func @transform_11(%arg0: i32) -> (i32, i32) {
    %c0_i32 = arith.constant 0 : i32
    %c0_i32_0 = arith.constant 0 : i32
    return %arg0, %c0_i32 : i32, i32
  }
  func.func @transform_12(%arg0: i32) -> (i32, i32) {
    %c0_i32 = arith.constant 0 : i32
    %c0_i32_0 = arith.constant 0 : i32
    return %arg0, %c0_i32 : i32, i32
  }
}

</mosaic_0001>

<bundles_post_ra>
// kernel: tpu_custom_call.1
= control target key start
LH: loop header
LB: loop body
LE: loop exit
PB: predicated region body
PF: predicated region fallthrough
CT: control target
= control target key end

     0   :  { %18 = vsyncpa [#allocation3], 0  ;;  %s7854_s0 = inlined_call_operand.hbm [shape: f32[8,512], index: 0, kind: input, shape index: {}]   ;;  %s7855_s1 = inlined_call_operand.hbm [shape: bf16[512,512], index: 1, kind: input, shape index: {}]   ;;  %s7856_s2 = inlined_call_operand.hbm [shape: f32[1,512], index: 2, kind: input, shape index: {}]   ;;  %s7857_s3 = inlined_call_operand.hbm [shape: bf16[512,512], index: 3, kind: input, shape index: {}]   ;;  %s7858_s4 = inlined_call_operand.hbm [shape: f32[1,512], index: 4, kind: input, shape index: {}]   ;;  %s7859_s5 = inlined_call_operand.hbm [shape: bf16[512,512], index: 5, kind: input, shape index: {}]   ;;  %s7860_s6 = inlined_call_operand.vmem [shape: f32[1,512], index: 6, kind: input, shape index: {}]   ;;  %s7861_s7 = inlined_call_operand.hbm [shape: bf16[512,512], index: 7, kind: input, shape index: {}]   ;;  %s7862_s8 = inlined_call_operand.hbm [shape: f32[1,512], index: 8, kind: input, shape index: {}]   ;;  %s7863_s9 = inlined_call_operand.hbm [shape: bf16[512,128], index: 9, kind: input, shape index: {}]   ;;  %s7864_s10 = inlined_call_operand.vmem [shape: f32[1,128], index: 10, kind: input, shape index: {}]   ;;  %s7865_s11 = inlined_call_operand.hbm [shape: f32[8,512], index: 11, kind: output, shape index: {0}]   ;;  %s7866_s12 = inlined_call_operand.hbm [shape: f32[8,128], index: 12, kind: output, shape index: {1}]  }
   0x1   :  { %19 = vsyncpa [#allocation6], 0 }
   0x2   :  { %20 = vsyncpa [#allocation9], 0 }
   0x3   :  { %21 = vsyncpa [#allocation12], 0 }
   0x4   :  { %22 = vsyncpa [#allocation15], 0 }
   0x5   :  { %23 = vsyncpa [#allocation4], 0  ;;  %s40_s23 = sshll.u32 %s7855_s1, 4  ;;  %s41_s23 = int_to_ptr.hbm [resolvable:$true] %s40_s23 }
   0x6   :  { %24 = vsyncpa [#allocation19], 0  ;;  %s7522_s24 = smov [#allocation5]   ;;  %s64_s28 = sshll.u32 %s7857_s3, 4  ;;  %s65_s28 = int_to_ptr.hbm [resolvable:$true] %s64_s28 }
   0x7   :  { %s42_s25 = sshll.u32 %s7522_s24, 4  ;;  %s7523_s29 = smov 256   ;;  %s43_s25 = int_to_ptr.vmem [resolvable:$true] %s42_s25 }
   0x8   :  { %s7524_s30 = smov 16   ;;  %s7525_s13 = smov [#allocation8]  }
   0x9   :  { %48 = dma.hbm_to_vmem [thread:$0]  %s41_s23, 16384, %s43_s25, [#allocation6], %s7523_s29, %s7523_s29, %s7524_s30  }
   0xa   :  { %s66_s14 = sshll.u32 %s7525_s13, 4  ;;  %s88_s16 = sshll.u32 %s7859_s5, 4  ;;  %s67_s14 = int_to_ptr.vmem [resolvable:$true] %s66_s14  ;;  %s89_s16 = int_to_ptr.hbm [resolvable:$true] %s88_s16 }
   0xb   :  { %72 = dma.hbm_to_vmem [thread:$0]  %s65_s28, 16384, %s67_s14, [#allocation9], %s7523_s29, %s7523_s29, %s7524_s30  }
   0xc   :  { %s117_s18 = sshll.u32 %s7862_s8, 4  ;;  %s7526_s19 = smov [#allocation11]   ;;  %s118_s18 = int_to_ptr.hbm [resolvable:$true] %s117_s18 }
   0xd   :  { %s90_s20 = sshll.u32 %s7526_s19, 4  ;;  %s7527_s21 = smov [#allocation14]   ;;  %s91_s20 = int_to_ptr.vmem [resolvable:$true] %s90_s20 }
   0xe   :  { %96 = dma.hbm_to_vmem [thread:$0]  %s89_s16, 16384, %s91_s20, [#allocation12], %s7523_s29, %s7523_s29, %s7524_s30  }
   0xf   :  { %s119_s5 = sshll.u32 %s7527_s21, 4  ;;  %s30_s24 = sshll.u32 %s7854_s0, 4  ;;  %s120_s5 = int_to_ptr.vmem [resolvable:$true] %s119_s5  ;;  %s31_s24 = int_to_ptr.hbm [resolvable:$true] %s30_s24 }
  0x10   :  { %122 = dma.hbm_to_vmem [thread:$0]  %s118_s18, 64, %s120_s5, [#allocation15]  }
  0x11   :  { %s54_s8 = sshll.u32 %s7856_s2, 4  ;;  %s7528_s27 = smov [#allocation2]   ;;  %s55_s8 = int_to_ptr.hbm [resolvable:$true] %s54_s8 }
  0x12   :  { %s32_s28 = sshll.u32 %s7528_s27, 4  ;;  %s7529_s13 = smov [#allocation7]   ;;  %s33_s28 = int_to_ptr.vmem [resolvable:$true] %s32_s28 }
  0x13   :  { %35 = dma.hbm_to_vmem [thread:$0]  %s31_s24, 512, %s33_s28, [#allocation3]  }
  0x14   :  { %s56_s14 = sshll.u32 %s7529_s13, 4  ;;  %s78_s16 = sshll.u32 %s7858_s4, 4  ;;  %s57_s14 = int_to_ptr.vmem [resolvable:$true] %s56_s14  ;;  %s79_s16 = int_to_ptr.hbm [resolvable:$true] %s78_s16 }
  0x15   :  { %59 = dma.hbm_to_vmem [thread:$0]  %s55_s8, 64, %s57_s14, [#allocation6]  }
  0x16   :  { %s103_s17 = sshll.u32 %s7861_s7, 4  ;;  %s7530_s18 = smov [#allocation10]   ;;  %s104_s17 = int_to_ptr.hbm [resolvable:$true] %s103_s17 }
  0x17   :  { %s80_s2 = sshll.u32 %s7530_s18, 4  ;;  %s7531_s19 = smov [#allocation13]   ;;  %s81_s2 = int_to_ptr.vmem [resolvable:$true] %s80_s2 }
  0x18   :  { %83 = dma.hbm_to_vmem [thread:$0]  %s79_s16, 64, %s81_s2, [#allocation9]  }
  0x19   :  { %s105_s20 = sshll.u32 %s7531_s19, 4  ;;  %s127_s22 = sshll.u32 %s7863_s9, 4  ;;  %s106_s20 = int_to_ptr.vmem [resolvable:$true] %s105_s20  ;;  %s128_s22 = int_to_ptr.hbm [resolvable:$true] %s127_s22 }
  0x1a   :  { %111 = dma.hbm_to_vmem [thread:$0]  %s104_s17, 16384, %s106_s20, [#allocation12], %s7523_s29, %s7523_s29, %s7524_s30  }
  0x1b   :  { %s7532_s4 = smov [#allocation16]   ;;  %s7533_s7 = smov 64  }
  0x1c   :  { %s129_s23 = sshll.u32 %s7532_s4, 4  ;;  %s7534_s24 = smov 4   ;;  %s130_s23 = int_to_ptr.vmem [resolvable:$true] %s129_s23 }
  0x1d   :  { %135 = dma.hbm_to_vmem [thread:$0]  %s128_s22, 4096, %s130_s23, [#allocation15], %s7533_s7, %s7533_s7, %s7534_s24  }
  0x1e   :  { %7508 = dma.done.wait [#allocation3], 512  }
  0x1f   :  { %7509 = vsyncadd [#allocation3], 4294966784 }
  0x20   :  { %7510 = dma.done.wait [#allocation6], 16448  }
  0x21   :  { %7511 = vsyncadd [#allocation6], 4294950848 }
  0x22   :  { %7512 = dma.done.wait [#allocation9], 16448  }
  0x23   :  { %7513 = vsyncadd [#allocation9], 4294950848 }
  0x24   :  { %7514 = dma.done.wait [#allocation12], 32768  }
  0x25   :  { %7515 = vsyncadd [#allocation12], 4294934528 }
  0x26   :  { %7516 = dma.done.wait [#allocation15], 4160  }
  0x27   :  { %7517 = vsyncadd [#allocation15], 4294963136  ;;  %v4622_v0 = vld [vmem:[#allocation5 + $0xe0] sm:$0xf]  ;;  %v6714_v1 = vld [vmem:[#allocation5 + $0xec] sm:$0xf0] }
  0x28   :  { %v4750_v2 = vld [vmem:[#allocation5 + $0x1e0] sm:$0xf]  ;;  %v4623_v3 = vor.u32 %v6714_v1, %v4622_v0  ;;  %v6746_v4 = vld [vmem:[#allocation5 + $0x1ec] sm:$0xf0]  ;;  %s4478_s8 = sshll.u32 %s7865_s11, 4  ;;  %s7536_s13 = smov [#allocation18]   ;;  %s4479_s8 = int_to_ptr.hbm [resolvable:$true] %s4478_s8 }
  0x29   :  { %v4878_v5 = vld [vmem:[#allocation5 + $0x2e0] sm:$0xf]  ;;  %v6778_v6 = vld [vmem:[#allocation5 + $0x2ec] sm:$0xf0]  ;;  %v4751_v7 = vor.u32 %v6746_v4, %v4750_v2  ;;  %s4487_s14 = sshll.u32 %s7536_s13, 4  ;;  %s4489_s11 = sshll.u32 %s7866_s12, 4  ;;  %s4488_s14 = int_to_ptr.vmem [resolvable:$true] %s4487_s14  ;;  %s4490_s11 = int_to_ptr.hbm [resolvable:$true] %s4489_s11 }
  0x2a   :  { %v4879_v8 = vor.u32 %v6778_v6, %v4878_v5  ;;  %v5006_v9 = vld [vmem:[#allocation5 + $0x3e0] sm:$0xf]  ;;  %v6810_v10 = vld [vmem:[#allocation5 + $0x3ec] sm:$0xf0]  ;;  %960 = vmatpush.bf16.msra.mxu0 %v4623_v3 }
  0x2b   :  { %v4606_v11 = vld [vmem:[#allocation5 + $0xc0] sm:$0xf]  ;;  %v5007_v12 = vor.u32 %v6810_v10, %v5006_v9  ;;  %v6710_v13 = vld [vmem:[#allocation5 + $0xcc] sm:$0xf0]  ;;  %973 = vmatpush.bf16.msra.mxu1 %v4751_v7 }
  0x2c   :  { %v4734_v14 = vld [vmem:[#allocation5 + $0x1c0] sm:$0xf]  ;;  %v6742_v15 = vld [vmem:[#allocation5 + $0x1cc] sm:$0xf0]  ;;  %986 = vmatpush.bf16.msra.mxu2 %v4879_v8  ;;  %v4607_v16 = vor.u32 %v6710_v13, %v4606_v11 }
  0x2d   :  { %v4735_v17 = vor.u32 %v6742_v15, %v4734_v14  ;;  %v4862_v18 = vld [vmem:[#allocation5 + $0x2c0] sm:$0xf]  ;;  %v6774_v19 = vld [vmem:[#allocation5 + $0x2cc] sm:$0xf0]  ;;  %999 = vmatpush.bf16.msra.mxu3 %v5007_v12 }
  0x2e   :  { %v4990_v20 = vld [vmem:[#allocation5 + $0x3c0] sm:$0xf]  ;;  %v4863_v21 = vor.u32 %v6774_v19, %v4862_v18  ;;  %v6806_v22 = vld [vmem:[#allocation5 + $0x3cc] sm:$0xf0]  ;;  %961 = vmatpush.bf16.msra.mxu0 %v4607_v16 }
  0x2f   :  { %v4590_v23 = vld [vmem:[#allocation5 + $0xa0] sm:$0xf]  ;;  %v6706_v24 = vld [vmem:[#allocation5 + $0xac] sm:$0xf0]  ;;  %v4991_v25 = vor.u32 %v6806_v22, %v4990_v20  ;;  %974 = vmatpush.bf16.msra.mxu1 %v4735_v17 }
  0x30   :  { %v4718_v26 = vld [vmem:[#allocation5 + $0x1a0] sm:$0xf]  ;;  %v6738_v27 = vld [vmem:[#allocation5 + $0x1ac] sm:$0xf0]  ;;  %v4591_v29 = vor.u32 %v6706_v24, %v4590_v23  ;;  %987 = vmatpush.bf16.msra.mxu2 %v4863_v21 }
  0x31   :  { %v4846_v28 = vld [vmem:[#allocation5 + $0x2a0] sm:$0xf]  ;;  %v6770_v30 = vld [vmem:[#allocation5 + $0x2ac] sm:$0xf0]  ;;  %v4719_v33 = vor.u32 %v6738_v27, %v4718_v26  ;;  %1000 = vmatpush.bf16.msra.mxu3 %v4991_v25 }
  0x32   :  { %v4974_v31 = vld [vmem:[#allocation5 + $0x3a0] sm:$0xf]  ;;  %v6802_v32 = vld [vmem:[#allocation5 + $0x3ac] sm:$0xf0]  ;;  %v4847_v34 = vor.u32 %v6770_v30, %v4846_v28  ;;  %962 = vmatpush.bf16.msra.mxu0 %v4591_v29  ;;  %v6712_v28 = vld [vmem:[#allocation5 + $0xe4] sm:$0xf] }
  0x33   :  { %v4574_v35 = vld [vmem:[#allocation5 + $0x80] sm:$0xf]  ;;  %v6702_v36 = vld [vmem:[#allocation5 + $0x8c] sm:$0xf0]  ;;  %v4975_v38 = vor.u32 %v6802_v32, %v4974_v31  ;;  %975 = vmatpush.bf16.msra.mxu1 %v4719_v33  ;;  %v4624_v29 = vld [vmem:[#allocation5 + $0xf0] sm:$0xf0] }
  0x34   :  { %v4702_v37 = vld [vmem:[#allocation5 + $0x180] sm:$0xf]  ;;  %v6734_v39 = vld [vmem:[#allocation5 + $0x18c] sm:$0xf0]  ;;  %v4575_v44 = vor.u32 %v6702_v36, %v4574_v35  ;;  %988 = vmatpush.bf16.msra.mxu2 %v4847_v34  ;;  %v6744_v30 = vld [vmem:[#allocation5 + $0x1e4] sm:$0xf] }
  0x35   :  { %v4830_v40 = vld [vmem:[#allocation5 + $0x280] sm:$0xf]  ;;  %v6766_v41 = vld [vmem:[#allocation5 + $0x28c] sm:$0xf0]  ;;  %v4703_v45 = vor.u32 %v6734_v39, %v4702_v37  ;;  %1001 = vmatpush.bf16.msra.mxu3 %v4975_v38  ;;  %v4752_v32 = vld [vmem:[#allocation5 + $0x1f0] sm:$0xf0] }
  0x36   :  { %v4958_v42 = vld [vmem:[#allocation5 + $0x380] sm:$0xf]  ;;  %v6798_v43 = vld [vmem:[#allocation5 + $0x38c] sm:$0xf0]  ;;  %v4831_v46 = vor.u32 %v6766_v41, %v4830_v40  ;;  %963 = vmatpush.bf16.msra.mxu0 %v4575_v44  ;;  %v6776_v33 = vld [vmem:[#allocation5 + $0x2e4] sm:$0xf]  ;;  %v4627_v41 = vor.u32 %v6712_v28, %v4624_v29 }
  0x37   :  { %v4558_v47 = vld [vmem:[#allocation5 + $0x60] sm:$0xf]  ;;  %v6698_v48 = vld [vmem:[#allocation5 + $0x6c] sm:$0xf0]  ;;  %v4959_v50 = vor.u32 %v6798_v43, %v4958_v42  ;;  %976 = vmatpush.bf16.msra.mxu1 %v4703_v45  ;;  %v4880_v34 = vld [vmem:[#allocation5 + $0x2f0] sm:$0xf0]  ;;  %v4755_v45 = vor.u32 %v6744_v30, %v4752_v32 }
  0x38   :  { %v4686_v49 = vld [vmem:[#allocation5 + $0x160] sm:$0xf]  ;;  %v6730_v51 = vld [vmem:[#allocation5 + $0x16c] sm:$0xf0]  ;;  %v4559_v56 = vor.u32 %v6698_v48, %v4558_v47  ;;  %989 = vmatpush.bf16.msra.mxu2 %v4831_v46  ;;  %v6808_v37 = vld [vmem:[#allocation5 + $0x3e4] sm:$0xf]  ;;  %v4883_v46 = vor.u32 %v6776_v33, %v4880_v34 }
  0x39   :  { %v4814_v52 = vld [vmem:[#allocation5 + $0x260] sm:$0xf]  ;;  %v6762_v53 = vld [vmem:[#allocation5 + $0x26c] sm:$0xf0]  ;;  %v4687_v57 = vor.u32 %v6730_v51, %v4686_v49  ;;  %1002 = vmatpush.bf16.msra.mxu3 %v4959_v50  ;;  %v5008_v38 = vld [vmem:[#allocation5 + $0x3f0] sm:$0xf0] }
  0x3a   :  { %v4942_v54 = vld [vmem:[#allocation5 + $0x360] sm:$0xf]  ;;  %v6794_v55 = vld [vmem:[#allocation5 + $0x36c] sm:$0xf0]  ;;  %v4815_v58 = vor.u32 %v6762_v53, %v4814_v52  ;;  %964 = vmatpush.bf16.msra.mxu0 %v4559_v56  ;;  %v6708_v42 = vld [vmem:[#allocation5 + $0xc4] sm:$0xf]  ;;  %v5011_v50 = vor.u32 %v6808_v37, %v5008_v38 }
  0x3b   :  { %v4542_v59 = vld [vmem:[#allocation5 + $0x40] sm:$0xf]  ;;  %v6694_v60 = vld [vmem:[#allocation5 + $0x4c] sm:$0xf0]  ;;  %v4943_v62 = vor.u32 %v6794_v55, %v4942_v54  ;;  %977 = vmatpush.bf16.msra.mxu1 %v4687_v57  ;;  %v177_v44 = vld [vmem:[#allocation2 + $0x18] sm:$0xff] }
  0x3c   :  { %v4670_v61 = vld [vmem:[#allocation5 + $0x140] sm:$0xf]  ;;  %v6726_v63 = vld [vmem:[#allocation5 + $0x14c] sm:$0xf0]  ;;  %v4543_v4 = vor.u32 %v6694_v60, %v4542_v59  ;;  %990 = vmatpush.bf16.msra.mxu2 %v4815_v58  ;;  %v4608_v47 = vld [vmem:[#allocation5 + $0xd0] sm:$0xf0]  ;;  %v7645_v58 = vpack.c.bf16 %v177_v44, %v177_v44 }
  0x3d   :  { %v4798_v0 = vld [vmem:[#allocation5 + $0x240] sm:$0xf]  ;;  %v6758_v1 = vld [vmem:[#allocation5 + $0x24c] sm:$0xf0]  ;;  %v4671_v5 = vor.u32 %v6726_v63, %v4670_v61  ;;  %1003 = vmatpush.bf16.msra.mxu3 %v4943_v62  ;;  %v6740_v48 = vld [vmem:[#allocation5 + $0x1c4] sm:$0xf]  ;;  %v4611_v59 = vor.u32 %v6708_v42, %v4608_v47 }
  0x3e   :  { %v4926_v2 = vld [vmem:[#allocation5 + $0x340] sm:$0xf]  ;;  %v6790_v3 = vld [vmem:[#allocation5 + $0x34c] sm:$0xf0]  ;;  %v4799_v6 = vor.u32 %v6758_v1, %v4798_v0  ;;  %965 = vmatpush.bf16.msra.mxu0 %v4543_v4  ;;  %v175_v49 = vld [vmem:[#allocation2 + $0x8] sm:$0xff] }
  0x3f   :  { %v4526_v7 = vld [vmem:[#allocation5 + $0x20] sm:$0xf]  ;;  %v6690_v8 = vld [vmem:[#allocation5 + $0x2c] sm:$0xf0]  ;;  %v4927_v10 = vor.u32 %v6790_v3, %v4926_v2  ;;  %978 = vmatpush.bf16.msra.mxu1 %v4671_v5  ;;  %v4736_v52 = vld [vmem:[#allocation5 + $0x1d0] sm:$0xf0]  ;;  %v7647_v60 = vpack.c.bf16 %v175_v49, %v175_v49 }
  0x40   :  { %v4654_v9 = vld [vmem:[#allocation5 + $0x120] sm:$0xf]  ;;  %v6722_v11 = vld [vmem:[#allocation5 + $0x12c] sm:$0xf0]  ;;  %v4527_v16 = vor.u32 %v6690_v8, %v4526_v7  ;;  %991 = vmatpush.bf16.msra.mxu2 %v4799_v6  ;;  %v6772_v53 = vld [vmem:[#allocation5 + $0x2c4] sm:$0xf]  ;;  %v4739_v61 = vor.u32 %v6740_v48, %v4736_v52 }
  0x41   :  { %v4782_v12 = vld [vmem:[#allocation5 + $0x220] sm:$0xf]  ;;  %v6754_v13 = vld [vmem:[#allocation5 + $0x22c] sm:$0xf0]  ;;  %v4655_v19 = vor.u32 %v6722_v11, %v4654_v9  ;;  %1004 = vmatpush.bf16.msra.mxu3 %v4927_v10  ;;  %v4864_v54 = vld [vmem:[#allocation5 + $0x2d0] sm:$0xf0] }
  0x42   :  { %v4910_v14 = vld [vmem:[#allocation5 + $0x320] sm:$0xf]  ;;  %v6786_v15 = vld [vmem:[#allocation5 + $0x32c] sm:$0xf0]  ;;  %v4783_v20 = vor.u32 %v6754_v13, %v4782_v12  ;;  %966 = vmatpush.bf16.msra.mxu0 %v4527_v16  ;;  %v6804_v55 = vld [vmem:[#allocation5 + $0x3c4] sm:$0xf]  ;;  %v4867_v62 = vor.u32 %v6772_v53, %v4864_v54 }
  0x43   :  { %v4510_v17 = vld [vmem:[#allocation5] sm:$0xf]  ;;  %v6686_v18 = vld [vmem:[#allocation5 + $0xc] sm:$0xf0]  ;;  %v4911_v24 = vor.u32 %v6786_v15, %v4910_v14  ;;  %979 = vmatpush.bf16.msra.mxu1 %v4655_v19  ;;  %v4992_v56 = vld [vmem:[#allocation5 + $0x3d0] sm:$0xf0] }
  0x44   :  { %v4638_v21 = vld [vmem:[#allocation5 + $0x100] sm:$0xf]  ;;  %v6718_v22 = vld [vmem:[#allocation5 + $0x10c] sm:$0xf0]  ;;  %v4511_v31 = vor.u32 %v6686_v18, %v4510_v17  ;;  %992 = vmatpush.bf16.msra.mxu2 %v4783_v20  ;;  %v6704_v63 = vld [vmem:[#allocation5 + $0xa4] sm:$0xf]  ;;  %v4995_v2 = vor.u32 %v6804_v55, %v4992_v56 }
  0x45   :  { %v4766_v23 = vld [vmem:[#allocation5 + $0x200] sm:$0xf]  ;;  %v6750_v25 = vld [vmem:[#allocation5 + $0x20c] sm:$0xf0]  ;;  %v4639_v35 = vor.u32 %v6718_v22, %v4638_v21  ;;  %1005 = vmatpush.bf16.msra.mxu3 %v4911_v24  ;;  %v4592_v0 = vld [vmem:[#allocation5 + $0xb0] sm:$0xf0] }
  0x46   :  { %v4894_v26 = vld [vmem:[#allocation5 + $0x300] sm:$0xf]  ;;  %v6782_v27 = vld [vmem:[#allocation5 + $0x30c] sm:$0xf0]  ;;  %v4767_v36 = vor.u32 %v6750_v25, %v4766_v23  ;;  %967 = vmatpush.bf16.msra.mxu0 %v4511_v31  ;;  %v6736_v1 = vld [vmem:[#allocation5 + $0x1a4] sm:$0xf]  ;;  %v4595_v8 = vor.u32 %v6704_v63, %v4592_v0 }
  0x47   :  { %v176_v39 = vld [vmem:[#allocation2 + $0x10] sm:$0xff]  ;;  %v4895_v40 = vor.u32 %v6782_v27, %v4894_v26  ;;  %v174_v43 = vld [vmem:[#allocation2] sm:$0xff]  ;;  %980 = vmatpush.bf16.msra.mxu1 %v4639_v35 }
  0x48   :  { %v7641_v51 = vpack.c.bf16 %v176_v39, %v176_v39  ;;  %993 = vmatpush.bf16.msra.mxu2 %v4767_v36  ;;  %v7643_v57 = vpack.c.bf16 %v174_v43, %v174_v43  ;;  %v4720_v3 = vld [vmem:[#allocation5 + $0x1b0] sm:$0xf0]  ;;  %v6768_v4 = vld [vmem:[#allocation5 + $0x2a4] sm:$0xf] }
  0x49   :  { %1006 = vmatpush.bf16.msra.mxu3 %v4895_v40  ;;  %v4848_v5 = vld [vmem:[#allocation5 + $0x2b0] sm:$0xf0]  ;;  %v6800_v6 = vld [vmem:[#allocation5 + $0x3a4] sm:$0xf]  ;;  %v4723_v9 = vor.u32 %v6736_v1, %v4720_v3 }
  0x4a   :  { %1012 = vmatpush.bf16.msrb.mxu0 %v4627_v41  ;;  %v4976_v7 = vld [vmem:[#allocation5 + $0x3b0] sm:$0xf0]  ;;  %981 = vmatmul.bf16.vlgmr.msra.gmra.mxu1 %v7647_v60  ;;  %v4851_v10 = vor.u32 %v6768_v4, %v4848_v5  ;;  %v6700_v11 = vld [vmem:[#allocation5 + $0x84] sm:$0xf] }
  0x4b   :  { %1025 = vmatpush.bf16.msrb.mxu1 %v4755_v45  ;;  %994 = vmatmul.bf16.vlgmr.msra.gmra.mxu2 %v7641_v51  ;;  %v4576_v12 = vld [vmem:[#allocation5 + $0x90] sm:$0xf0]  ;;  %v6732_v13 = vld [vmem:[#allocation5 + $0x184] sm:$0xf]  ;;  %v4979_v14 = vor.u32 %v6800_v6, %v4976_v7 }
  0x4c   :  { %1038 = vmatpush.bf16.msrb.mxu2 %v4883_v46  ;;  %968 = vmatmul.bf16.vlgmr.msra.gmra.mxu0 %v7643_v57  ;;  %v4704_v15 = vld [vmem:[#allocation5 + $0x190] sm:$0xf0]  ;;  %v6764_v16 = vld [vmem:[#allocation5 + $0x284] sm:$0xf]  ;;  %v4579_v20 = vor.u32 %v6700_v11, %v4576_v12  ;;  %v6747_v12 = vld [vmem:[#allocation5 + $0x1f4] sm:$0xf0] }
  0x4d   :  { %1051 = vmatpush.bf16.msrb.mxu3 %v5011_v50  ;;  %v4832_v17 = vld [vmem:[#allocation5 + $0x290] sm:$0xf0]  ;;  %v6796_v18 = vld [vmem:[#allocation5 + $0x384] sm:$0xf]  ;;  %v4707_v21 = vor.u32 %v6732_v13, %v4704_v15  ;;  %v4886_v13 = vld [vmem:[#allocation5 + $0x2e8] sm:$0xf] }
  0x4e   :  { %1007 = vmatmul.bf16.vlgmr.msra.gmra.mxu3 %v7645_v58  ;;  %1013 = vmatpush.bf16.msrb.mxu0 %v4611_v59  ;;  %v4960_v19 = vld [vmem:[#allocation5 + $0x390] sm:$0xf0]  ;;  %v4835_v22 = vor.u32 %v6764_v16, %v4832_v17  ;;  %v6696_v23 = vld [vmem:[#allocation5 + $0x64] sm:$0xf]  ;;  %v5014_v17 = vld [vmem:[#allocation5 + $0x3e8] sm:$0xf] }
  0x4f   :  { %1026 = vmatpush.bf16.msrb.mxu1 %v4739_v61  ;;  %v4560_v24 = vld [vmem:[#allocation5 + $0x70] sm:$0xf0]  ;;  %v6728_v25 = vld [vmem:[#allocation5 + $0x164] sm:$0xf]  ;;  %v4963_v26 = vor.u32 %v6796_v18, %v4960_v19  ;;  %v6811_v18 = vld [vmem:[#allocation5 + $0x3f4] sm:$0xf0] }
  0x50   :  { %1039 = vmatpush.bf16.msrb.mxu2 %v4867_v62  ;;  %v4688_v27 = vld [vmem:[#allocation5 + $0x170] sm:$0xf0]  ;;  %v6760_v28 = vld [vmem:[#allocation5 + $0x264] sm:$0xf]  ;;  %v4563_v32 = vor.u32 %v6696_v23, %v4560_v24  ;;  %v4614_v23 = vld [vmem:[#allocation5 + $0xc8] sm:$0xf] }
  0x51   :  { %1052 = vmatpush.bf16.msrb.mxu3 %v4995_v2  ;;  %v4816_v29 = vld [vmem:[#allocation5 + $0x270] sm:$0xf0]  ;;  %v6792_v30 = vld [vmem:[#allocation5 + $0x364] sm:$0xf]  ;;  %v4691_v33 = vor.u32 %v6728_v25, %v4688_v27  ;;  %v6711_v24 = vld [vmem:[#allocation5 + $0xd4] sm:$0xf0] }
  0x52   :  { %1014 = vmatpush.bf16.msrb.mxu0 %v4595_v8  ;;  %v4944_v31 = vld [vmem:[#allocation5 + $0x370] sm:$0xf0]  ;;  %v4819_v34 = vor.u32 %v6760_v28, %v4816_v29  ;;  %v6692_v35 = vld [vmem:[#allocation5 + $0x44] sm:$0xf]  ;;  %v4630_v8 = vld [vmem:[#allocation5 + $0xe8] sm:$0xf] }
  0x53   :  { %1027 = vmatpush.bf16.msrb.mxu1 %v4723_v9  ;;  %v4544_v36 = vld [vmem:[#allocation5 + $0x50] sm:$0xf0]  ;;  %v6724_v37 = vld [vmem:[#allocation5 + $0x144] sm:$0xf]  ;;  %v4947_v38 = vor.u32 %v6792_v30, %v4944_v31  ;;  %v6715_v9 = vld [vmem:[#allocation5 + $0xf4] sm:$0xf0] }
  0x54   :  { %1040 = vmatpush.bf16.msrb.mxu2 %v4851_v10  ;;  %v4672_v39 = vld [vmem:[#allocation5 + $0x150] sm:$0xf0]  ;;  %v6756_v40 = vld [vmem:[#allocation5 + $0x244] sm:$0xf]  ;;  %v4547_v44 = vor.u32 %v6692_v35, %v4544_v36  ;;  %v4758_v10 = vld [vmem:[#allocation5 + $0x1e8] sm:$0xf] }
  0x55   :  { %1053 = vmatpush.bf16.msrb.mxu3 %v4979_v14  ;;  %v4800_v41 = vld [vmem:[#allocation5 + $0x250] sm:$0xf0]  ;;  %v6788_v42 = vld [vmem:[#allocation5 + $0x344] sm:$0xf]  ;;  %v4675_v45 = vor.u32 %v6724_v37, %v4672_v39  ;;  %v6779_v14 = vld [vmem:[#allocation5 + $0x2f4] sm:$0xf0] }
  0x56   :  { %1015 = vmatpush.bf16.msrb.mxu0 %v4579_v20  ;;  %v4928_v43 = vld [vmem:[#allocation5 + $0x350] sm:$0xf0]  ;;  %v4803_v46 = vor.u32 %v6756_v40, %v4800_v41  ;;  %v6688_v47 = vld [vmem:[#allocation5 + $0x24] sm:$0xf]  ;;  %v4631_v20 = vor.u32 %v6715_v9, %v4630_v8  ;;  %v4742_v25 = vld [vmem:[#allocation5 + $0x1c8] sm:$0xf] }
  0x57   :  { %1028 = vmatpush.bf16.msrb.mxu1 %v4707_v21  ;;  %v4528_v48 = vld [vmem:[#allocation5 + $0x30] sm:$0xf0]  ;;  %v6720_v49 = vld [vmem:[#allocation5 + $0x124] sm:$0xf]  ;;  %v4931_v50 = vor.u32 %v6788_v42, %v4928_v43  ;;  %v4759_v21 = vor.u32 %v6747_v12, %v4758_v10  ;;  %v6743_v27 = vld [vmem:[#allocation5 + $0x1d4] sm:$0xf0] }
  0x58   :  { %1041 = vmatpush.bf16.msrb.mxu2 %v4835_v22  ;;  %v4656_v52 = vld [vmem:[#allocation5 + $0x130] sm:$0xf0]  ;;  %v6752_v53 = vld [vmem:[#allocation5 + $0x224] sm:$0xf]  ;;  %v4531_v59 = vor.u32 %v6688_v47, %v4528_v48  ;;  %v4887_v22 = vor.u32 %v6779_v14, %v4886_v13  ;;  %v4870_v28 = vld [vmem:[#allocation5 + $0x2c8] sm:$0xf] }
  0x59   :  { %1054 = vmatpush.bf16.msrb.mxu3 %v4963_v26  ;;  %v4784_v54 = vld [vmem:[#allocation5 + $0x230] sm:$0xf0]  ;;  %v6784_v55 = vld [vmem:[#allocation5 + $0x324] sm:$0xf]  ;;  %v4659_v63 = vor.u32 %v6720_v49, %v4656_v52  ;;  %v5015_v26 = vor.u32 %v6811_v18, %v5014_v17  ;;  %v6775_v29 = vld [vmem:[#allocation5 + $0x2d4] sm:$0xf0] }
  0x5a   :  { %1016 = vmatpush.bf16.msrb.mxu0 %v4563_v32  ;;  %v4912_v56 = vld [vmem:[#allocation5 + $0x330] sm:$0xf0]  ;;  %v6684_v61 = vld [vmem:[#allocation5 + $0x4] sm:$0xf]  ;;  %v4787_v0 = vor.u32 %v6752_v53, %v4784_v54  ;;  %v4998_v30 = vld [vmem:[#allocation5 + $0x3c8] sm:$0xf]  ;;  %v4615_v32 = vor.u32 %v6711_v24, %v4614_v23 }
  0x5b   :  { %1029 = vmatpush.bf16.msrb.mxu1 %v4691_v33  ;;  %v4512_v62 = vld [vmem:[#allocation5 + $0x10] sm:$0xf0]  ;;  %v6716_v1 = vld [vmem:[#allocation5 + $0x104] sm:$0xf]  ;;  %v4915_v4 = vor.u32 %v6784_v55, %v4912_v56  ;;  %v6807_v31 = vld [vmem:[#allocation5 + $0x3d4] sm:$0xf0]  ;;  %v4743_v33 = vor.u32 %v6743_v27, %v4742_v25 }
  0x5c   :  { %1042 = vmatpush.bf16.msrb.mxu2 %v4819_v34  ;;  %v4640_v2 = vld [vmem:[#allocation5 + $0x110] sm:$0xf0]  ;;  %v6748_v3 = vld [vmem:[#allocation5 + $0x204] sm:$0xf]  ;;  %v4515_v11 = vor.u32 %v6684_v61, %v4512_v62  ;;  %v4871_v34 = vor.u32 %v6775_v29, %v4870_v28  ;;  %v4598_v35 = vld [vmem:[#allocation5 + $0xa8] sm:$0xf] }
  0x5d   :  { %1055 = vmatpush.bf16.msrb.mxu3 %v4947_v38  ;;  %v4768_v5 = vld [vmem:[#allocation5 + $0x210] sm:$0xf0]  ;;  %v6780_v6 = vld [vmem:[#allocation5 + $0x304] sm:$0xf]  ;;  %v4643_v15 = vor.u32 %v6716_v1, %v4640_v2  ;;  %v6707_v36 = vld [vmem:[#allocation5 + $0xb4] sm:$0xf0]  ;;  %v4999_v38 = vor.u32 %v6807_v31, %v4998_v30 }
  0x5e   :  { %1017 = vmatpush.bf16.msrb.mxu0 %v4547_v44  ;;  %v4896_v7 = vld [vmem:[#allocation5 + $0x310] sm:$0xf0]  ;;  %v4771_v16 = vor.u32 %v6748_v3, %v4768_v5  ;;  %v4726_v37 = vld [vmem:[#allocation5 + $0x1a8] sm:$0xf]  ;;  %v6739_v39 = vld [vmem:[#allocation5 + $0x1b4] sm:$0xf0]  ;;  %v4599_v44 = vor.u32 %v6707_v36, %v4598_v35 }
  0x5f   :  { %1030 = vmatpush.bf16.msrb.mxu1 %v4675_v45  ;;  %v4899_v19 = vor.u32 %v6780_v6, %v4896_v7  ;;  %v4854_v40 = vld [vmem:[#allocation5 + $0x2a8] sm:$0xf]  ;;  %v6771_v41 = vld [vmem:[#allocation5 + $0x2b4] sm:$0xf0]  ;;  %v4727_v45 = vor.u32 %v6739_v39, %v4726_v37 }
  0x60   :  { %1043 = vmatpush.bf16.msrb.mxu2 %v4803_v46  ;;  %v4982_v42 = vld [vmem:[#allocation5 + $0x3a8] sm:$0xf]  ;;  %v6803_v43 = vld [vmem:[#allocation5 + $0x3b4] sm:$0xf0]  ;;  %v4855_v46 = vor.u32 %v6771_v41, %v4854_v40 }
  0x61   :  { %1056 = vmatpush.bf16.msrb.mxu3 %v4931_v50  ;;  %v4582_v47 = vld [vmem:[#allocation5 + $0x88] sm:$0xf]  ;;  %v6703_v48 = vld [vmem:[#allocation5 + $0x94] sm:$0xf0]  ;;  %v4983_v50 = vor.u32 %v6803_v43, %v4982_v42 }
  0x62   :  { %1018 = vmatpush.bf16.msrb.mxu0 %v4531_v59  ;;  %v4710_v49 = vld [vmem:[#allocation5 + $0x188] sm:$0xf]  ;;  %v6735_v52 = vld [vmem:[#allocation5 + $0x194] sm:$0xf0]  ;;  %v4583_v59 = vor.u32 %v6703_v48, %v4582_v47  ;;  %v4760_v48 = vld [vmem:[#allocation5 + $0x1f8] sm:$0xf0] }
  0x63   :  { %1031 = vmatpush.bf16.msrb.mxu1 %v4659_v63  ;;  %v4838_v53 = vld [vmem:[#allocation5 + $0x288] sm:$0xf]  ;;  %v6767_v54 = vld [vmem:[#allocation5 + $0x294] sm:$0xf0]  ;;  %v4711_v61 = vor.u32 %v6735_v52, %v4710_v49  ;;  %v6777_v49 = vld [vmem:[#allocation5 + $0x2ec] sm:$0xf] }
  0x64   :  { %1044 = vmatpush.bf16.msrb.mxu2 %v4787_v0  ;;  %v4966_v55 = vld [vmem:[#allocation5 + $0x388] sm:$0xf]  ;;  %v6799_v56 = vld [vmem:[#allocation5 + $0x394] sm:$0xf0]  ;;  %v4839_v62 = vor.u32 %v6767_v54, %v4838_v53  ;;  %v6809_v54 = vld [vmem:[#allocation5 + $0x3ec] sm:$0xf] }
  0x65   :  { %1057 = vmatpush.bf16.msrb.mxu3 %v4915_v4  ;;  %v4566_v63 = vld [vmem:[#allocation5 + $0x68] sm:$0xf]  ;;  %v6699_v0 = vld [vmem:[#allocation5 + $0x74] sm:$0xf0]  ;;  %v4967_v2 = vor.u32 %v6799_v56, %v4966_v55  ;;  %v5016_v55 = vld [vmem:[#allocation5 + $0x3f8] sm:$0xf0] }
  0x66   :  { %1019 = vmatpush.bf16.msrb.mxu0 %v4515_v11  ;;  %v4694_v1 = vld [vmem:[#allocation5 + $0x168] sm:$0xf]  ;;  %v6731_v3 = vld [vmem:[#allocation5 + $0x174] sm:$0xf0]  ;;  %v4567_v8 = vor.u32 %v6699_v0, %v4566_v63  ;;  %v6709_v63 = vld [vmem:[#allocation5 + $0xcc] sm:$0xf] }
  0x67   :  { %1032 = vmatpush.bf16.msrb.mxu1 %v4643_v15  ;;  %v4822_v4 = vld [vmem:[#allocation5 + $0x268] sm:$0xf]  ;;  %v6763_v5 = vld [vmem:[#allocation5 + $0x274] sm:$0xf0]  ;;  %v4695_v9 = vor.u32 %v6731_v3, %v4694_v1  ;;  %v4616_v0 = vld [vmem:[#allocation5 + $0xd8] sm:$0xf0] }
  0x68   :  { %1045 = vmatpush.bf16.msrb.mxu2 %v4771_v16  ;;  %v4950_v6 = vld [vmem:[#allocation5 + $0x368] sm:$0xf]  ;;  %v6795_v7 = vld [vmem:[#allocation5 + $0x374] sm:$0xf0]  ;;  %v4823_v10 = vor.u32 %v6763_v5, %v4822_v4  ;;  %v6741_v1 = vld [vmem:[#allocation5 + $0x1cc] sm:$0xf] }
  0x69   :  { %1058 = vmatpush.bf16.msrb.mxu3 %v4899_v19  ;;  %1020 = vmatmul.bf16.vlgmr.msrb.gmra.mxu0 %v7643_v57  ;;  %v4550_v11 = vld [vmem:[#allocation5 + $0x48] sm:$0xf]  ;;  %v6695_v12 = vld [vmem:[#allocation5 + $0x54] sm:$0xf0]  ;;  %v4951_v14 = vor.u32 %v6795_v7, %v4950_v6  ;;  %v4744_v3 = vld [vmem:[#allocation5 + $0x1d8] sm:$0xf0] }
  0x6a   :  { %1064 = vmatpush.bf16.msra.mxu0 %v4631_v20  ;;  %1033 = vmatmul.bf16.vlgmr.msrb.gmra.mxu1 %v7647_v60  ;;  %v4678_v13 = vld [vmem:[#allocation5 + $0x148] sm:$0xf]  ;;  %v6727_v15 = vld [vmem:[#allocation5 + $0x154] sm:$0xf0]  ;;  %v4551_v20 = vor.u32 %v6695_v12, %v4550_v11  ;;  %v6773_v4 = vld [vmem:[#allocation5 + $0x2cc] sm:$0xf] }
  0x6b   :  { %1077 = vmatpush.bf16.msra.mxu1 %v4759_v21  ;;  %1046 = vmatmul.bf16.vlgmr.msrb.gmra.mxu2 %v7641_v51  ;;  %v4806_v16 = vld [vmem:[#allocation5 + $0x248] sm:$0xf]  ;;  %v6759_v17 = vld [vmem:[#allocation5 + $0x254] sm:$0xf0]  ;;  %v4679_v21 = vor.u32 %v6727_v15, %v4678_v13  ;;  %v4872_v5 = vld [vmem:[#allocation5 + $0x2d8] sm:$0xf0] }
  0x6c   :  { %1090 = vmatpush.bf16.msra.mxu2 %v4887_v22  ;;  %1059 = vmatmul.bf16.vlgmr.msrb.gmra.mxu3 %v7645_v58  ;;  %v4934_v18 = vld [vmem:[#allocation5 + $0x348] sm:$0xf]  ;;  %v6791_v19 = vld [vmem:[#allocation5 + $0x354] sm:$0xf0]  ;;  %v4807_v22 = vor.u32 %v6759_v17, %v4806_v16  ;;  %v6805_v6 = vld [vmem:[#allocation5 + $0x3cc] sm:$0xf] }
  0x6d   :  { %1103 = vmatpush.bf16.msra.mxu3 %v5015_v26  ;;  %v4534_v23 = vld [vmem:[#allocation5 + $0x28] sm:$0xf]  ;;  %v6691_v24 = vld [vmem:[#allocation5 + $0x34] sm:$0xf0]  ;;  %v4935_v26 = vor.u32 %v6791_v19, %v4934_v18  ;;  %v5000_v7 = vld [vmem:[#allocation5 + $0x3d8] sm:$0xf0] }
  0x6e   :  { %1065 = vmatpush.bf16.msra.mxu0 %v4615_v32  ;;  %v4662_v25 = vld [vmem:[#allocation5 + $0x128] sm:$0xf]  ;;  %v6723_v27 = vld [vmem:[#allocation5 + $0x134] sm:$0xf0]  ;;  %v4535_v32 = vor.u32 %v6691_v24, %v4534_v23  ;;  %v6705_v11 = vld [vmem:[#allocation5 + $0xac] sm:$0xf] }
  0x6f   :  { %1078 = vmatpush.bf16.msra.mxu1 %v4743_v33  ;;  %v4790_v28 = vld [vmem:[#allocation5 + $0x228] sm:$0xf]  ;;  %v6755_v29 = vld [vmem:[#allocation5 + $0x234] sm:$0xf0]  ;;  %v4663_v35 = vor.u32 %v6723_v27, %v4662_v25  ;;  %v4600_v12 = vld [vmem:[#allocation5 + $0xb8] sm:$0xf0] }
  0x70   :  { %1091 = vmatpush.bf16.msra.mxu2 %v4871_v34  ;;  %v4918_v30 = vld [vmem:[#allocation5 + $0x328] sm:$0xf]  ;;  %v6787_v31 = vld [vmem:[#allocation5 + $0x334] sm:$0xf0]  ;;  %v4791_v36 = vor.u32 %v6755_v29, %v4790_v28  ;;  %v6737_v13 = vld [vmem:[#allocation5 + $0x1ac] sm:$0xf] }
  0x71   :  { %1104 = vmatpush.bf16.msra.mxu3 %v4999_v38  ;;  %v4518_v33 = vld [vmem:[#allocation5 + $0x8] sm:$0xf]  ;;  %v6687_v34 = vld [vmem:[#allocation5 + $0x14] sm:$0xf0]  ;;  %v4919_v40 = vor.u32 %v6787_v31, %v4918_v30  ;;  %v4728_v15 = vld [vmem:[#allocation5 + $0x1b8] sm:$0xf0] }
  0x72   :  { %1066 = vmatpush.bf16.msra.mxu0 %v4599_v44  ;;  %v4646_v37 = vld [vmem:[#allocation5 + $0x108] sm:$0xf]  ;;  %v6719_v38 = vld [vmem:[#allocation5 + $0x114] sm:$0xf0]  ;;  %v6713_v44 = vld [vmem:[#allocation5 + $0xec] sm:$0xf]  ;;  %v4519_v47 = vor.u32 %v6687_v34, %v4518_v33 }
  0x73   :  { %1079 = vmatpush.bf16.msra.mxu1 %v4727_v45  ;;  %v4774_v39 = vld [vmem:[#allocation5 + $0x208] sm:$0xf]  ;;  %v6751_v41 = vld [vmem:[#allocation5 + $0x214] sm:$0xf0]  ;;  %v4632_v45 = vld [vmem:[#allocation5 + $0xf8] sm:$0xf0]  ;;  %v4647_v52 = vor.u32 %v6719_v38, %v4646_v37 }
  0x74   :  { %1092 = vmatpush.bf16.msra.mxu2 %v4855_v46  ;;  %v4902_v42 = vld [vmem:[#allocation5 + $0x308] sm:$0xf]  ;;  %v6783_v43 = vld [vmem:[#allocation5 + $0x314] sm:$0xf0]  ;;  %v6745_v46 = vld [vmem:[#allocation5 + $0x1ec] sm:$0xf]  ;;  %v4775_v53 = vor.u32 %v6751_v41, %v4774_v39 }
  0x75   :  { %1105 = vmatpush.bf16.msra.mxu3 %v4983_v50  ;;  %v4888_v50 = vld [vmem:[#allocation5 + $0x2f8] sm:$0xf0]  ;;  %v4903_v56 = vor.u32 %v6783_v43, %v4902_v42  ;;  %v6769_v16 = vld [vmem:[#allocation5 + $0x2ac] sm:$0xf] }
  0x76   :  { %1067 = vmatpush.bf16.msra.mxu0 %v4583_v59  ;;  %v4635_v59 = vor.u32 %v6713_v44, %v4632_v45  ;;  %v4856_v17 = vld [vmem:[#allocation5 + $0x2b8] sm:$0xf0]  ;;  %v6801_v18 = vld [vmem:[#allocation5 + $0x3ac] sm:$0xf] }
  0x77   :  { %1080 = vmatpush.bf16.msra.mxu1 %v4711_v61  ;;  %v4763_v61 = vor.u32 %v6745_v46, %v4760_v48  ;;  %v4984_v19 = vld [vmem:[#allocation5 + $0x3b8] sm:$0xf0]  ;;  %v6701_v23 = vld [vmem:[#allocation5 + $0x8c] sm:$0xf] }
  0x78   :  { %1093 = vmatpush.bf16.msra.mxu2 %v4839_v62  ;;  %v4891_v62 = vor.u32 %v6777_v49, %v4888_v50  ;;  %v4584_v24 = vld [vmem:[#allocation5 + $0x98] sm:$0xf0]  ;;  %v6733_v25 = vld [vmem:[#allocation5 + $0x18c] sm:$0xf] }
  0x79   :  { %1106 = vmatpush.bf16.msra.mxu3 %v4967_v2  ;;  %v5019_v2 = vor.u32 %v6809_v54, %v5016_v55  ;;  %v4712_v27 = vld [vmem:[#allocation5 + $0x198] sm:$0xf0]  ;;  %v6765_v28 = vld [vmem:[#allocation5 + $0x28c] sm:$0xf] }
  0x7a   :  { %1068 = vmatpush.bf16.msra.mxu0 %v4567_v8  ;;  %v4619_v8 = vor.u32 %v6709_v63, %v4616_v0  ;;  %v4840_v29 = vld [vmem:[#allocation5 + $0x298] sm:$0xf0]  ;;  %v6797_v30 = vld [vmem:[#allocation5 + $0x38c] sm:$0xf]  ;;  %v4715_v33 = vor.u32 %v6733_v25, %v4712_v27 }
  0x7b   :  { %1081 = vmatpush.bf16.msra.mxu1 %v4695_v9  ;;  %v4747_v9 = vor.u32 %v6741_v1, %v4744_v3  ;;  %v4968_v31 = vld [vmem:[#allocation5 + $0x398] sm:$0xf0]  ;;  %v4843_v34 = vor.u32 %v6765_v28, %v4840_v29  ;;  %v6729_v37 = vld [vmem:[#allocation5 + $0x16c] sm:$0xf]  ;;  %v5118_v29 = vld [vmem:[#allocation8 + $0xc0] sm:$0xf] }
  0x7c   :  { %1094 = vmatpush.bf16.msra.mxu2 %v4823_v10  ;;  %v4875_v10 = vor.u32 %v6773_v4, %v4872_v5  ;;  %v4971_v38 = vor.u32 %v6797_v30, %v4968_v31  ;;  %v4696_v39 = vld [vmem:[#allocation5 + $0x178] sm:$0xf0]  ;;  %v6793_v42 = vld [vmem:[#allocation5 + $0x36c] sm:$0xf]  ;;  %v6838_v30 = vld [vmem:[#allocation8 + $0xcc] sm:$0xf0] }
  0x7d   :  { %1107 = vmatpush.bf16.msra.mxu3 %v4951_v14  ;;  %v5003_v14 = vor.u32 %v6805_v6, %v5000_v7  ;;  %v4824_v41 = vld [vmem:[#allocation5 + $0x278] sm:$0xf0]  ;;  %v4699_v45 = vor.u32 %v6729_v37, %v4696_v39  ;;  %v6725_v49 = vld [vmem:[#allocation5 + $0x14c] sm:$0xf]  ;;  %v6866_v39 = vld [vmem:[#allocation8 + $0x1ac] sm:$0xf0] }
  0x7e   :  { %1069 = vmatpush.bf16.msra.mxu0 %v4551_v20  ;;  %v4603_v20 = vor.u32 %v6705_v11, %v4600_v12  ;;  %v4952_v43 = vld [vmem:[#allocation5 + $0x378] sm:$0xf0]  ;;  %v6789_v55 = vld [vmem:[#allocation5 + $0x34c] sm:$0xf] }
  0x7f   :  { %1082 = vmatpush.bf16.msra.mxu1 %v4679_v21  ;;  %v4731_v21 = vor.u32 %v6737_v13, %v4728_v15  ;;  %v4552_v48 = vld [vmem:[#allocation5 + $0x58] sm:$0xf0]  ;;  %v4955_v50 = vor.u32 %v6793_v42, %v4952_v43  ;;  %v6689_v63 = vld [vmem:[#allocation5 + $0x2c] sm:$0xf]  ;;  %v6830_v42 = vld [vmem:[#allocation8 + $0x8c] sm:$0xf0] }
  0x80   :  { %1095 = vmatpush.bf16.msra.mxu2 %v4807_v22  ;;  %v4859_v22 = vor.u32 %v6769_v16, %v4856_v17  ;;  %v4808_v54 = vld [vmem:[#allocation5 + $0x258] sm:$0xf0]  ;;  %v6721_v1 = vld [vmem:[#allocation5 + $0x12c] sm:$0xf] }
  0x81   :  { %1108 = vmatpush.bf16.msra.mxu3 %v4935_v26  ;;  %v4987_v26 = vor.u32 %v6801_v18, %v4984_v19  ;;  %v4536_v0 = vld [vmem:[#allocation5 + $0x38] sm:$0xf0]  ;;  %v6753_v4 = vld [vmem:[#allocation5 + $0x22c] sm:$0xf] }
  0x82   :  { %1070 = vmatpush.bf16.msra.mxu0 %v4535_v32  ;;  %v4587_v32 = vor.u32 %v6701_v23, %v4584_v24  ;;  %v4664_v3 = vld [vmem:[#allocation5 + $0x138] sm:$0xf0]  ;;  %v6785_v6 = vld [vmem:[#allocation5 + $0x32c] sm:$0xf]  ;;  %v5262_v23 = vld [vmem:[#allocation8 + $0x1e0] sm:$0xf] }
  0x83   :  { %1083 = vmatpush.bf16.msra.mxu1 %v4663_v35  ;;  %v6697_v35 = vld [vmem:[#allocation5 + $0x6c] sm:$0xf]  ;;  %v4792_v5 = vld [vmem:[#allocation5 + $0x238] sm:$0xf0]  ;;  %v6874_v24 = vld [vmem:[#allocation8 + $0x1ec] sm:$0xf0] }
  0x84   :  { %1096 = vmatpush.bf16.msra.mxu2 %v4791_v36  ;;  %v4568_v36 = vld [vmem:[#allocation5 + $0x78] sm:$0xf0]  ;;  %v4795_v11 = vor.u32 %v6753_v4, %v4792_v5  ;;  %v6717_v13 = vld [vmem:[#allocation5 + $0x10c] sm:$0xf]  ;;  %v5263_v31 = vor.u32 %v6874_v24, %v5262_v23  ;;  %v5390_v5 = vld [vmem:[#allocation8 + $0x2e0] sm:$0xf] }
  0x85   :  { %1109 = vmatpush.bf16.msra.mxu3 %v4919_v40  ;;  %v6761_v40 = vld [vmem:[#allocation5 + $0x26c] sm:$0xf]  ;;  %v4571_v44 = vor.u32 %v6697_v35, %v4568_v36  ;;  %v4920_v7 = vld [vmem:[#allocation5 + $0x338] sm:$0xf0]  ;;  %v5102_v35 = vld [vmem:[#allocation8 + $0xa0] sm:$0xf] }
  0x86   :  { %1071 = vmatpush.bf16.msra.mxu0 %v4519_v47  ;;  %v4827_v46 = vor.u32 %v6761_v40, %v4824_v41  ;;  %v6693_v47 = vld [vmem:[#allocation5 + $0x4c] sm:$0xf]  ;;  %v4520_v12 = vld [vmem:[#allocation5 + $0x18] sm:$0xf0]  ;;  %v4923_v15 = vor.u32 %v6785_v6, %v4920_v7  ;;  %v6834_v36 = vld [vmem:[#allocation8 + $0xac] sm:$0xf0] }
  0x87   :  { %1084 = vmatpush.bf16.msra.mxu1 %v4647_v52  ;;  %v4680_v52 = vld [vmem:[#allocation5 + $0x158] sm:$0xf0]  ;;  %v6749_v16 = vld [vmem:[#allocation5 + $0x20c] sm:$0xf]  ;;  %v5103_v40 = vor.u32 %v6834_v36, %v5102_v35  ;;  %v5086_v41 = vld [vmem:[#allocation8 + $0x80] sm:$0xf] }
  0x88   :  { %1097 = vmatpush.bf16.msra.mxu2 %v4775_v53  ;;  %v6757_v53 = vld [vmem:[#allocation5 + $0x24c] sm:$0xf]  ;;  %v4776_v17 = vld [vmem:[#allocation5 + $0x218] sm:$0xf0]  ;;  %v6906_v6 = vld [vmem:[#allocation8 + $0x2ec] sm:$0xf0] }
  0x89   :  { %1110 = vmatpush.bf16.msra.mxu3 %v4903_v56  ;;  %1072 = vmatmul.bf16.vlgmr.msra.gmra.mxu0 %v7643_v57  ;;  %v4936_v56 = vld [vmem:[#allocation5 + $0x358] sm:$0xf0]  ;;  %v6781_v18 = vld [vmem:[#allocation5 + $0x30c] sm:$0xf]  ;;  %v5136_v7 = vld [vmem:[#allocation8 + $0xf0] sm:$0xf0] }
  0x8a   :  { %1116 = vmatpush.bf16.msrb.mxu0 %v4635_v59  ;;  %1085 = vmatmul.bf16.vlgmr.msra.gmra.mxu1 %v7647_v60  ;;  %v4555_v59 = vor.u32 %v6693_v47, %v4552_v48  ;;  %v4904_v19 = vld [vmem:[#allocation5 + $0x318] sm:$0xf0]  ;;  %v6826_v47 = vld [vmem:[#allocation8 + $0x6c] sm:$0xf0]  ;;  %v5198_v48 = vld [vmem:[#allocation8 + $0x160] sm:$0xf] }
  0x8b   :  { %1129 = vmatpush.bf16.msrb.mxu1 %v4763_v61  ;;  %1098 = vmatmul.bf16.vlgmr.msra.gmra.mxu2 %v7641_v51  ;;  %v4683_v61 = vor.u32 %v6725_v49, %v4680_v52  ;;  %v4907_v27 = vor.u32 %v6781_v18, %v4904_v19  ;;  %v6836_v18 = vld [vmem:[#allocation8 + $0xc4] sm:$0xf]  ;;  %v5120_v19 = vld [vmem:[#allocation8 + $0xd0] sm:$0xf0]  ;;  %v5342_v35 = vld [vmem:[#allocation8 + $0x280] sm:$0xf] }
  0x8c   :  { %1142 = vmatpush.bf16.msrb.mxu2 %v4891_v62  ;;  %1111 = vmatmul.bf16.vlgmr.msra.gmra.mxu3 %v7645_v58  ;;  %v4811_v62 = vor.u32 %v6757_v53, %v4808_v54  ;;  %v5182_v53 = vld [vmem:[#allocation8 + $0x140] sm:$0xf]  ;;  %v6854_v54 = vld [vmem:[#allocation8 + $0x14c] sm:$0xf0]  ;;  %v5248_v23 = vld [vmem:[#allocation8 + $0x1d0] sm:$0xf0]  ;;  %v5123_v24 = vor.u32 %v6836_v18, %v5120_v19 }
  0x8d   :  { %1155 = vmatpush.bf16.msrb.mxu3 %v5019_v2  ;;  %v4939_v2 = vor.u32 %v6789_v55, %v4936_v56  ;;  %v5038_v56 = vld [vmem:[#allocation8 + $0x20] sm:$0xf]  ;;  %v6894_v36 = vld [vmem:[#allocation8 + $0x28c] sm:$0xf0]  ;;  %v6812_v18 = vld [vmem:[#allocation8 + $0x4] sm:$0xf] }
  0x8e   :  { %1117 = vmatpush.bf16.msrb.mxu0 %v4619_v8  ;;  %v4539_v8 = vor.u32 %v6689_v63, %v4536_v0  ;;  %v6850_v63 = vld [vmem:[#allocation8 + $0x12c] sm:$0xf0]  ;;  %v5024_v19 = vld [vmem:[#allocation8 + $0x10] sm:$0xf0] }
  0x8f   :  { %1130 = vmatpush.bf16.msrb.mxu1 %v4747_v9  ;;  %v6685_v9 = vld [vmem:[#allocation5 + $0xc] sm:$0xf] }
  0x90   :  { %1143 = vmatpush.bf16.msrb.mxu2 %v4875_v10  ;;  %v4667_v10 = vor.u32 %v6721_v1, %v4664_v3  ;;  %v5022_v1 = vld [vmem:[#allocation8] sm:$0xf]  ;;  %v6840_v3 = vld [vmem:[#allocation8 + $0xe4] sm:$0xf] }
  0x91   :  { %1156 = vmatpush.bf16.msrb.mxu3 %v5003_v14  ;;  %v4648_v14 = vld [vmem:[#allocation5 + $0x118] sm:$0xf0] }
  0x92   :  { %1118 = vmatpush.bf16.msrb.mxu0 %v4603_v20  ;;  %v5134_v20 = vld [vmem:[#allocation8 + $0xe0] sm:$0xf]  ;;  %v4651_v25 = vor.u32 %v6717_v13, %v4648_v14  ;;  %v5139_v14 = vor.u32 %v6840_v3, %v5136_v7  ;;  %v6882_v7 = vld [vmem:[#allocation8 + $0x22c] sm:$0xf0] }
  0x93   :  { %1131 = vmatpush.bf16.msrb.mxu1 %v4731_v21  ;;  %v6842_v21 = vld [vmem:[#allocation8 + $0xec] sm:$0xf0] }
  0x94   :  { %1144 = vmatpush.bf16.msrb.mxu2 %v4859_v22  ;;  %v4523_v22 = vor.u32 %v6685_v9, %v4520_v12  ;;  %v5135_v28 = vor.u32 %v6842_v21, %v5134_v20  ;;  %v6846_v9 = vld [vmem:[#allocation8 + $0x10c] sm:$0xf0]  ;;  %v5264_v12 = vld [vmem:[#allocation8 + $0x1f0] sm:$0xf0] }
  0x95   :  { %1157 = vmatpush.bf16.msrb.mxu3 %v4987_v26  ;;  %v4779_v26 = vor.u32 %v6749_v16, %v4776_v17  ;;  %v5374_v16 = vld [vmem:[#allocation8 + $0x2c0] sm:$0xf]  ;;  %v6902_v17 = vld [vmem:[#allocation8 + $0x2cc] sm:$0xf0] }
  0x96   :  { %1119 = vmatpush.bf16.msrb.mxu0 %v4587_v32  ;;  %v5246_v32 = vld [vmem:[#allocation8 + $0x1c0] sm:$0xf]  ;;  %v5375_v21 = vor.u32 %v6902_v17, %v5374_v16  ;;  %v5168_v16 = vld [vmem:[#allocation8 + $0x130] sm:$0xf0] }
  0x97   :  { %1132 = vmatpush.bf16.msrb.mxu1 %v4715_v33  ;;  %v6870_v33 = vld [vmem:[#allocation8 + $0x1cc] sm:$0xf0] }
  0x98   :  { %1145 = vmatpush.bf16.msrb.mxu2 %v4843_v34  ;;  %v5119_v34 = vor.u32 %v6838_v30, %v5118_v29  ;;  %v5247_v37 = vor.u32 %v6870_v33, %v5246_v32  ;;  %v5232_v32 = vld [vmem:[#allocation8 + $0x1b0] sm:$0xf0]  ;;  %v7665_v33 = vld [vmem:[#allocation7] sm:$0xf] }
  0x99   :  { %1158 = vmatpush.bf16.msrb.mxu3 %v4971_v38  ;;  %v5230_v38 = vld [vmem:[#allocation8 + $0x1a0] sm:$0xf] }
  0x9a   :  { %1120 = vmatpush.bf16.msrb.mxu0 %v4571_v44  ;;  %v5231_v43 = vor.u32 %v6866_v39, %v5230_v38  ;;  %v5214_v44 = vld [vmem:[#allocation8 + $0x180] sm:$0xf]  ;;  %v5088_v38 = vld [vmem:[#allocation8 + $0x90] sm:$0xf0] }
  0x9b   :  { %1133 = vmatpush.bf16.msrb.mxu1 %v4699_v45  ;;  %v5087_v45 = vor.u32 %v6830_v42, %v5086_v41  ;;  %v312_v41 = vperm.slane %v7665_v33, 0  ;;  %v6860_v42 = vld [vmem:[#allocation8 + $0x184] sm:$0xf] }
  0x9c   :  { %1146 = vmatpush.bf16.msrb.mxu2 %v4827_v46  ;;  %v5070_v46 = vld [vmem:[#allocation8 + $0x60] sm:$0xf] }
  0x9d   :  { %1159 = vmatpush.bf16.msrb.mxu3 %v4955_v50  ;;  %v5071_v49 = vor.u32 %v6826_v47, %v5070_v46  ;;  %v5054_v50 = vld [vmem:[#allocation8 + $0x40] sm:$0xf]  ;;  %v6824_v47 = vld [vmem:[#allocation8 + $0x64] sm:$0xf] }
  0x9e   :  { %1121 = vmatpush.bf16.msrb.mxu0 %v4555_v59  ;;  %v6818_v59 = vld [vmem:[#allocation8 + $0x2c] sm:$0xf0] }
  0x9f   :  { %1134 = vmatpush.bf16.msrb.mxu1 %v4683_v61  ;;  %v5183_v61 = vor.u32 %v6854_v54, %v5182_v53  ;;  %v5039_v0 = vor.u32 %v6818_v59, %v5038_v56  ;;  %v6886_v56 = vld [vmem:[#allocation8 + $0x24c] sm:$0xf0]  ;;  %v6820_v59 = vld [vmem:[#allocation8 + $0x44] sm:$0xf] }
  0xa0   :  { %1147 = vmatpush.bf16.msrb.mxu2 %v4811_v62  ;;  %v5166_v62 = vld [vmem:[#allocation8 + $0x120] sm:$0xf] }
  0xa1   :  { %1160 = vmatpush.bf16.msrb.mxu3 %v4939_v2  ;;  %v6814_v2 = vld [vmem:[#allocation8 + $0xc] sm:$0xf0]  ;;  %v5167_v4 = vor.u32 %v6850_v63, %v5166_v62 }
  0xa2   :  { %1122 = vmatpush.bf16.msrb.mxu0 %v4539_v8  ;;  %v5150_v8 = vld [vmem:[#allocation8 + $0x100] sm:$0xf]  ;;  %v5023_v13 = vor.u32 %v6814_v2, %v5022_v1  ;;  %v6852_v1 = vld [vmem:[#allocation8 + $0x144] sm:$0xf]  ;;  %v5184_v2 = vld [vmem:[#allocation8 + $0x150] sm:$0xf0] }
  0xa3   :  { %1135 = vmatpush.bf16.msrb.mxu1 %v4667_v10  ;;  %v5391_v10 = vor.u32 %v6906_v6, %v5390_v5  ;;  %v5294_v6 = vld [vmem:[#allocation8 + $0x220] sm:$0xf] }
  0xa4   :  { %1148 = vmatpush.bf16.msrb.mxu2 %v4795_v11  ;;  %v6872_v11 = vld [vmem:[#allocation8 + $0x1e4] sm:$0xf] }
  0xa5   :  { %1161 = vmatpush.bf16.msrb.mxu3 %v4923_v15  ;;  %v5151_v15 = vor.u32 %v6846_v9, %v5150_v8  ;;  %v5267_v20 = vor.u32 %v6872_v11, %v5264_v12  ;;  %v6816_v9 = vld [vmem:[#allocation8 + $0x24] sm:$0xf]  ;;  %v5187_v12 = vor.u32 %v6852_v1, %v5184_v2  ;;  %v5344_v2 = vld [vmem:[#allocation8 + $0x290] sm:$0xf0] }
  0xa6   :  { %1123 = vmatpush.bf16.msrb.mxu0 %v4523_v22  ;;  %v6868_v22 = vld [vmem:[#allocation8 + $0x1c4] sm:$0xf] }
  0xa7   :  { %1136 = vmatpush.bf16.msrb.mxu1 %v4651_v25  ;;  %v5358_v25 = vld [vmem:[#allocation8 + $0x2a0] sm:$0xf]  ;;  %v5251_v29 = vor.u32 %v6868_v22, %v5248_v23  ;;  %v6843_v22 = vld [vmem:[#allocation8 + $0xf4] sm:$0xf0] }
  0xa8   :  { %1149 = vmatpush.bf16.msrb.mxu2 %v4779_v26  ;;  %v6898_v26 = vld [vmem:[#allocation8 + $0x2ac] sm:$0xf0]  ;;  %v5278_v23 = vld [vmem:[#allocation8 + $0x200] sm:$0xf] }
  0xa9   :  { %1162 = vmatpush.bf16.msrb.mxu3 %v4907_v27  ;;  %1124 = vmatmul.bf16.vlgmr.msrb.gmra.mxu0 %v7643_v57  ;;  %v6862_v57 = vld [vmem:[#allocation8 + $0x18c] sm:$0xf0]  ;;  %v6832_v27 = vld [vmem:[#allocation8 + $0xa4] sm:$0xf]  ;;  %v5359_v30 = vor.u32 %v6898_v26, %v5358_v25 }
  0xaa   :  { %1954 = vmatpush.bf16.msra.mxu0 %v5135_v28  ;;  %1137 = vmatmul.bf16.vlgmr.msrb.gmra.mxu1 %v7647_v60  ;;  %v5215_v60 = vor.u32 %v6862_v57, %v5214_v44  ;;  %v5104_v28 = vld [vmem:[#allocation8 + $0xb0] sm:$0xf0]  ;;  %v5326_v57 = vld [vmem:[#allocation8 + $0x260] sm:$0xf] }
  0xab   :  { %1967 = vmatpush.bf16.msra.mxu1 %v5263_v31  ;;  %1150 = vmatmul.bf16.vlgmr.msrb.gmra.mxu2 %v7641_v51  ;;  %v6858_v51 = vld [vmem:[#allocation8 + $0x16c] sm:$0xf0]  ;;  %v6864_v31 = vld [vmem:[#allocation8 + $0x1a4] sm:$0xf] }
  0xac   :  { %1163 = vmatmul.bf16.vlgmr.msrb.gmra.mxu3 %v7645_v58  ;;  %v6822_v58 = vld [vmem:[#allocation8 + $0x4c] sm:$0xf0]  ;;  %v5199_v52 = vor.u32 %v6858_v51, %v5198_v48  ;;  %1980 = vmatpush.bf16.msra.mxu2 %v5391_v10  ;;  %v5235_v39 = vor.u32 %v6864_v31, %v5232_v32  ;;  %v5040_v10 = vld [vmem:[#allocation8 + $0x30] sm:$0xf0] }
  0xad   :  { %v5055_v55 = vor.u32 %v6822_v58, %v5054_v50  ;;  %v6856_v58 = vld [vmem:[#allocation8 + $0x164] sm:$0xf]  ;;  %v5152_v32 = vld [vmem:[#allocation8 + $0x110] sm:$0xf0] }
  0xae   :  { %1955 = vmatpush.bf16.msra.mxu0 %v5119_v34  ;;  %v5107_v34 = vor.u32 %v6832_v27, %v5104_v28  ;;  %v6844_v28 = vld [vmem:[#allocation8 + $0x104] sm:$0xf] }
  0xaf   :  { %1968 = vmatpush.bf16.msra.mxu1 %v5247_v37  ;;  %v6828_v37 = vld [vmem:[#allocation8 + $0x84] sm:$0xf] }
  0xb0   :  { %1981 = vmatpush.bf16.msra.mxu2 %v5375_v21  ;;  %v5091_v44 = vor.u32 %v6828_v37, %v5088_v38  ;;  %v5142_v21 = vld [vmem:[#allocation8 + $0xe8] sm:$0xf] }
  0xb2   :  { %1956 = vmatpush.bf16.msra.mxu0 %v5103_v40  ;;  %v5343_v40 = vor.u32 %v6894_v36, %v5342_v35  ;;  %v6904_v35 = vld [vmem:[#allocation8 + $0x2e4] sm:$0xf]  ;;  %v5392_v36 = vld [vmem:[#allocation8 + $0x2f0] sm:$0xf0] }
  0xb3   :  { %1969 = vmatpush.bf16.msra.mxu1 %v5231_v43  ;;  %v5216_v43 = vld [vmem:[#allocation8 + $0x190] sm:$0xf0]  ;;  %v5395_v38 = vor.u32 %v6904_v35, %v5392_v36  ;;  %v6880_v35 = vld [vmem:[#allocation8 + $0x224] sm:$0xf]  ;;  %v5046_v36 = vld [vmem:[#allocation8 + $0x28] sm:$0xf] }
  0xb4   :  { %1982 = vmatpush.bf16.msra.mxu2 %v5359_v30  ;;  %v5219_v48 = vor.u32 %v6860_v42, %v5216_v43  ;;  %v6938_v30 = vld [vmem:[#allocation8 + $0x3ec] sm:$0xf0]  ;;  %v5502_v42 = vld [vmem:[#allocation8 + $0x3c0] sm:$0xf] }
  0xb5   :  { %v6934_v43 = vld [vmem:[#allocation8 + $0x3cc] sm:$0xf0] }
  0xb6   :  { %1957 = vmatpush.bf16.msra.mxu0 %v5087_v45  ;;  %v6890_v45 = vld [vmem:[#allocation8 + $0x26c] sm:$0xf0] }
  0xb7   :  { %1970 = vmatpush.bf16.msra.mxu1 %v5215_v60  ;;  %v5072_v60 = vld [vmem:[#allocation8 + $0x70] sm:$0xf0]  ;;  %v5327_v51 = vor.u32 %v6890_v45, %v5326_v57  ;;  %v5126_v57 = vld [vmem:[#allocation8 + $0xc8] sm:$0xf]  ;;  %v6839_v45 = vld [vmem:[#allocation8 + $0xd4] sm:$0xf0] }
  0xb8   :  { %1983 = vmatpush.bf16.msra.mxu2 %v5343_v40  ;;  %v5075_v53 = vor.u32 %v6824_v47, %v5072_v60  ;;  %v5143_v40 = vor.u32 %v6843_v22, %v5142_v21  ;;  %v5376_v47 = vld [vmem:[#allocation8 + $0x2d0] sm:$0xf0]  ;;  %v5062_v22 = vld [vmem:[#allocation8 + $0x48] sm:$0xf] }
  0xba   :  { %1958 = vmatpush.bf16.msra.mxu0 %v5071_v49 }
  0xbb   :  { %1971 = vmatpush.bf16.msra.mxu1 %v5199_v52  ;;  %v5200_v52 = vld [vmem:[#allocation8 + $0x170] sm:$0xf0] }
  0xbc   :  { %1984 = vmatpush.bf16.msra.mxu2 %v5327_v51  ;;  %v5203_v62 = vor.u32 %v6856_v58, %v5200_v52  ;;  %v5486_v51 = vld [vmem:[#allocation8 + $0x3a0] sm:$0xf]  ;;  %v5110_v58 = vld [vmem:[#allocation8 + $0xa8] sm:$0xf]  ;;  %v6835_v52 = vld [vmem:[#allocation8 + $0xb4] sm:$0xf0] }
  0xbe   :  { %1959 = vmatpush.bf16.msra.mxu0 %v5055_v55  ;;  %v5310_v55 = vld [vmem:[#allocation8 + $0x240] sm:$0xf] }
  0xbf   :  { %1972 = vmatpush.bf16.msra.mxu1 %v5183_v61  ;;  %v5056_v61 = vld [vmem:[#allocation8 + $0x50] sm:$0xf0]  ;;  %v5311_v63 = vor.u32 %v6886_v56, %v5310_v55  ;;  %v5111_v56 = vor.u32 %v6835_v52, %v5110_v58  ;;  %v5254_v52 = vld [vmem:[#allocation8 + $0x1c8] sm:$0xf] }
  0xc0   :  { %v5059_v5 = vor.u32 %v6820_v59, %v5056_v61  ;;  %v5470_v59 = vld [vmem:[#allocation8 + $0x380] sm:$0xf]  ;;  %v6926_v61 = vld [vmem:[#allocation8 + $0x38c] sm:$0xf0] }
  0xc1   :  { %1985 = vmatpush.bf16.msra.mxu2 %v5311_v63  ;;  %v5094_v63 = vld [vmem:[#allocation8 + $0x88] sm:$0xf]  ;;  %v5471_v1 = vor.u32 %v6926_v61, %v5470_v59  ;;  %v6871_v59 = vld [vmem:[#allocation8 + $0x1d4] sm:$0xf0] }
  0xc2   :  { %1960 = vmatpush.bf16.msra.mxu0 %v5039_v0 }
  0xc3   :  { %1973 = vmatpush.bf16.msra.mxu1 %v5167_v4 }
  0xc6   :  { %1961 = vmatpush.bf16.msra.mxu0 %v5023_v13  ;;  %v5295_v13 = vor.u32 %v6882_v7, %v5294_v6  ;;  %v5454_v6 = vld [vmem:[#allocation8 + $0x360] sm:$0xf]  ;;  %v6922_v7 = vld [vmem:[#allocation8 + $0x36c] sm:$0xf0] }
  0xc7   :  { %1974 = vmatpush.bf16.msra.mxu1 %v5151_v15  ;;  %v982_v50 = vpop.f32.mrf.mxu1  ;;  %v6848_v15 = vld [vmem:[#allocation8 + $0x124] sm:$0xf] }
  0xc8   :  { %1986 = vmatpush.bf16.msra.mxu2 %v5295_v13  ;;  %v5171_v26 = vor.u32 %v6848_v15, %v5168_v16 }
  0xc9   :  { %v969_v46 = vpop.f32.mrf.mxu0 }
  0xca   :  { %2006 = vmatpush.bf16.msrb.mxu0 %v5139_v14  ;;  %v970_v49 = vadd.f32 %v969_v46, %v312_v41  ;;  %v5155_v41 = vor.u32 %v6844_v28, %v5152_v32  ;;  %v5503_v46 = vor.u32 %v6934_v43, %v5502_v42  ;;  %v5422_v32 = vld [vmem:[#allocation8 + $0x320] sm:$0xf]  ;;  %v6875_v42 = vld [vmem:[#allocation8 + $0x1f4] sm:$0xf0] }
  0xcb   :  { %2019 = vmatpush.bf16.msrb.mxu1 %v5267_v20  ;;  %v5043_v20 = vor.u32 %v6816_v9, %v5040_v10  ;;  %v5078_v9 = vld [vmem:[#allocation8 + $0x68] sm:$0xf]  ;;  %v6827_v10 = vld [vmem:[#allocation8 + $0x74] sm:$0xf0] }
  0xcc   :  { %v983_v54 = vadd.f32 %v982_v50, %v970_v49  ;;  %v6930_v49 = vld [vmem:[#allocation8 + $0x3ac] sm:$0xf0]  ;;  %v6896_v50 = vld [vmem:[#allocation8 + $0x2a4] sm:$0xf] }
  0xce   :  { %2007 = vmatpush.bf16.msrb.mxu0 %v5123_v24  ;;  %v995_v0 = vpop.f32.mrf.mxu2  ;;  %v6878_v24 = vld [vmem:[#allocation8 + $0x20c] sm:$0xf0] }
  0xcf   :  { %2020 = vmatpush.bf16.msrb.mxu1 %v5251_v29  ;;  %v996_v3 = vadd.f32 %v995_v0, %v983_v54  ;;  %v984_v14 = vpop.f32.mrf.mxu1  ;;  %v5279_v27 = vor.u32 %v6878_v24, %v5278_v23  ;;  %v5518_v29 = vld [vmem:[#allocation8 + $0x3e0] sm:$0xf]  ;;  %v5360_v54 = vld [vmem:[#allocation8 + $0x2b0] sm:$0xf0]  ;;  %v6831_v0 = vld [vmem:[#allocation8 + $0x94] sm:$0xf0] }
  0xd0   :  { %v5363_v55 = vor.u32 %v6896_v50, %v5360_v54  ;;  %v6823_v23 = vld [vmem:[#allocation8 + $0x54] sm:$0xf0]  ;;  %v6910_v50 = vld [vmem:[#allocation8 + $0x30c] sm:$0xf0]  ;;  %v6876_v54 = vld [vmem:[#allocation8 + $0x204] sm:$0xf] }
  0xd1   :  { %v1008_v4 = vpop.f32.mrf.mxu3  ;;  %v971_v11 = vpop.f32.mrf.mxu0  ;;  %1987 = vmatpush.bf16.msra.mxu2 %v5279_v27 }
  0xd2   :  { %2008 = vmatpush.bf16.msrb.mxu0 %v5107_v34  ;;  %v1009_v8 = vadd.f32 %v1008_v4, %v996_v3  ;;  %v5519_v34 = vor.u32 %v6938_v30, %v5518_v29  ;;  %v313_v4 = vperm.slane %v7665_v33, 1  ;;  %v5455_v11 = vor.u32 %v6922_v7, %v5454_v6  ;;  %v6837_v6 = vld [vmem:[#allocation8 + $0xcc] sm:$0xf]  ;;  %v6932_v7 = vld [vmem:[#allocation8 + $0x3c4] sm:$0xf] }
  0xd3   :  { %2021 = vmatpush.bf16.msrb.mxu1 %v5235_v39  ;;  %v5027_v39 = vor.u32 %v6812_v18, %v5024_v19  ;;  %v5438_v18 = vld [vmem:[#allocation8 + $0x340] sm:$0xf]  ;;  %v6918_v19 = vld [vmem:[#allocation8 + $0x34c] sm:$0xf0] }
  0xd4   :  { %v1168_v17 = vmax.f32 %v1009_v8, 0.0  ;;  %1993 = vmatpush.bf16.msra.mxu3 %v5519_v34  ;;  %v6888_v8 = vld [vmem:[#allocation8 + $0x264] sm:$0xf]  ;;  %v5439_v24 = vor.u32 %v6918_v19, %v5438_v18  ;;  %v6914_v34 = vld [vmem:[#allocation8 + $0x32c] sm:$0xf0] }
  0xd5   :  { %2032 = vmatpush.bf16.msrb.mxu2 %v5395_v38  ;;  %v5423_v38 = vor.u32 %v6914_v34, %v5422_v32  ;;  %v5112_v18 = vld [vmem:[#allocation8 + $0xb8] sm:$0xf0]  ;;  %v5222_v19 = vld [vmem:[#allocation8 + $0x188] sm:$0xf]  ;;  %v314_v32 = vperm.slane %v7665_v33, 2 }
  0xd6   :  { %2009 = vmatpush.bf16.msrb.mxu0 %v5091_v44  ;;  %v7668_v25 = vpack.c.bf16 %v1168_v17, %v1168_v17  ;;  %v997_v31 = vpop.f32.mrf.mxu2  ;;  %v6900_v44 = vld [vmem:[#allocation8 + $0x2c4] sm:$0xf]  ;;  %v5079_v17 = vor.u32 %v6827_v10, %v5078_v9  ;;  %v5128_v9 = vld [vmem:[#allocation8 + $0xd8] sm:$0xf0]  ;;  %v5238_v10 = vld [vmem:[#allocation8 + $0x1a8] sm:$0xf] }
  0xd7   :  { %2022 = vmatpush.bf16.msrb.mxu1 %v5219_v48  ;;  %v5379_v60 = vor.u32 %v6900_v44, %v5376_v47  ;;  %v5127_v48 = vor.u32 %v6839_v45, %v5126_v57  ;;  %v5063_v31 = vor.u32 %v6823_v23, %v5062_v22  ;;  %v5030_v57 = vld [vmem:[#allocation8 + $0x8] sm:$0xf]  ;;  %v6815_v45 = vld [vmem:[#allocation8 + $0x14] sm:$0xf0]  ;;  %v6924_v22 = vld [vmem:[#allocation8 + $0x384] sm:$0xf] }
  0xd8   :  { %1962 = vmatmul.bf16.vlgmr.msra.gmra.mxu0 %v7668_v25  ;;  %1994 = vmatpush.bf16.msra.mxu3 %v5503_v46  ;;  %v5472_v23 = vld [vmem:[#allocation8 + $0x390] sm:$0xf0] }
  0xd9   :  { %v1010_v37 = vpop.f32.mrf.mxu3  ;;  %2033 = vmatpush.bf16.msrb.mxu2 %v5379_v60 }
  0xda   :  { %2010 = vmatpush.bf16.msrb.mxu0 %v5075_v53  ;;  %v5487_v53 = vor.u32 %v6930_v49, %v5486_v51  ;;  %v6819_v37 = vld [vmem:[#allocation8 + $0x34] sm:$0xf0]  ;;  %v5144_v51 = vld [vmem:[#allocation8 + $0xf8] sm:$0xf0]  ;;  %v5406_v49 = vld [vmem:[#allocation8 + $0x300] sm:$0xf] }
  0xdb   :  { %2023 = vmatpush.bf16.msrb.mxu1 %v5203_v62  ;;  %v6892_v62 = vld [vmem:[#allocation8 + $0x284] sm:$0xf]  ;;  %v5047_v60 = vor.u32 %v6819_v37, %v5046_v36  ;;  %v6825_v36 = vld [vmem:[#allocation8 + $0x6c] sm:$0xf] }
  0xdc   :  { %1995 = vmatpush.bf16.msra.mxu3 %v5487_v53  ;;  %v5347_v3 = vor.u32 %v6892_v62, %v5344_v2  ;;  %v5407_v53 = vor.u32 %v6910_v50, %v5406_v49  ;;  %v6936_v62 = vld [vmem:[#allocation8 + $0x3e4] sm:$0xf]  ;;  %v5031_v2 = vor.u32 %v6815_v45, %v5030_v57  ;;  %v5174_v49 = vld [vmem:[#allocation8 + $0x128] sm:$0xf]  ;;  %v6851_v50 = vld [vmem:[#allocation8 + $0x134] sm:$0xf0] }
  0xdd   :  { %2034 = vmatpush.bf16.msrb.mxu2 %v5363_v55  ;;  %v5280_v55 = vld [vmem:[#allocation8 + $0x210] sm:$0xf0]  ;;  %v6920_v37 = vld [vmem:[#allocation8 + $0x364] sm:$0xf] }
  0xde   :  { %2011 = vmatpush.bf16.msrb.mxu0 %v5059_v5  ;;  %v5095_v5 = vor.u32 %v6831_v0, %v5094_v63  ;;  %v5283_v61 = vor.u32 %v6876_v54, %v5280_v55  ;;  %v5520_v63 = vld [vmem:[#allocation8 + $0x3f0] sm:$0xf0]  ;;  %v5175_v55 = vor.u32 %v6851_v50, %v5174_v49  ;;  %v6853_v50 = vld [vmem:[#allocation8 + $0x14c] sm:$0xf] }
  0xdf   :  { %2024 = vmatpush.bf16.msrb.mxu1 %v5187_v12  ;;  %v5328_v12 = vld [vmem:[#allocation8 + $0x270] sm:$0xf0] }
  0xe0   :  { %1996 = vmatpush.bf16.msra.mxu3 %v5471_v1  ;;  %v5331_v14 = vor.u32 %v6888_v8, %v5328_v12  ;;  %v5523_v1 = vor.u32 %v6936_v62, %v5520_v63  ;;  %v5504_v8 = vld [vmem:[#allocation8 + $0x3d0] sm:$0xf0] }
  0xe1   :  { %2035 = vmatpush.bf16.msrb.mxu2 %v5347_v3  ;;  %v5507_v12 = vor.u32 %v6932_v7, %v5504_v8  ;;  %v5424_v62 = vld [vmem:[#allocation8 + $0x330] sm:$0xf0] }
  0xe2   :  { %2012 = vmatpush.bf16.msrb.mxu0 %v5043_v20  ;;  %v6884_v20 = vld [vmem:[#allocation8 + $0x244] sm:$0xf] }
  0xe3   :  { %2025 = vmatpush.bf16.msrb.mxu1 %v5171_v26  ;;  %v5312_v26 = vld [vmem:[#allocation8 + $0x250] sm:$0xf0] }
  0xe4   :  { %1997 = vmatpush.bf16.msra.mxu3 %v5455_v11  ;;  %v5315_v27 = vor.u32 %v6884_v20, %v5312_v26  ;;  %v6867_v11 = vld [vmem:[#allocation8 + $0x1b4] sm:$0xf0] }
  0xe5   :  { %2036 = vmatpush.bf16.msrb.mxu2 %v5331_v14  ;;  %v5488_v14 = vld [vmem:[#allocation8 + $0x3b0] sm:$0xf0]  ;;  %v6863_v20 = vld [vmem:[#allocation8 + $0x194] sm:$0xf0] }
  0xe6   :  { %2013 = vmatpush.bf16.msrb.mxu0 %v5027_v39  ;;  %v1021_v13 = vpop.f32.mrf.mxu0  ;;  %v5296_v39 = vld [vmem:[#allocation8 + $0x230] sm:$0xf0]  ;;  %v5223_v26 = vor.u32 %v6863_v20, %v5222_v19  ;;  %v5032_v19 = vld [vmem:[#allocation8 + $0x18] sm:$0xf0] }
  0xe7   :  { %2026 = vmatpush.bf16.msrb.mxu1 %v5155_v41  ;;  %v1022_v15 = vadd.f32 %v1021_v13, %v313_v4  ;;  %v1034_v16 = vpop.f32.mrf.mxu1  ;;  %v5270_v41 = vld [vmem:[#allocation8 + $0x1e8] sm:$0xf]  ;;  %v5299_v44 = vor.u32 %v6880_v35, %v5296_v39  ;;  %v6928_v13 = vld [vmem:[#allocation8 + $0x3a4] sm:$0xf]  ;;  %v5080_v39 = vld [vmem:[#allocation8 + $0x78] sm:$0xf0] }
  0xe8   :  { %1998 = vmatpush.bf16.msra.mxu3 %v5439_v24  ;;  %v5271_v58 = vor.u32 %v6875_v42, %v5270_v41  ;;  %v6855_v41 = vld [vmem:[#allocation8 + $0x154] sm:$0xf0]  ;;  %v5083_v45 = vor.u32 %v6825_v36, %v5080_v39  ;;  %v5366_v36 = vld [vmem:[#allocation8 + $0x2a8] sm:$0xf] }
  0xe9   :  { %2014 = vmatmul.bf16.vlgmr.msrb.gmra.mxu0 %v7668_v25  ;;  %v1035_v21 = vadd.f32 %v1034_v16, %v1022_v15  ;;  %2037 = vmatpush.bf16.msrb.mxu2 %v5315_v27  ;;  %v5131_v15 = vor.u32 %v6837_v6, %v5128_v9  ;;  %v5239_v16 = vor.u32 %v6867_v11, %v5238_v10  ;;  %v6829_v27 = vld [vmem:[#allocation8 + $0x8c] sm:$0xf]  ;;  %v5272_v6 = vld [vmem:[#allocation8 + $0x1f8] sm:$0xf0]  ;;  %v5398_v9 = vld [vmem:[#allocation8 + $0x2e8] sm:$0xf] }
  0xea   :  { %2058 = vmatpush.bf16.msra.mxu0 %v5143_v40  ;;  %v6907_v10 = vld [vmem:[#allocation8 + $0x2f4] sm:$0xf0] }
  0xeb   :  { %v5399_v20 = vor.u32 %v6907_v10, %v5398_v9  ;;  %v5286_v10 = vld [vmem:[#allocation8 + $0x208] sm:$0xf] }
  0xec   :  { %1999 = vmatpush.bf16.msra.mxu3 %v5423_v38  ;;  %v5456_v38 = vld [vmem:[#allocation8 + $0x370] sm:$0xf0] }
  0xed   :  { %2038 = vmatpush.bf16.msrb.mxu2 %v5299_v44  ;;  %v5459_v42 = vor.u32 %v6920_v37, %v5456_v38  ;;  %v6899_v37 = vld [vmem:[#allocation8 + $0x2b4] sm:$0xf0] }
  0xee   :  { %2059 = vmatpush.bf16.msra.mxu0 %v5127_v48  ;;  %v1047_v28 = vpop.f32.mrf.mxu2  ;;  %v1023_v43 = vpop.f32.mrf.mxu0  ;;  %v6841_v48 = vld [vmem:[#allocation8 + $0xec] sm:$0xf]  ;;  %v5367_v39 = vor.u32 %v6899_v37, %v5366_v36  ;;  %v5368_v36 = vld [vmem:[#allocation8 + $0x2b8] sm:$0xf0]  ;;  %v5494_v37 = vld [vmem:[#allocation8 + $0x3a8] sm:$0xf] }
  0xef   :  { %v1048_v29 = vadd.f32 %v1047_v28, %v1035_v21  ;;  %v1060_v30 = vpop.f32.mrf.mxu3  ;;  %v1036_v46 = vpop.f32.mrf.mxu1  ;;  %v5147_v4 = vor.u32 %v6841_v48, %v5144_v51  ;;  %v5491_v21 = vor.u32 %v6928_v13, %v5488_v14  ;;  %v5096_v28 = vld [vmem:[#allocation8 + $0x98] sm:$0xf0]  ;;  %v5440_v48 = vld [vmem:[#allocation8 + $0x350] sm:$0xf0]  ;;  %v6908_v14 = vld [vmem:[#allocation8 + $0x304] sm:$0xf] }
  0xf0   :  { %2000 = vmatpush.bf16.msra.mxu3 %v5407_v53  ;;  %v5099_v34 = vor.u32 %v6829_v27, %v5096_v28  ;;  %v5064_v51 = vld [vmem:[#allocation8 + $0x58] sm:$0xf0]  ;;  %v6903_v27 = vld [vmem:[#allocation8 + $0x2d4] sm:$0xf0] }
  0xf1   :  { %v1061_v40 = vadd.f32 %v1060_v30, %v1048_v29  ;;  %2039 = vmatpush.bf16.msrb.mxu2 %v5283_v61  ;;  %v5206_v29 = vld [vmem:[#allocation8 + $0x168] sm:$0xf]  ;;  %v6859_v30 = vld [vmem:[#allocation8 + $0x174] sm:$0xf0]  ;;  %v6912_v61 = vld [vmem:[#allocation8 + $0x324] sm:$0xf] }
  0xf2   :  { %2060 = vmatpush.bf16.msra.mxu0 %v5111_v56  ;;  %v5207_v35 = vor.u32 %v6859_v30, %v5206_v29 }
  0xf3   :  { %v1169_v47 = vmax.f32 %v1061_v40, 0.0  ;;  %v5190_v40 = vld [vmem:[#allocation8 + $0x148] sm:$0xf] }
  0xf4   :  { %2045 = vmatpush.bf16.msrb.mxu3 %v5523_v1  ;;  %v5191_v46 = vor.u32 %v6855_v41, %v5190_v40  ;;  %v5048_v1 = vld [vmem:[#allocation8 + $0x38] sm:$0xf0]  ;;  %v6861_v40 = vld [vmem:[#allocation8 + $0x18c] sm:$0xf] }
  0xf5   :  { %v7673_v56 = vpack.c.bf16 %v1169_v47, %v1169_v47  ;;  %v6821_v47 = vld [vmem:[#allocation8 + $0x4c] sm:$0xf]  ;;  %v5224_v41 = vld [vmem:[#allocation8 + $0x198] sm:$0xf0] }
  0xf6   :  { %2061 = vmatpush.bf16.msra.mxu0 %v5095_v5  ;;  %v1049_v0 = vpop.f32.mrf.mxu2  ;;  %v5255_v5 = vor.u32 %v6871_v59, %v5254_v52  ;;  %v5067_v54 = vor.u32 %v6821_v47, %v5064_v51  ;;  %v6817_v59 = vld [vmem:[#allocation8 + $0x2c] sm:$0xf]  ;;  %v5334_v47 = vld [vmem:[#allocation8 + $0x268] sm:$0xf] }
  0xf7   :  { %1975 = vmatmul.bf16.vlgmr.msra.gmra.mxu1 %v7673_v56  ;;  %v1062_v3 = vpop.f32.mrf.mxu3  ;;  %v5051_v11 = vor.u32 %v6817_v59, %v5048_v1  ;;  %v6883_v1 = vld [vmem:[#allocation8 + $0x234] sm:$0xf0] }
  0xf8   :  { %2071 = vmatpush.bf16.msra.mxu1 %v5271_v58  ;;  %2046 = vmatpush.bf16.msrb.mxu3 %v5507_v12  ;;  %v6847_v3 = vld [vmem:[#allocation8 + $0x114] sm:$0xf0] }
  0xfa   :  { %2062 = vmatpush.bf16.msra.mxu0 %v5079_v17  ;;  %v6833_v17 = vld [vmem:[#allocation8 + $0xac] sm:$0xf] }
  0xfb   :  { %v5115_v24 = vor.u32 %v6833_v17, %v5112_v18  ;;  %v6813_v18 = vld [vmem:[#allocation8 + $0xc] sm:$0xf] }
  0xfc   :  { %2072 = vmatpush.bf16.msra.mxu1 %v5255_v5  ;;  %2047 = vmatpush.bf16.msrb.mxu3 %v5491_v21  ;;  %v6873_v5 = vld [vmem:[#allocation8 + $0x1ec] sm:$0xf]  ;;  %v5035_v28 = vor.u32 %v6813_v18, %v5032_v19  ;;  %v6939_v18 = vld [vmem:[#allocation8 + $0x3f4] sm:$0xf0] }
  0xfd   :  { %v5275_v17 = vor.u32 %v6873_v5, %v5272_v6  ;;  %v6869_v21 = vld [vmem:[#allocation8 + $0x1cc] sm:$0xf]  ;;  %v5160_v6 = vld [vmem:[#allocation8 + $0x118] sm:$0xf0] }
  0xfe   :  { %2063 = vmatpush.bf16.msra.mxu0 %v5063_v31  ;;  %v5475_v31 = vor.u32 %v6924_v22, %v5472_v23  ;;  %v5256_v22 = vld [vmem:[#allocation8 + $0x1d8] sm:$0xf0]  ;;  %v6845_v5 = vld [vmem:[#allocation8 + $0x10c] sm:$0xf] }
  0xff   :  { %v5259_v30 = vor.u32 %v6869_v21, %v5256_v22 }
 0x100   :  { %2073 = vmatpush.bf16.msra.mxu1 %v5239_v16  ;;  %2048 = vmatpush.bf16.msrb.mxu3 %v5475_v31 }
 0x102   :  { %2064 = vmatpush.bf16.msra.mxu0 %v5047_v60  ;;  %v6916_v60 = vld [vmem:[#allocation8 + $0x344] sm:$0xf] }
 0x103   :  { %v5443_v58 = vor.u32 %v6916_v60, %v5440_v48  ;;  %v6891_v60 = vld [vmem:[#allocation8 + $0x274] sm:$0xf0]  ;;  %v315_v48 = vperm.slane %v7665_v33, 3 }
 0x104   :  { %2074 = vmatpush.bf16.msra.mxu1 %v5223_v26  ;;  %2049 = vmatpush.bf16.msrb.mxu3 %v5459_v42  ;;  %v5382_v26 = vld [vmem:[#allocation8 + $0x2c8] sm:$0xf]  ;;  %v5335_v49 = vor.u32 %v6891_v60, %v5334_v47  ;;  %v6923_v60 = vld [vmem:[#allocation8 + $0x374] sm:$0xf0] }
 0x105   :  { %v5350_v42 = vld [vmem:[#allocation8 + $0x288] sm:$0xf] }
 0x106   :  { %2065 = vmatpush.bf16.msra.mxu0 %v5031_v2  ;;  %v1073_v43 = vpop.f32.mrf.mxu0  ;;  %v5158_v2 = vld [vmem:[#allocation8 + $0x108] sm:$0xf] }
 0x107   :  { %2027 = vmatmul.bf16.vlgmr.msrb.gmra.mxu1 %v7673_v56  ;;  %v1074_v44 = vadd.f32 %v1073_v43, %v314_v32  ;;  %v1086_v57 = vpop.f32.mrf.mxu1  ;;  %v5159_v12 = vor.u32 %v6847_v3, %v5158_v2  ;;  %v5383_v32 = vor.u32 %v6903_v27, %v5382_v26  ;;  %v6895_v43 = vld [vmem:[#allocation8 + $0x294] sm:$0xf0]  ;;  %v5384_v26 = vld [vmem:[#allocation8 + $0x2d8] sm:$0xf0]  ;;  %v5462_v47 = vld [vmem:[#allocation8 + $0x368] sm:$0xf] }
 0x108   :  { %2075 = vmatpush.bf16.msra.mxu1 %v5207_v35  ;;  %2050 = vmatpush.bf16.msrb.mxu3 %v5443_v58  ;;  %v5240_v35 = vld [vmem:[#allocation8 + $0x1b8] sm:$0xf0] }
 0x109   :  { %2066 = vmatmul.bf16.vlgmr.msra.gmra.mxu0 %v7668_v25  ;;  %v1087_v52 = vadd.f32 %v1086_v57, %v1074_v44  ;;  %v5227_v44 = vor.u32 %v6861_v40, %v5224_v41  ;;  %v5351_v57 = vor.u32 %v6895_v43, %v5350_v42  ;;  %v5192_v58 = vld [vmem:[#allocation8 + $0x158] sm:$0xf0]  ;;  %v6893_v41 = vld [vmem:[#allocation8 + $0x28c] sm:$0xf]  ;;  %v5478_v43 = vld [vmem:[#allocation8 + $0x388] sm:$0xf] }
 0x10a   :  { %2110 = vmatpush.bf16.msrb.mxu0 %v5147_v4  ;;  %v5427_v4 = vor.u32 %v6912_v61, %v5424_v62  ;;  %v5195_v59 = vor.u32 %v6853_v50, %v5192_v58  ;;  %v6849_v62 = vld [vmem:[#allocation8 + $0x12c] sm:$0xf]  ;;  %v5352_v42 = vld [vmem:[#allocation8 + $0x298] sm:$0xf0]  ;;  %v5446_v58 = vld [vmem:[#allocation8 + $0x348] sm:$0xf] }
 0x10b   :  { %v5320_v50 = vld [vmem:[#allocation8 + $0x258] sm:$0xf0] }
 0x10c   :  { %2076 = vmatpush.bf16.msra.mxu1 %v5191_v46  ;;  %2051 = vmatpush.bf16.msrb.mxu3 %v5427_v4  ;;  %v5208_v46 = vld [vmem:[#allocation8 + $0x178] sm:$0xf0] }
 0x10e   :  { %2111 = vmatpush.bf16.msrb.mxu0 %v5131_v15  ;;  %v1099_v53 = vpop.f32.mrf.mxu2  ;;  %v1075_v8 = vpop.f32.mrf.mxu0  ;;  %v5408_v15 = vld [vmem:[#allocation8 + $0x310] sm:$0xf0] }
 0x10f   :  { %v1100_v63 = vadd.f32 %v1099_v53, %v1087_v52  ;;  %v1112_v0 = vpop.f32.mrf.mxu3  ;;  %v1088_v13 = vpop.f32.mrf.mxu1  ;;  %v5411_v23 = vor.u32 %v6908_v14, %v5408_v15  ;;  %v6887_v53 = vld [vmem:[#allocation8 + $0x254] sm:$0xf0]  ;;  %v5400_v14 = vld [vmem:[#allocation8 + $0x2f8] sm:$0xf0] }
 0x110   :  { %2077 = vmatpush.bf16.msra.mxu1 %v5175_v55  ;;  %v6905_v13 = vld [vmem:[#allocation8 + $0x2ec] sm:$0xf] }
 0x111   :  { %v1113_v7 = vadd.f32 %v1112_v0, %v1100_v63  ;;  %2052 = vmatpush.bf16.msrb.mxu3 %v5411_v23  ;;  %v5176_v63 = vld [vmem:[#allocation8 + $0x138] sm:$0xf0]  ;;  %v5302_v0 = vld [vmem:[#allocation8 + $0x228] sm:$0xf]  ;;  %v5403_v21 = vor.u32 %v6905_v13, %v5400_v14  ;;  %v6901_v23 = vld [vmem:[#allocation8 + $0x2cc] sm:$0xf] }
 0x112   :  { %2112 = vmatpush.bf16.msrb.mxu0 %v5115_v24  ;;  %v5179_v2 = vor.u32 %v6849_v62, %v5176_v63  ;;  %v5303_v4 = vor.u32 %v6883_v1, %v5302_v0  ;;  %v5288_v0 = vld [vmem:[#allocation8 + $0x218] sm:$0xf0]  ;;  %v5414_v1 = vld [vmem:[#allocation8 + $0x308] sm:$0xf] }
 0x113   :  { %v1170_v16 = vmax.f32 %v1113_v7, 0.0 }
 0x114   :  { %2078 = vmatpush.bf16.msra.mxu1 %v5159_v12 }
 0x115   :  { %v7679_v24 = vpack.c.bf16 %v1170_v16, %v1170_v16  ;;  %v5163_v16 = vor.u32 %v6845_v5, %v5160_v6 }
 0x116   :  { %2113 = vmatpush.bf16.msrb.mxu0 %v5099_v34  ;;  %v1101_v29 = vpop.f32.mrf.mxu2  ;;  %v6865_v34 = vld [vmem:[#allocation8 + $0x1ac] sm:$0xf] }
 0x117   :  { %1988 = vmatmul.bf16.vlgmr.msra.gmra.mxu2 %v7679_v24  ;;  %v1114_v31 = vpop.f32.mrf.mxu3  ;;  %2079 = vmatmul.bf16.vlgmr.msra.gmra.mxu1 %v7673_v56  ;;  %v5243_v38 = vor.u32 %v6865_v34, %v5240_v35  ;;  %v6935_v29 = vld [vmem:[#allocation8 + $0x3d4] sm:$0xf0]  ;;  %v6897_v35 = vld [vmem:[#allocation8 + $0x2ac] sm:$0xf] }
 0x118   :  { %2123 = vmatpush.bf16.msrb.mxu1 %v5275_v17  ;;  %2084 = vmatpush.bf16.msra.mxu2 %v5399_v20  ;;  %v5526_v17 = vld [vmem:[#allocation8 + $0x3e8] sm:$0xf] }
 0x119   :  { %v5527_v22 = vor.u32 %v6939_v18, %v5526_v17  ;;  %v6921_v18 = vld [vmem:[#allocation8 + $0x36c] sm:$0xf] }
 0x11a   :  { %2114 = vmatpush.bf16.msrb.mxu0 %v5083_v45  ;;  %v6857_v45 = vld [vmem:[#allocation8 + $0x16c] sm:$0xf] }
 0x11b   :  { %v5211_v51 = vor.u32 %v6857_v45, %v5208_v46  ;;  %v5336_v46 = vld [vmem:[#allocation8 + $0x278] sm:$0xf0] }
 0x11c   :  { %2124 = vmatpush.bf16.msrb.mxu1 %v5259_v30  ;;  %2085 = vmatpush.bf16.msra.mxu2 %v5383_v32  ;;  %v5387_v32 = vor.u32 %v6901_v23, %v5384_v26  ;;  %v5448_v23 = vld [vmem:[#allocation8 + $0x358] sm:$0xf0]  ;;  %v5646_v26 = vld [vmem:[#allocation11 + $0xe0] sm:$0xf] }
 0x11e   :  { %2115 = vmatpush.bf16.msrb.mxu0 %v5067_v54 }
 0x120   :  { %2125 = vmatpush.bf16.msrb.mxu1 %v5243_v38  ;;  %2086 = vmatpush.bf16.msra.mxu2 %v5367_v39  ;;  %v6931_v38 = vld [vmem:[#allocation8 + $0x3b4] sm:$0xf0]  ;;  %v5371_v39 = vor.u32 %v6897_v35, %v5368_v36  ;;  %v6966_v35 = vld [vmem:[#allocation11 + $0xcc] sm:$0xf0]  ;;  %v5614_v36 = vld [vmem:[#allocation11 + $0xa0] sm:$0xf] }
 0x121   :  { %v5495_v40 = vor.u32 %v6931_v38, %v5494_v37  ;;  %v6909_v38 = vld [vmem:[#allocation8 + $0x30c] sm:$0xf] }
 0x122   :  { %2116 = vmatpush.bf16.msrb.mxu0 %v5051_v11  ;;  %v6879_v11 = vld [vmem:[#allocation8 + $0x214] sm:$0xf0] }
 0x123   :  { %v5287_v19 = vor.u32 %v6879_v11, %v5286_v10  ;;  %v6929_v11 = vld [vmem:[#allocation8 + $0x3ac] sm:$0xf] }
 0x124   :  { %2126 = vmatpush.bf16.msrb.mxu1 %v5227_v44  ;;  %2087 = vmatpush.bf16.msra.mxu2 %v5351_v57  ;;  %v6927_v44 = vld [vmem:[#allocation8 + $0x394] sm:$0xf0]  ;;  %v5355_v57 = vor.u32 %v6893_v41, %v5352_v42  ;;  %v6962_v41 = vld [vmem:[#allocation11 + $0xac] sm:$0xf0] }
 0x125   :  { %v5479_v45 = vor.u32 %v6927_v44, %v5478_v43  ;;  %v5615_v42 = vor.u32 %v6962_v41, %v5614_v36  ;;  %v5598_v44 = vld [vmem:[#allocation11 + $0x80] sm:$0xf]  ;;  %v6978_v36 = vld [vmem:[#allocation11 + $0x12c] sm:$0xf0]  ;;  %v6956_v41 = vld [vmem:[#allocation11 + $0x84] sm:$0xf] }
 0x126   :  { %2117 = vmatpush.bf16.msrb.mxu0 %v5035_v28  ;;  %v1125_v52 = vpop.f32.mrf.mxu0  ;;  %v5510_v28 = vld [vmem:[#allocation8 + $0x3c8] sm:$0xf] }
 0x127   :  { %v1126_v54 = vadd.f32 %v1125_v52, %v315_v48  ;;  %v1138_v55 = vpop.f32.mrf.mxu1  ;;  %2040 = vmatmul.bf16.vlgmr.msrb.gmra.mxu2 %v7679_v24  ;;  %v5511_v34 = vor.u32 %v6935_v29, %v5510_v28  ;;  %v6919_v52 = vld [vmem:[#allocation8 + $0x354] sm:$0xf0]  ;;  %v6970_v28 = vld [vmem:[#allocation11 + $0xec] sm:$0xf0]  ;;  %v6913_v29 = vld [vmem:[#allocation8 + $0x32c] sm:$0xf] }
 0x128   :  { %2127 = vmatpush.bf16.msrb.mxu1 %v5211_v51  ;;  %2088 = vmatpush.bf16.msra.mxu2 %v5335_v49  ;;  %v5463_v51 = vor.u32 %v6923_v60, %v5462_v47  ;;  %v6885_v49 = vld [vmem:[#allocation8 + $0x24c] sm:$0xf]  ;;  %v5774_v47 = vld [vmem:[#allocation11 + $0x1e0] sm:$0xf]  ;;  %v7002_v60 = vld [vmem:[#allocation11 + $0x1ec] sm:$0xf0] }
 0x129   :  { %2118 = vmatmul.bf16.vlgmr.msrb.gmra.mxu0 %v7668_v25  ;;  %v5318_v25 = vld [vmem:[#allocation8 + $0x248] sm:$0xf]  ;;  %v1139_v33 = vadd.f32 %v1138_v55, %v1126_v54  ;;  %v6881_v54 = vld [vmem:[#allocation8 + $0x22c] sm:$0xf]  ;;  %v5304_v55 = vld [vmem:[#allocation8 + $0x238] sm:$0xf0] }
 0x12a   :  { %v5319_v61 = vor.u32 %v6887_v53, %v5318_v25  ;;  %v5323_v25 = vor.u32 %v6885_v49, %v5320_v50  ;;  %v5447_v53 = vor.u32 %v6919_v52, %v5446_v58  ;;  %v5307_v62 = vor.u32 %v6881_v54, %v5304_v55  ;;  %v5566_v58 = vld [vmem:[#allocation11 + $0x40] sm:$0xf]  ;;  %v6950_v52 = vld [vmem:[#allocation11 + $0x4c] sm:$0xf0] }
 0x12b   :  { %v6998_v54 = vld [vmem:[#allocation11 + $0x1cc] sm:$0xf0] }
 0x12c   :  { %2128 = vmatpush.bf16.msrb.mxu1 %v5195_v59  ;;  %2089 = vmatpush.bf16.msra.mxu2 %v5319_v61  ;;  %v5430_v59 = vld [vmem:[#allocation8 + $0x328] sm:$0xf]  ;;  %v6915_v61 = vld [vmem:[#allocation8 + $0x334] sm:$0xf0] }
 0x12d   :  { %v5431_v63 = vor.u32 %v6915_v61, %v5430_v59  ;;  %v5550_v59 = vld [vmem:[#allocation11 + $0x20] sm:$0xf]  ;;  %v6946_v61 = vld [vmem:[#allocation11 + $0x2c] sm:$0xf0] }
 0x12e   :  { %v1151_v3 = vpop.f32.mrf.mxu2  ;;  %v1127_v9 = vpop.f32.mrf.mxu0 }
 0x12f   :  { %v1152_v7 = vadd.f32 %v1151_v3, %v1139_v33  ;;  %v1164_v8 = vpop.f32.mrf.mxu3  ;;  %v1140_v12 = vpop.f32.mrf.mxu1  ;;  %v6877_v33 = vld [vmem:[#allocation8 + $0x20c] sm:$0xf]  ;;  %v5512_v9 = vld [vmem:[#allocation8 + $0x3d8] sm:$0xf0] }
 0x130   :  { %2129 = vmatpush.bf16.msrb.mxu1 %v5179_v2  ;;  %2090 = vmatpush.bf16.msra.mxu2 %v5303_v4  ;;  %v6911_v2 = vld [vmem:[#allocation8 + $0x314] sm:$0xf0]  ;;  %v6937_v3 = vld [vmem:[#allocation8 + $0x3ec] sm:$0xf]  ;;  %v5528_v4 = vld [vmem:[#allocation8 + $0x3f8] sm:$0xf0]  ;;  %v5291_v5 = vor.u32 %v6877_v33, %v5288_v0 }
 0x131   :  { %v1165_v15 = vadd.f32 %v1164_v8, %v1152_v7  ;;  %v5415_v6 = vor.u32 %v6911_v2, %v5414_v1  ;;  %v5531_v7 = vor.u32 %v6937_v3, %v5528_v4  ;;  %v6933_v8 = vld [vmem:[#allocation8 + $0x3cc] sm:$0xf]  ;;  %v5496_v12 = vld [vmem:[#allocation8 + $0x3b8] sm:$0xf0]  ;;  %v6994_v33 = vld [vmem:[#allocation11 + $0x1ac] sm:$0xf0] }
 0x132   :  { %v5515_v10 = vor.u32 %v6933_v8, %v5512_v9  ;;  %v5499_v13 = vor.u32 %v6929_v11, %v5496_v12  ;;  %v5534_v2 = vld [vmem:[#allocation11] sm:$0xf]  ;;  %v6942_v3 = vld [vmem:[#allocation11 + $0xc] sm:$0xf0]  ;;  %v6968_v8 = vld [vmem:[#allocation11 + $0xe4] sm:$0xf] }
 0x133   :  { %v1171_v20 = vmax.f32 %v1165_v15, 0.0  ;;  %v6925_v15 = vld [vmem:[#allocation8 + $0x38c] sm:$0xf]  ;;  %v5726_v4 = vld [vmem:[#allocation11 + $0x180] sm:$0xf] }
 0x134   :  { %2130 = vmatpush.bf16.msrb.mxu1 %v5163_v16  ;;  %2091 = vmatpush.bf16.msra.mxu2 %v5287_v19  ;;  %v5480_v16 = vld [vmem:[#allocation8 + $0x398] sm:$0xf0]  ;;  %v5648_v9 = vld [vmem:[#allocation11 + $0xf0] sm:$0xf0]  ;;  %v5710_v11 = vld [vmem:[#allocation11 + $0x160] sm:$0xf] }
 0x135   :  { %v7686_v27 = vpack.c.bf16 %v1171_v20, %v1171_v20  ;;  %v5483_v17 = vor.u32 %v6925_v15, %v5480_v16  ;;  %v5464_v19 = vld [vmem:[#allocation8 + $0x378] sm:$0xf0]  ;;  %v6986_v12 = vld [vmem:[#allocation11 + $0x16c] sm:$0xf0] }
 0x136   :  { %v1153_v30 = vpop.f32.mrf.mxu2  ;;  %v5467_v20 = vor.u32 %v6921_v18, %v5464_v19  ;;  %v5711_v15 = vor.u32 %v6986_v12, %v5710_v11  ;;  %v7034_v16 = vld [vmem:[#allocation11 + $0x2ec] sm:$0xf0]  ;;  %v5632_v18 = vld [vmem:[#allocation11 + $0xd0] sm:$0xf0] }
 0x137   :  { %v1166_v31 = vpop.f32.mrf.mxu3  ;;  %2001 = vmatmul.bf16.vlgmr.msra.gmra.mxu3 %v7686_v27  ;;  %2131 = vmatmul.bf16.vlgmr.msrb.gmra.mxu1 %v7673_v56  ;;  %v6889_v56 = vld [vmem:[#allocation8 + $0x26c] sm:$0xf]  ;;  %v5432_v30 = vld [vmem:[#allocation8 + $0x338] sm:$0xf0] }
 0x138   :  { %2136 = vmatpush.bf16.msrb.mxu2 %v5403_v21  ;;  %2097 = vmatpush.bf16.msra.mxu3 %v5527_v22  ;;  %v5339_v48 = vor.u32 %v6889_v56, %v5336_v46  ;;  %v6917_v22 = vld [vmem:[#allocation8 + $0x34c] sm:$0xf]  ;;  %v5647_v31 = vor.u32 %v6970_v28, %v5646_v26  ;;  %v6954_v46 = vld [vmem:[#allocation11 + $0x6c] sm:$0xf0]  ;;  %v6960_v28 = vld [vmem:[#allocation11 + $0xa4] sm:$0xf] }
 0x139   :  { %2092 = vmatmul.bf16.vlgmr.msra.gmra.mxu2 %v7679_v24  ;;  %v7030_v26 = vld [vmem:[#allocation11 + $0x2cc] sm:$0xf0] }
 0x13a   :  { %2948 = vmatpush.bf16.msra.mxu0 %v5647_v31 }
 0x13c   :  { %2137 = vmatpush.bf16.msrb.mxu2 %v5387_v32  ;;  %2098 = vmatpush.bf16.msra.mxu3 %v5511_v34  ;;  %v5435_v32 = vor.u32 %v6913_v29, %v5432_v30  ;;  %v5630_v34 = vld [vmem:[#allocation11 + $0xc0] sm:$0xf]  ;;  %v5616_v29 = vld [vmem:[#allocation11 + $0xb0] sm:$0xf0] }
 0x140   :  { %2138 = vmatpush.bf16.msrb.mxu2 %v5371_v39  ;;  %2099 = vmatpush.bf16.msra.mxu3 %v5495_v40  ;;  %v5416_v39 = vld [vmem:[#allocation8 + $0x318] sm:$0xf0]  ;;  %v5631_v40 = vor.u32 %v6966_v35, %v5630_v34  ;;  %v5619_v34 = vor.u32 %v6960_v28, %v5616_v29  ;;  %v5678_v35 = vld [vmem:[#allocation11 + $0x120] sm:$0xf]  ;;  %v7006_v28 = vld [vmem:[#allocation11 + $0x20c] sm:$0xf0] }
 0x141   :  { %v5419_v43 = vor.u32 %v6909_v38, %v5416_v39  ;;  %v5870_v38 = vld [vmem:[#allocation11 + $0x2a0] sm:$0xf]  ;;  %v5679_v39 = vor.u32 %v6978_v36, %v5678_v35  ;;  %v5712_v35 = vld [vmem:[#allocation11 + $0x170] sm:$0xf0] }
 0x142   :  { %2949 = vmatpush.bf16.msra.mxu0 %v5631_v40  ;;  %v7026_v40 = vld [vmem:[#allocation11 + $0x2ac] sm:$0xf0]  ;;  %v6030_v29 = vld [vmem:[#allocation11 + $0x3e0] sm:$0xf] }
 0x144   :  { %2139 = vmatpush.bf16.msrb.mxu2 %v5355_v57  ;;  %2100 = vmatpush.bf16.msra.mxu3 %v5479_v45  ;;  %v6958_v57 = vld [vmem:[#allocation11 + $0x8c] sm:$0xf0]  ;;  %v5582_v45 = vld [vmem:[#allocation11 + $0x60] sm:$0xf] }
 0x145   :  { %v5599_v56 = vor.u32 %v6958_v57, %v5598_v44  ;;  %v5583_v49 = vor.u32 %v6954_v46, %v5582_v45  ;;  %v5662_v57 = vld [vmem:[#allocation11 + $0x100] sm:$0xf]  ;;  %v6974_v45 = vld [vmem:[#allocation11 + $0x10c] sm:$0xf0] }
 0x146   :  { %2950 = vmatpush.bf16.msra.mxu0 %v5615_v42  ;;  %v5600_v42 = vld [vmem:[#allocation11 + $0x90] sm:$0xf0] }
 0x147   :  { %2053 = vmatmul.bf16.vlgmr.msrb.gmra.mxu3 %v7686_v27  ;;  %v5603_v44 = vor.u32 %v6956_v41, %v5600_v42 }
 0x148   :  { %2140 = vmatpush.bf16.msrb.mxu2 %v5339_v48  ;;  %2101 = vmatpush.bf16.msra.mxu3 %v5463_v51  ;;  %v5775_v51 = vor.u32 %v7002_v60, %v5774_v47  ;;  %v7022_v47 = vld [vmem:[#allocation11 + $0x28c] sm:$0xf0]  ;;  %v6952_v60 = vld [vmem:[#allocation11 + $0x64] sm:$0xf] }
 0x14a   :  { %2951 = vmatpush.bf16.msra.mxu0 %v5599_v56  ;;  %2961 = vmatpush.bf16.msra.mxu1 %v5775_v51  ;;  %v5854_v56 = vld [vmem:[#allocation11 + $0x280] sm:$0xf]  ;;  %v5663_v51 = vor.u32 %v6974_v45, %v5662_v57  ;;  %v7062_v57 = vld [vmem:[#allocation11 + $0x3cc] sm:$0xf0] }
 0x14c   :  { %2141 = vmatpush.bf16.msrb.mxu2 %v5323_v25  ;;  %2102 = vmatpush.bf16.msra.mxu3 %v5447_v53  ;;  %v5758_v25 = vld [vmem:[#allocation11 + $0x1c0] sm:$0xf]  ;;  %v5567_v53 = vor.u32 %v6950_v52, %v5566_v58  ;;  %v7000_v58 = vld [vmem:[#allocation11 + $0x1e4] sm:$0xf]  ;;  %v5776_v52 = vld [vmem:[#allocation11 + $0x1f0] sm:$0xf0] }
 0x14d   :  { %v5759_v55 = vor.u32 %v6998_v54, %v5758_v25  ;;  %v5838_v54 = vld [vmem:[#allocation11 + $0x260] sm:$0xf] }
 0x14e   :  { %2952 = vmatpush.bf16.msra.mxu0 %v5583_v49  ;;  %v5855_v49 = vor.u32 %v7022_v47, %v5854_v56  ;;  %v6980_v56 = vld [vmem:[#allocation11 + $0x144] sm:$0xf] }
 0x14f   :  { %2962 = vmatpush.bf16.msra.mxu1 %v5759_v55  ;;  %v7018_v55 = vld [vmem:[#allocation11 + $0x26c] sm:$0xf0]  ;;  %v7028_v47 = vld [vmem:[#allocation11 + $0x2c4] sm:$0xf] }
 0x150   :  { %2142 = vmatpush.bf16.msrb.mxu2 %v5307_v62  ;;  %2103 = vmatpush.bf16.msra.mxu3 %v5431_v63  ;;  %v5742_v62 = vld [vmem:[#allocation11 + $0x1a0] sm:$0xf]  ;;  %v5551_v63 = vor.u32 %v6946_v61, %v5550_v59  ;;  %v5839_v59 = vor.u32 %v7018_v55, %v5838_v54  ;;  %v6948_v61 = vld [vmem:[#allocation11 + $0x44] sm:$0xf] }
 0x151   :  { %v5743_v0 = vor.u32 %v6994_v33, %v5742_v62  ;;  %v5568_v62 = vld [vmem:[#allocation11 + $0x50] sm:$0xf0]  ;;  %v7024_v54 = vld [vmem:[#allocation11 + $0x2a4] sm:$0xf] }
 0x152   :  { %2953 = vmatpush.bf16.msra.mxu0 %v5567_v53  ;;  %v5779_v53 = vor.u32 %v7000_v58, %v5776_v52  ;;  %v5571_v33 = vor.u32 %v6948_v61, %v5568_v62  ;;  %v7058_v58 = vld [vmem:[#allocation11 + $0x3ac] sm:$0xf0]  ;;  %v7711_v61 = vld [vmem:[#allocation10] sm:$0xf] }
 0x153   :  { %2963 = vmatpush.bf16.msra.mxu1 %v5743_v0  ;;  %v5760_v0 = vld [vmem:[#allocation11 + $0x1d0] sm:$0xf0] }
 0x154   :  { %2143 = vmatpush.bf16.msrb.mxu2 %v5291_v5  ;;  %2104 = vmatpush.bf16.msra.mxu3 %v5415_v6  ;;  %v5535_v5 = vor.u32 %v6942_v3, %v5534_v2  ;;  %v6990_v6 = vld [vmem:[#allocation11 + $0x18c] sm:$0xf0]  ;;  %v5822_v3 = vld [vmem:[#allocation11 + $0x240] sm:$0xf] }
 0x155   :  { %v7694_v14 = vpop.f32.mrf.mxu0 }
 0x156   :  { %2954 = vmatpush.bf16.msra.mxu0 %v5551_v63  ;;  %v6996_v63 = vld [vmem:[#allocation11 + $0x1c4] sm:$0xf] }
 0x157   :  { %2144 = vmatmul.bf16.vlgmr.msrb.gmra.mxu2 %v7679_v24  ;;  %2105 = vmatmul.bf16.vlgmr.msra.gmra.mxu3 %v7686_v27  ;;  %v5451_v24 = vor.u32 %v6917_v22, %v5448_v23  ;;  %v6982_v22 = vld [vmem:[#allocation11 + $0x14c] sm:$0xf0]  ;;  %v5886_v23 = vld [vmem:[#allocation11 + $0x2c0] sm:$0xf]  ;;  %v5763_v2 = vor.u32 %v6996_v63, %v5760_v0 }
 0x158   :  { %2149 = vmatpush.bf16.msrb.mxu3 %v5531_v7  ;;  %v5727_v7 = vor.u32 %v6990_v6, %v5726_v4  ;;  %v5887_v31 = vor.u32 %v7030_v26, %v5886_v23  ;;  %v7014_v4 = vld [vmem:[#allocation11 + $0x24c] sm:$0xf0]  ;;  %v6944_v6 = vld [vmem:[#allocation11 + $0x24] sm:$0xf]  ;;  %v5790_v26 = vld [vmem:[#allocation11 + $0x200] sm:$0xf] }
 0x159   :  { %v7054_v0 = vld [vmem:[#allocation11 + $0x38c] sm:$0xf0] }
 0x15a   :  { %2955 = vmatpush.bf16.msra.mxu0 %v5535_v5  ;;  %2964 = vmatpush.bf16.msra.mxu1 %v5727_v7  ;;  %v5823_v5 = vor.u32 %v7014_v4, %v5822_v3  ;;  %v5552_v7 = vld [vmem:[#allocation11 + $0x30] sm:$0xf0]  ;;  %v6972_v3 = vld [vmem:[#allocation11 + $0x104] sm:$0xf] }
 0x15b   :  { %v5664_v4 = vld [vmem:[#allocation11 + $0x110] sm:$0xf0] }
 0x15c   :  { %2150 = vmatpush.bf16.msrb.mxu3 %v5515_v10  ;;  %v5651_v10 = vor.u32 %v6968_v8, %v5648_v9  ;;  %v6992_v8 = vld [vmem:[#allocation11 + $0x1a4] sm:$0xf]  ;;  %v5555_v9 = vor.u32 %v6944_v6, %v5552_v7  ;;  %v1306_v6 = vperm.slane %v7711_v61, 0  ;;  %v5667_v7 = vor.u32 %v6972_v3, %v5664_v4 }
 0x15d   :  { %v1965_v21 = vpop.f32.mrf.mxu0 }
 0x15e   :  { %3000 = vmatpush.bf16.msrb.mxu0 %v5651_v10  ;;  %v5694_v21 = vld [vmem:[#allocation11 + $0x140] sm:$0xf]  ;;  %2965 = vmatpush.bf16.msra.mxu1 %v5711_v15  ;;  %v5744_v10 = vld [vmem:[#allocation11 + $0x1b0] sm:$0xf0] }
 0x15f   :  { %v5806_v15 = vld [vmem:[#allocation11 + $0x220] sm:$0xf] }
 0x160   :  { %2151 = vmatpush.bf16.msrb.mxu3 %v5499_v13  ;;  %v5902_v13 = vld [vmem:[#allocation11 + $0x2e0] sm:$0xf] }
 0x161   :  { %v5903_v19 = vor.u32 %v7034_v16, %v5902_v13  ;;  %v5747_v13 = vor.u32 %v6992_v8, %v5744_v10  ;;  %v7010_v16 = vld [vmem:[#allocation11 + $0x22c] sm:$0xf0]  ;;  %v5856_v8 = vld [vmem:[#allocation11 + $0x290] sm:$0xf0]  ;;  %v5966_v10 = vld [vmem:[#allocation11 + $0x360] sm:$0xf] }
 0x163   :  { %2974 = vmatpush.bf16.msra.mxu2 %v5903_v19  ;;  %v5536_v19 = vld [vmem:[#allocation11 + $0x10] sm:$0xf0] }
 0x164   :  { %2152 = vmatpush.bf16.msrb.mxu3 %v5483_v17  ;;  %v6964_v17 = vld [vmem:[#allocation11 + $0xc4] sm:$0xf] }
 0x166   :  { %v7696_v37 = vpop.f32.mrf.mxu0 }
 0x167   :  { %2975 = vmatpush.bf16.msra.mxu2 %v5887_v31  ;;  %v5791_v31 = vor.u32 %v7006_v28, %v5790_v26  ;;  %v7012_v26 = vld [vmem:[#allocation11 + $0x244] sm:$0xf]  ;;  %v5824_v28 = vld [vmem:[#allocation11 + $0x250] sm:$0xf0] }
 0x168   :  { %2153 = vmatpush.bf16.msrb.mxu3 %v5467_v20  ;;  %v5635_v20 = vor.u32 %v6964_v17, %v5632_v18  ;;  %v5807_v17 = vor.u32 %v7010_v16, %v5806_v15  ;;  %v6940_v18 = vld [vmem:[#allocation11 + $0x4] sm:$0xf] }
 0x169   :  { %v7016_v16 = vld [vmem:[#allocation11 + $0x264] sm:$0xf] }
 0x16a   :  { %3001 = vmatpush.bf16.msrb.mxu0 %v5635_v20  ;;  %v6988_v20 = vld [vmem:[#allocation11 + $0x184] sm:$0xf] }
 0x16c   :  { %2154 = vmatpush.bf16.msrb.mxu3 %v5451_v24 }
 0x16e   :  { %v2017_v48 = vpop.f32.mrf.mxu0  ;;  %3002 = vmatpush.bf16.msrb.mxu0 %v5619_v34  ;;  %v6984_v34 = vld [vmem:[#allocation11 + $0x164] sm:$0xf] }
 0x16f   :  { %v5584_v48 = vld [vmem:[#allocation11 + $0x70] sm:$0xf0] }
 0x170   :  { %2155 = vmatpush.bf16.msrb.mxu3 %v5435_v32  ;;  %v5695_v32 = vor.u32 %v6982_v22, %v5694_v21  ;;  %v5587_v25 = vor.u32 %v6952_v60, %v5584_v48  ;;  %v5539_v21 = vor.u32 %v6940_v18, %v5536_v19  ;;  %v5728_v22 = vld [vmem:[#allocation11 + $0x190] sm:$0xf0]  ;;  %v1964_v18 = vadd.f32 %v7694_v14, %v1306_v6 }
 0x171   :  { %v5888_v48 = vld [vmem:[#allocation11 + $0x2d0] sm:$0xf0] }
 0x172   :  { %2966 = vmatpush.bf16.msra.mxu1 %v5695_v32  ;;  %3003 = vmatpush.bf16.msrb.mxu0 %v5603_v44  ;;  %v7066_v32 = vld [vmem:[#allocation11 + $0x3ec] sm:$0xf0]  ;;  %v6014_v44 = vld [vmem:[#allocation11 + $0x3c0] sm:$0xf] }
 0x173   :  { %v6031_v36 = vor.u32 %v7066_v32, %v6030_v29  ;;  %v6015_v45 = vor.u32 %v7062_v57, %v6014_v44 }
 0x174   :  { %2156 = vmatpush.bf16.msrb.mxu3 %v5419_v43  ;;  %v7699_v50 = vpop.f32.mrf.mxu1  ;;  %v5871_v43 = vor.u32 %v7026_v40, %v5870_v38  ;;  %v5715_v38 = vor.u32 %v6984_v34, %v5712_v35  ;;  %v5904_v40 = vld [vmem:[#allocation11 + $0x2f0] sm:$0xf0]  ;;  %v5934_v34 = vld [vmem:[#allocation11 + $0x320] sm:$0xf]  ;;  %v7042_v35 = vld [vmem:[#allocation11 + $0x32c] sm:$0xf0] }
 0x175   :  { %v1977_v29 = vadd.f32 %v7699_v50, %v1964_v18  ;;  %v5918_v50 = vld [vmem:[#allocation11 + $0x300] sm:$0xf] }
 0x176   :  { %2967 = vmatpush.bf16.msra.mxu1 %v5679_v39  ;;  %2976 = vmatpush.bf16.msra.mxu2 %v5871_v43  ;;  %v7032_v39 = vld [vmem:[#allocation11 + $0x2e4] sm:$0xf] }
 0x177   :  { %2157 = vmatmul.bf16.vlgmr.msrb.gmra.mxu3 %v7686_v27  ;;  %3004 = vmatpush.bf16.msrb.mxu0 %v5587_v25  ;;  %v5907_v43 = vor.u32 %v7032_v39, %v5904_v40  ;;  %v6976_v25 = vld [vmem:[#allocation11 + $0x124] sm:$0xf]  ;;  %v5808_v39 = vld [vmem:[#allocation11 + $0x230] sm:$0xf0] }
 0x178   :  { %2987 = vmatpush.bf16.msra.mxu3 %v6031_v36  ;;  %v5935_v36 = vor.u32 %v7042_v35, %v5934_v34  ;;  %v6951_v34 = vld [vmem:[#allocation11 + $0x54] sm:$0xf0]  ;;  %v5766_v35 = vld [vmem:[#allocation11 + $0x1c8] sm:$0xf] }
 0x17a   :  { %2968 = vmatpush.bf16.msra.mxu1 %v5663_v51  ;;  %2977 = vmatpush.bf16.msra.mxu2 %v5855_v49  ;;  %v5891_v51 = vor.u32 %v7028_v47, %v5888_v48  ;;  %v5998_v49 = vld [vmem:[#allocation11 + $0x3a0] sm:$0xf]  ;;  %v7004_v47 = vld [vmem:[#allocation11 + $0x204] sm:$0xf] }
 0x17b   :  { %3005 = vmatpush.bf16.msrb.mxu0 %v5571_v33  ;;  %v5999_v52 = vor.u32 %v7058_v58, %v5998_v49  ;;  %v5982_v33 = vld [vmem:[#allocation11 + $0x380] sm:$0xf]  ;;  %v7064_v48 = vld [vmem:[#allocation11 + $0x3e4] sm:$0xf]  ;;  %v5638_v49 = vld [vmem:[#allocation11 + $0xc8] sm:$0xf] }
 0x17c   :  { %v1978_v1 = vpop.f32.mrf.mxu1  ;;  %2988 = vmatpush.bf16.msra.mxu3 %v6015_v45  ;;  %v6967_v58 = vld [vmem:[#allocation11 + $0xd4] sm:$0xf0] }
 0x17e   :  { %3013 = vmatpush.bf16.msrb.mxu1 %v5779_v53  ;;  %2978 = vmatpush.bf16.msra.mxu2 %v5839_v59  ;;  %v5680_v53 = vld [vmem:[#allocation11 + $0x130] sm:$0xf0] }
 0x17f   :  { %3006 = vmatpush.bf16.msrb.mxu0 %v5555_v9  ;;  %v5683_v55 = vor.u32 %v6976_v25, %v5680_v53  ;;  %v5872_v59 = vld [vmem:[#allocation11 + $0x2b0] sm:$0xf0] }
 0x180   :  { %v5875_v63 = vor.u32 %v7024_v54, %v5872_v59  ;;  %2989 = vmatpush.bf16.msra.mxu3 %v5999_v52  ;;  %v6032_v25 = vld [vmem:[#allocation11 + $0x3f0] sm:$0xf0]  ;;  %v1307_v54 = vperm.slane %v7711_v61, 1  ;;  %v5639_v59 = vor.u32 %v6967_v58, %v5638_v49  ;;  %v5542_v58 = vld [vmem:[#allocation11 + $0x8] sm:$0xf] }
 0x181   :  { %v6035_v53 = vor.u32 %v7064_v48, %v6032_v25  ;;  %v5734_v25 = vld [vmem:[#allocation11 + $0x188] sm:$0xf] }
 0x182   :  { %3014 = vmatpush.bf16.msrb.mxu1 %v5763_v2  ;;  %2979 = vmatpush.bf16.msra.mxu2 %v5823_v5  ;;  %v5983_v2 = vor.u32 %v7054_v0, %v5982_v33  ;;  %v7020_v5 = vld [vmem:[#allocation11 + $0x284] sm:$0xf]  ;;  %v6963_v33 = vld [vmem:[#allocation11 + $0xb4] sm:$0xf0] }
 0x183   :  { %3007 = vmatpush.bf16.msrb.mxu0 %v5539_v21  ;;  %v5859_v9 = vor.u32 %v7020_v5, %v5856_v8  ;;  %v7060_v0 = vld [vmem:[#allocation11 + $0x3c4] sm:$0xf]  ;;  %v2016_v5 = vadd.f32 %v7696_v37, %v1307_v54  ;;  %v7003_v37 = vld [vmem:[#allocation11 + $0x1f4] sm:$0xf0] }
 0x184   :  { %v7703_v30 = vpop.f32.mrf.mxu1  ;;  %2990 = vmatpush.bf16.msra.mxu3 %v5983_v2  ;;  %v6016_v2 = vld [vmem:[#allocation11 + $0x3d0] sm:$0xf0]  ;;  %v6991_v54 = vld [vmem:[#allocation11 + $0x194] sm:$0xf0] }
 0x185   :  { %v6019_v4 = vor.u32 %v7060_v0, %v6016_v2  ;;  %v2029_v8 = vadd.f32 %v7703_v30, %v2016_v5  ;;  %v5735_v5 = vor.u32 %v6991_v54, %v5734_v25 }
 0x186   :  { %v7701_v27 = vpop.f32.mrf.mxu0  ;;  %3015 = vmatpush.bf16.msrb.mxu1 %v5747_v13  ;;  %2980 = vmatpush.bf16.msra.mxu2 %v5807_v17  ;;  %v7050_v13 = vld [vmem:[#allocation11 + $0x36c] sm:$0xf0]  ;;  %v5840_v17 = vld [vmem:[#allocation11 + $0x270] sm:$0xf0] }
 0x187   :  { %v5967_v15 = vor.u32 %v7050_v13, %v5966_v10  ;;  %v5843_v19 = vor.u32 %v7016_v16, %v5840_v17  ;;  %v7056_v10 = vld [vmem:[#allocation11 + $0x3a4] sm:$0xf]  ;;  %v6000_v13 = vld [vmem:[#allocation11 + $0x3b0] sm:$0xf0] }
 0x189   :  { %2991 = vmatpush.bf16.msra.mxu3 %v5967_v15  ;;  %v6003_v15 = vor.u32 %v7056_v10, %v6000_v13  ;;  %v7036_v10 = vld [vmem:[#allocation11 + $0x304] sm:$0xf]  ;;  %v5920_v13 = vld [vmem:[#allocation11 + $0x310] sm:$0xf0] }
 0x18a   :  { %2981 = vmatpush.bf16.msra.mxu2 %v5791_v31  ;;  %v5827_v31 = vor.u32 %v7012_v26, %v5824_v28  ;;  %v5984_v26 = vld [vmem:[#allocation11 + $0x390] sm:$0xf0] }
 0x18c   :  { %v2030_v46 = vpop.f32.mrf.mxu1 }
 0x18d   :  { %v5696_v46 = vld [vmem:[#allocation11 + $0x150] sm:$0xf0] }
 0x18e   :  { %v2069_v24 = vpop.f32.mrf.mxu0  ;;  %3026 = vmatpush.bf16.msrb.mxu2 %v5907_v43  ;;  %v5699_v60 = vor.u32 %v6980_v56, %v5696_v46  ;;  %v7038_v56 = vld [vmem:[#allocation11 + $0x30c] sm:$0xf0] }
 0x18f   :  { %v5731_v24 = vor.u32 %v6988_v20, %v5728_v22  ;;  %v5950_v22 = vld [vmem:[#allocation11 + $0x340] sm:$0xf]  ;;  %v5919_v46 = vor.u32 %v7038_v56, %v5918_v50  ;;  %v5750_v50 = vld [vmem:[#allocation11 + $0x1a8] sm:$0xf]  ;;  %v6995_v56 = vld [vmem:[#allocation11 + $0x1b4] sm:$0xf0] }
 0x190   :  { %v5751_v49 = vor.u32 %v6995_v56, %v5750_v50  ;;  %v5670_v50 = vld [vmem:[#allocation11 + $0x108] sm:$0xf]  ;;  %v6975_v56 = vld [vmem:[#allocation11 + $0x114] sm:$0xf0] }
 0x191   :  { %3016 = vmatpush.bf16.msrb.mxu1 %v5731_v24 }
 0x192   :  { %3027 = vmatpush.bf16.msrb.mxu2 %v5891_v51 }
 0x194   :  { %v7705_v1 = vpop.f32.mrf.mxu1 }
 0x195   :  { %3017 = vmatpush.bf16.msrb.mxu1 %v5715_v38  ;;  %v7008_v38 = vld [vmem:[#allocation11 + $0x224] sm:$0xf] }
 0x196   :  { %3028 = vmatpush.bf16.msrb.mxu2 %v5875_v63  ;;  %v5811_v43 = vor.u32 %v7008_v38, %v5808_v39  ;;  %v5622_v63 = vld [vmem:[#allocation11 + $0xa8] sm:$0xf]  ;;  %v5968_v38 = vld [vmem:[#allocation11 + $0x370] sm:$0xf0] }
 0x197   :  { %v5623_v6 = vor.u32 %v6963_v33, %v5622_v63  ;;  %v6969_v63 = vld [vmem:[#allocation11 + $0xec] sm:$0xf]  ;;  %v5656_v33 = vld [vmem:[#allocation11 + $0xf8] sm:$0xf0] }
 0x199   :  { %3018 = vmatpush.bf16.msrb.mxu1 %v5699_v60  ;;  %v5792_v60 = vld [vmem:[#allocation11 + $0x210] sm:$0xf0] }
 0x19a   :  { %v7709_v12 = vpop.f32.mrf.mxu2  ;;  %3029 = vmatpush.bf16.msrb.mxu2 %v5859_v9  ;;  %v5795_v52 = vor.u32 %v7004_v47, %v5792_v60  ;;  %v6959_v9 = vld [vmem:[#allocation11 + $0x94] sm:$0xf0] }
 0x19b   :  { %v1990_v32 = vadd.f32 %v7709_v12, %v1977_v29 }
 0x19c   :  { %v2082_v23 = vpop.f32.mrf.mxu1 }
 0x19d   :  { %3019 = vmatpush.bf16.msrb.mxu1 %v5683_v55  ;;  %v7046_v23 = vld [vmem:[#allocation11 + $0x34c] sm:$0xf0] }
 0x19e   :  { %3030 = vmatpush.bf16.msrb.mxu2 %v5843_v19  ;;  %v5951_v24 = vor.u32 %v7046_v23, %v5950_v22  ;;  %v5590_v19 = vld [vmem:[#allocation11 + $0x68] sm:$0xf] }
 0x19f   :  { %v5782_v22 = vld [vmem:[#allocation11 + $0x1e8] sm:$0xf] }
 0x1a0   :  { %2992 = vmatpush.bf16.msra.mxu3 %v5951_v24  ;;  %v7052_v24 = vld [vmem:[#allocation11 + $0x384] sm:$0xf] }
 0x1a1   :  { %3020 = vmatpush.bf16.msrb.mxu1 %v5667_v7  ;;  %v5606_v7 = vld [vmem:[#allocation11 + $0x88] sm:$0xf]  ;;  %v5987_v28 = vor.u32 %v7052_v24, %v5984_v26  ;;  %v6983_v24 = vld [vmem:[#allocation11 + $0x154] sm:$0xf0] }
 0x1a2   :  { %v1991_v42 = vpop.f32.mrf.mxu2  ;;  %3031 = vmatpush.bf16.msrb.mxu2 %v5827_v31  ;;  %v5607_v18 = vor.u32 %v6959_v9, %v5606_v7  ;;  %v5783_v31 = vor.u32 %v7003_v37, %v5782_v22  ;;  %v6987_v7 = vld [vmem:[#allocation11 + $0x174] sm:$0xf0]  ;;  %v5910_v9 = vld [vmem:[#allocation11 + $0x2e8] sm:$0xf] }
 0x1a3   :  { %v6971_v42 = vld [vmem:[#allocation11 + $0xf4] sm:$0xf0]  ;;  %v5702_v37 = vld [vmem:[#allocation11 + $0x148] sm:$0xf] }
 0x1a4   :  { %2993 = vmatpush.bf16.msra.mxu3 %v5935_v36  ;;  %v7048_v36 = vld [vmem:[#allocation11 + $0x364] sm:$0xf]  ;;  %v5894_v26 = vld [vmem:[#allocation11 + $0x2c8] sm:$0xf] }
 0x1a5   :  { %v5971_v39 = vor.u32 %v7048_v36, %v5968_v38  ;;  %v5686_v36 = vld [vmem:[#allocation11 + $0x128] sm:$0xf]  ;;  %v6979_v38 = vld [vmem:[#allocation11 + $0x134] sm:$0xf0] }
 0x1a6   :  { %v7707_v11 = vpop.f32.mrf.mxu0  ;;  %3032 = vmatpush.bf16.msrb.mxu2 %v5811_v43 }
 0x1a8   :  { %2994 = vmatpush.bf16.msra.mxu3 %v5919_v46  ;;  %v5952_v46 = vld [vmem:[#allocation11 + $0x350] sm:$0xf0] }
 0x1aa   :  { %v7713_v62 = vpop.f32.mrf.mxu2  ;;  %3033 = vmatpush.bf16.msrb.mxu2 %v5795_v52  ;;  %v6943_v52 = vld [vmem:[#allocation11 + $0x14] sm:$0xf0] }
 0x1ab   :  { %v2042_v16 = vadd.f32 %v7713_v62, %v2029_v8 }
 0x1ac   :  { %3039 = vmatpush.bf16.msrb.mxu3 %v6035_v53 }
 0x1ae   :  { %v2121_v41 = vpop.f32.mrf.mxu0 }
 0x1af   :  { %v5654_v41 = vld [vmem:[#allocation11 + $0xe8] sm:$0xf] }
 0x1b0   :  { %v5655_v12 = vor.u32 %v6971_v42, %v5654_v41  ;;  %3040 = vmatpush.bf16.msrb.mxu3 %v6019_v4  ;;  %v5543_v4 = vor.u32 %v6943_v52, %v5542_v58  ;;  %v5671_v58 = vor.u32 %v6975_v56, %v5670_v50  ;;  %v6981_v50 = vld [vmem:[#allocation11 + $0x14c] sm:$0xf]  ;;  %v5704_v56 = vld [vmem:[#allocation11 + $0x158] sm:$0xf0] }
 0x1b2   :  { %v2043_v20 = vpop.f32.mrf.mxu2 }
 0x1b3   :  { %v6955_v20 = vld [vmem:[#allocation11 + $0x74] sm:$0xf0] }
 0x1b4   :  { %v7717_v21 = vpop.f32.mrf.mxu1  ;;  %3041 = vmatpush.bf16.msrb.mxu3 %v6003_v15  ;;  %v5591_v29 = vor.u32 %v6955_v20, %v5590_v19  ;;  %v7035_v15 = vld [vmem:[#allocation11 + $0x2f4] sm:$0xf0] }
 0x1b5   :  { %v5911_v22 = vor.u32 %v7035_v15, %v5910_v9  ;;  %v6993_v9 = vld [vmem:[#allocation11 + $0x1ac] sm:$0xf] }
 0x1b8   :  { %3042 = vmatpush.bf16.msrb.mxu3 %v5987_v28  ;;  %v7031_v28 = vld [vmem:[#allocation11 + $0x2d4] sm:$0xf0] }
 0x1ba   :  { %v2002_v14 = vpop.f32.mrf.mxu3 }
 0x1bb   :  { %v2003_v40 = vadd.f32 %v2002_v14, %v1990_v32  ;;  %v5574_v32 = vld [vmem:[#allocation11 + $0x48] sm:$0xf]  ;;  %v6999_v14 = vld [vmem:[#allocation11 + $0x1d4] sm:$0xf0] }
 0x1bc   :  { %v7721_v44 = vpop.f32.mrf.mxu2  ;;  %v2134_v45 = vpop.f32.mrf.mxu1  ;;  %v5575_v42 = vor.u32 %v6951_v34, %v5574_v32  ;;  %v5767_v43 = vor.u32 %v6999_v14, %v5766_v35  ;;  %3043 = vmatpush.bf16.msrb.mxu3 %v5971_v39  ;;  %v5703_v34 = vor.u32 %v6983_v24, %v5702_v37  ;;  %v5895_v35 = vor.u32 %v7031_v28, %v5894_v26  ;;  %v5878_v39 = vld [vmem:[#allocation11 + $0x2a8] sm:$0xf]  ;;  %v5736_v37 = vld [vmem:[#allocation11 + $0x198] sm:$0xf0] }
 0x1bd   :  { %v2162_v57 = vmax.f32 %v2003_v40, 0.0  ;;  %v1308_v40 = vperm.slane %v7711_v61, 2  ;;  %v6947_v45 = vld [vmem:[#allocation11 + $0x34] sm:$0xf0] }
 0x1bf   :  { %v7723_v51 = vpack.c.bf16 %v2162_v57, %v2162_v57  ;;  %v5558_v57 = vld [vmem:[#allocation11 + $0x28] sm:$0xf]  ;;  %v2068_v60 = vadd.f32 %v7701_v27, %v1308_v40  ;;  %v7027_v40 = vld [vmem:[#allocation11 + $0x2b4] sm:$0xf0] }
 0x1c0   :  { %v5559_v48 = vor.u32 %v6947_v45, %v5558_v57  ;;  %v5879_v57 = vor.u32 %v7027_v40, %v5878_v39 }
 0x1c1   :  { %2956 = vmatmul.bf16.vlgmr.msra.gmra.mxu0 %v7723_v51  ;;  %v2081_v53 = vadd.f32 %v7705_v1, %v2068_v60  ;;  %v5659_v1 = vor.u32 %v6969_v63, %v5656_v33  ;;  %v5592_v60 = vld [vmem:[#allocation11 + $0x78] sm:$0xf0]  ;;  %v6997_v33 = vld [vmem:[#allocation11 + $0x1cc] sm:$0xf] }
 0x1c2   :  { %3052 = vmatpush.bf16.msra.mxu0 %v5655_v12  ;;  %v2004_v55 = vpop.f32.mrf.mxu3  ;;  %v7044_v12 = vld [vmem:[#allocation11 + $0x344] sm:$0xf]  ;;  %v5576_v63 = vld [vmem:[#allocation11 + $0x58] sm:$0xf0] }
 0x1c3   :  { %v5955_v47 = vor.u32 %v7044_v12, %v5952_v46  ;;  %v7040_v55 = vld [vmem:[#allocation11 + $0x324] sm:$0xf]  ;;  %v2094_v2 = vadd.f32 %v7721_v44, %v2081_v53  ;;  %v5862_v12 = vld [vmem:[#allocation11 + $0x288] sm:$0xf]  ;;  %v7023_v46 = vld [vmem:[#allocation11 + $0x294] sm:$0xf0] }
 0x1c4   :  { %v2095_v3 = vpop.f32.mrf.mxu2  ;;  %v5863_v52 = vor.u32 %v7023_v46, %v5862_v12  ;;  %v5846_v53 = vld [vmem:[#allocation11 + $0x268] sm:$0xf]  ;;  %v7029_v12 = vld [vmem:[#allocation11 + $0x2cc] sm:$0xf]  ;;  %v5896_v46 = vld [vmem:[#allocation11 + $0x2d8] sm:$0xf0] }
 0x1c5   :  { %3044 = vmatpush.bf16.msrb.mxu3 %v5955_v47  ;;  %v6953_v47 = vld [vmem:[#allocation11 + $0x6c] sm:$0xf] }
 0x1c6   :  { %3053 = vmatpush.bf16.msra.mxu0 %v5639_v59  ;;  %v5936_v59 = vld [vmem:[#allocation11 + $0x330] sm:$0xf0]  ;;  %v5595_v25 = vor.u32 %v6953_v47, %v5592_v60 }
 0x1c7   :  { %v5939_v0 = vor.u32 %v7040_v55, %v5936_v59  ;;  %v7019_v55 = vld [vmem:[#allocation11 + $0x274] sm:$0xf0]  ;;  %v6949_v59 = vld [vmem:[#allocation11 + $0x4c] sm:$0xf] }
 0x1c9   :  { %3045 = vmatpush.bf16.msrb.mxu3 %v5939_v0  ;;  %v5768_v0 = vld [vmem:[#allocation11 + $0x1d8] sm:$0xf0] }
 0x1ca   :  { %3054 = vmatpush.bf16.msra.mxu0 %v5623_v6  ;;  %v2054_v17 = vpop.f32.mrf.mxu3  ;;  %v5718_v6 = vld [vmem:[#allocation11 + $0x168] sm:$0xf] }
 0x1cb   :  { %v2055_v23 = vadd.f32 %v2054_v17, %v2042_v16  ;;  %v6965_v16 = vld [vmem:[#allocation11 + $0xcc] sm:$0xf]  ;;  %v5640_v17 = vld [vmem:[#allocation11 + $0xd8] sm:$0xf0]  ;;  %v5719_v19 = vor.u32 %v6987_v7, %v5718_v6  ;;  %v5771_v6 = vor.u32 %v6997_v33, %v5768_v0  ;;  %v7015_v7 = vld [vmem:[#allocation11 + $0x254] sm:$0xf0] }
 0x1cc   :  { %v5990_v33 = vld [vmem:[#allocation11 + $0x388] sm:$0xf]  ;;  %v7055_v0 = vld [vmem:[#allocation11 + $0x394] sm:$0xf0] }
 0x1cd   :  { %v2163_v30 = vmax.f32 %v2055_v23, 0.0  ;;  %v5643_v23 = vor.u32 %v6965_v16, %v5640_v17  ;;  %v5814_v16 = vld [vmem:[#allocation11 + $0x228] sm:$0xf] }
 0x1ce   :  { %3055 = vmatpush.bf16.msra.mxu0 %v5607_v18  ;;  %v5923_v18 = vor.u32 %v7036_v10, %v5920_v13  ;;  %v5752_v10 = vld [vmem:[#allocation11 + $0x1b8] sm:$0xf0] }
 0x1cf   :  { %v7730_v62 = vpack.c.bf16 %v2163_v30, %v2163_v30  ;;  %v6961_v30 = vld [vmem:[#allocation11 + $0xac] sm:$0xf] }
 0x1d0   :  { %3046 = vmatpush.bf16.msrb.mxu3 %v5923_v18  ;;  %v5755_v18 = vor.u32 %v6993_v9, %v5752_v10  ;;  %v7051_v9 = vld [vmem:[#allocation11 + $0x374] sm:$0xf0]  ;;  %v7017_v10 = vld [vmem:[#allocation11 + $0x26c] sm:$0xf] }
 0x1d1   :  { %2969 = vmatmul.bf16.vlgmr.msra.gmra.mxu1 %v7730_v62  ;;  %3008 = vmatmul.bf16.vlgmr.msrb.gmra.mxu0 %v7723_v51 }
 0x1d2   :  { %3056 = vmatpush.bf16.msra.mxu0 %v5591_v29  ;;  %3065 = vmatpush.bf16.msra.mxu1 %v5783_v31  ;;  %v2056_v41 = vpop.f32.mrf.mxu3  ;;  %v5624_v29 = vld [vmem:[#allocation11 + $0xb8] sm:$0xf0] }
 0x1d3   :  { %v5627_v14 = vor.u32 %v6961_v30, %v5624_v29  ;;  %v6957_v41 = vld [vmem:[#allocation11 + $0x8c] sm:$0xf]  ;;  %v5798_v30 = vld [vmem:[#allocation11 + $0x208] sm:$0xf]  ;;  %v7007_v29 = vld [vmem:[#allocation11 + $0x214] sm:$0xf0] }
 0x1d6   :  { %3057 = vmatpush.bf16.msra.mxu0 %v5575_v42  ;;  %3066 = vmatpush.bf16.msra.mxu1 %v5767_v43  ;;  %v5608_v42 = vld [vmem:[#allocation11 + $0x98] sm:$0xf0]  ;;  %v5687_v43 = vor.u32 %v6979_v38, %v5686_v36  ;;  %v7033_v36 = vld [vmem:[#allocation11 + $0x2ec] sm:$0xf] }
 0x1d7   :  { %v5611_v45 = vor.u32 %v6957_v41, %v5608_v42  ;;  %v5912_v38 = vld [vmem:[#allocation11 + $0x2f8] sm:$0xf0] }
 0x1da   :  { %v7738_v3 = vpop.f32.mrf.mxu2  ;;  %3058 = vmatpush.bf16.msra.mxu0 %v5559_v48  ;;  %3067 = vmatpush.bf16.msra.mxu1 %v5751_v49  ;;  %v2106_v27 = vpop.f32.mrf.mxu3  ;;  %v7001_v48 = vld [vmem:[#allocation11 + $0x1ec] sm:$0xf]  ;;  %v5784_v49 = vld [vmem:[#allocation11 + $0x1f8] sm:$0xf0] }
 0x1db   :  { %v2107_v8 = vadd.f32 %v2106_v27, %v2094_v2  ;;  %v5787_v54 = vor.u32 %v7001_v48, %v5784_v49  ;;  %v1309_v2 = vperm.slane %v7711_v61, 3  ;;  %v5847_v27 = vor.u32 %v7019_v55, %v5846_v53  ;;  %v5688_v53 = vld [vmem:[#allocation11 + $0x138] sm:$0xf0] }
 0x1dc   :  { %v5707_v48 = vor.u32 %v6981_v50, %v5704_v56  ;;  %v5899_v49 = vor.u32 %v7029_v12, %v5896_v46  ;;  %v5880_v55 = vld [vmem:[#allocation11 + $0x2b8] sm:$0xf0]  ;;  %v7049_v50 = vld [vmem:[#allocation11 + $0x36c] sm:$0xf]  ;;  %v6158_v12 = vld [vmem:[#allocation13 + $0xe0] sm:$0xf] }
 0x1dd   :  { %v2164_v44 = vmax.f32 %v2107_v8, 0.0  ;;  %v6945_v8 = vld [vmem:[#allocation11 + $0x2c] sm:$0xf]  ;;  %v2120_v13 = vadd.f32 %v7707_v11, %v1309_v2  ;;  %v5976_v56 = vld [vmem:[#allocation11 + $0x378] sm:$0xf0] }
 0x1de   :  { %3059 = vmatpush.bf16.msra.mxu0 %v5543_v4  ;;  %3068 = vmatpush.bf16.msra.mxu1 %v5735_v5  ;;  %v5579_v4 = vor.u32 %v6949_v59, %v5576_v63  ;;  %v5830_v5 = vld [vmem:[#allocation11 + $0x248] sm:$0xf]  ;;  %v6973_v2 = vld [vmem:[#allocation11 + $0x10c] sm:$0xf]  ;;  %v7098_v46 = vld [vmem:[#allocation13 + $0xec] sm:$0xf0] }
 0x1df   :  { %v7740_v20 = vpack.c.bf16 %v2164_v44, %v2164_v44  ;;  %v5831_v61 = vor.u32 %v7015_v7, %v5830_v5  ;;  %v2133_v17 = vadd.f32 %v7717_v21, %v2120_v13  ;;  %v7011_v44 = vld [vmem:[#allocation11 + $0x234] sm:$0xf0]  ;;  %v6038_v21 = vld [vmem:[#allocation11 + $0x3e8] sm:$0xf]  ;;  %v5864_v5 = vld [vmem:[#allocation11 + $0x298] sm:$0xf0] }
 0x1e0   :  { %v5815_v11 = vor.u32 %v7011_v44, %v5814_v16  ;;  %v5848_v13 = vld [vmem:[#allocation11 + $0x278] sm:$0xf0]  ;;  %v5958_v16 = vld [vmem:[#allocation11 + $0x348] sm:$0xf] }
 0x1e1   :  { %2982 = vmatmul.bf16.vlgmr.msra.gmra.mxu2 %v7740_v20  ;;  %3021 = vmatmul.bf16.vlgmr.msrb.gmra.mxu1 %v7730_v62  ;;  %v2146_v24 = vadd.f32 %v7738_v3, %v2133_v17  ;;  %v5799_v3 = vor.u32 %v7007_v29, %v5798_v30  ;;  %v7047_v17 = vld [vmem:[#allocation11 + $0x354] sm:$0xf0]  ;;  %v5832_v44 = vld [vmem:[#allocation11 + $0x258] sm:$0xf0]  ;;  %v5926_v30 = vld [vmem:[#allocation11 + $0x308] sm:$0xf] }
 0x1e2   :  { %3104 = vmatpush.bf16.msrb.mxu0 %v5659_v1  ;;  %v2147_v31 = vpop.f32.mrf.mxu2  ;;  %3069 = vmatpush.bf16.msra.mxu1 %v5719_v19  ;;  %v2108_v32 = vpop.f32.mrf.mxu3  ;;  %v5560_v1 = vld [vmem:[#allocation11 + $0x38] sm:$0xf0]  ;;  %v6941_v19 = vld [vmem:[#allocation11 + $0xc] sm:$0xf]  ;;  %v7039_v29 = vld [vmem:[#allocation11 + $0x314] sm:$0xf0] }
 0x1e3   :  { %3060 = vmatmul.bf16.vlgmr.msra.gmra.mxu0 %v7723_v51  ;;  %3078 = vmatpush.bf16.msra.mxu2 %v5911_v22  ;;  %v5563_v15 = vor.u32 %v6945_v8, %v5560_v1  ;;  %v5544_v22 = vld [vmem:[#allocation11 + $0x18] sm:$0xf0]  ;;  %v5974_v1 = vld [vmem:[#allocation11 + $0x368] sm:$0xf] }
 0x1e4   :  { %v5547_v28 = vor.u32 %v6941_v19, %v5544_v22  ;;  %v5959_v19 = vor.u32 %v7047_v17, %v5958_v16  ;;  %v6270_v16 = vld [vmem:[#allocation13 + $0x1c0] sm:$0xf] }
 0x1e6   :  { %3105 = vmatpush.bf16.msrb.mxu0 %v5643_v23  ;;  %3070 = vmatpush.bf16.msra.mxu1 %v5703_v34  ;;  %v6989_v23 = vld [vmem:[#allocation11 + $0x18c] sm:$0xf]  ;;  %v7067_v34 = vld [vmem:[#allocation11 + $0x3f4] sm:$0xf0] }
 0x1e7   :  { %3079 = vmatpush.bf16.msra.mxu2 %v5895_v35  ;;  %v5739_v32 = vor.u32 %v6989_v23, %v5736_v37  ;;  %v6985_v35 = vld [vmem:[#allocation11 + $0x16c] sm:$0xf]  ;;  %v6039_v40 = vor.u32 %v7067_v34, %v6038_v21  ;;  %v5942_v23 = vld [vmem:[#allocation11 + $0x328] sm:$0xf]  ;;  %v7043_v37 = vld [vmem:[#allocation11 + $0x334] sm:$0xf0] }
 0x1e8   :  { %v7065_v21 = vld [vmem:[#allocation11 + $0x3ec] sm:$0xf]  ;;  %v6040_v34 = vld [vmem:[#allocation11 + $0x3f8] sm:$0xf0] }
 0x1ea   :  { %3106 = vmatpush.bf16.msrb.mxu0 %v5627_v14  ;;  %3071 = vmatpush.bf16.msra.mxu1 %v5687_v43  ;;  %v5720_v14 = vld [vmem:[#allocation11 + $0x178] sm:$0xf0]  ;;  %v5915_v43 = vor.u32 %v7033_v36, %v5912_v38  ;;  %v7061_v36 = vld [vmem:[#allocation11 + $0x3cc] sm:$0xf] }
 0x1eb   :  { %3080 = vmatpush.bf16.msra.mxu2 %v5879_v57  ;;  %v5723_v42 = vor.u32 %v6985_v35, %v5720_v14  ;;  %v6022_v57 = vld [vmem:[#allocation11 + $0x3c8] sm:$0xf]  ;;  %v5927_v35 = vor.u32 %v7039_v29, %v5926_v30  ;;  %v6043_v14 = vor.u32 %v7065_v21, %v6040_v34  ;;  %v6024_v38 = vld [vmem:[#allocation11 + $0x3d8] sm:$0xf0]  ;;  %v6238_v30 = vld [vmem:[#allocation13 + $0x180] sm:$0xf] }
 0x1ec   :  { %v6160_v21 = vld [vmem:[#allocation13 + $0xf0] sm:$0xf0] }
 0x1ee   :  { %3107 = vmatpush.bf16.msrb.mxu0 %v5611_v45  ;;  %3072 = vmatpush.bf16.msra.mxu1 %v5671_v58  ;;  %v7063_v45 = vld [vmem:[#allocation11 + $0x3d4] sm:$0xf0]  ;;  %v6006_v58 = vld [vmem:[#allocation11 + $0x3a8] sm:$0xf] }
 0x1ef   :  { %3081 = vmatpush.bf16.msra.mxu2 %v5863_v52  ;;  %v6023_v60 = vor.u32 %v7063_v45, %v6022_v57  ;;  %v7059_v52 = vld [vmem:[#allocation11 + $0x3b4] sm:$0xf0]  ;;  %v5992_v57 = vld [vmem:[#allocation11 + $0x398] sm:$0xf0] }
 0x1f0   :  { %v6007_v59 = vor.u32 %v7059_v52, %v6006_v58  ;;  %v7041_v52 = vld [vmem:[#allocation11 + $0x32c] sm:$0xf] }
 0x1f1   :  { %3034 = vmatmul.bf16.vlgmr.msrb.gmra.mxu2 %v7740_v20  ;;  %3073 = vmatmul.bf16.vlgmr.msra.gmra.mxu1 %v7730_v62 }
 0x1f2   :  { %3108 = vmatpush.bf16.msrb.mxu0 %v5595_v25  ;;  %3117 = vmatpush.bf16.msrb.mxu1 %v5787_v54  ;;  %v6977_v25 = vld [vmem:[#allocation11 + $0x12c] sm:$0xf] }
 0x1f3   :  { %3082 = vmatpush.bf16.msra.mxu2 %v5847_v27  ;;  %v7025_v54 = vld [vmem:[#allocation11 + $0x2ac] sm:$0xf]  ;;  %v5672_v27 = vld [vmem:[#allocation11 + $0x118] sm:$0xf0] }
 0x1f4   :  { %v5883_v63 = vor.u32 %v7025_v54, %v5880_v55  ;;  %v5675_v7 = vor.u32 %v6973_v2, %v5672_v27  ;;  %v6110_v27 = vld [vmem:[#allocation13 + $0x80] sm:$0xf] }
 0x1f6   :  { %3109 = vmatpush.bf16.msrb.mxu0 %v5579_v4  ;;  %3118 = vmatpush.bf16.msrb.mxu1 %v5771_v6  ;;  %v7021_v4 = vld [vmem:[#allocation11 + $0x28c] sm:$0xf]  ;;  %v5991_v6 = vor.u32 %v7055_v0, %v5990_v33  ;;  %v5928_v33 = vld [vmem:[#allocation11 + $0x318] sm:$0xf0] }
 0x1f7   :  { %3083 = vmatpush.bf16.msra.mxu2 %v5831_v61  ;;  %v5867_v8 = vor.u32 %v7021_v4, %v5864_v5  ;;  %v5975_v61 = vor.u32 %v7051_v9, %v5974_v1  ;;  %v7086_v4 = vld [vmem:[#allocation13 + $0x8c] sm:$0xf0]  ;;  %v6094_v5 = vld [vmem:[#allocation13 + $0x60] sm:$0xf] }
 0x1f8   :  { %v7130_v1 = vld [vmem:[#allocation13 + $0x1ec] sm:$0xf0] }
 0x1fa   :  { %v2158_v26 = vpop.f32.mrf.mxu3  ;;  %3110 = vmatpush.bf16.msrb.mxu0 %v5563_v15  ;;  %3119 = vmatpush.bf16.msrb.mxu1 %v5755_v18  ;;  %v5851_v15 = vor.u32 %v7017_v10, %v5848_v13  ;;  %v7013_v18 = vld [vmem:[#allocation11 + $0x24c] sm:$0xf] }
 0x1fb   :  { %v2159_v31 = vadd.f32 %v2158_v26, %v2146_v24  ;;  %3084 = vmatpush.bf16.msra.mxu2 %v5815_v11  ;;  %v5835_v22 = vor.u32 %v7013_v18, %v5832_v44  ;;  %v7009_v24 = vld [vmem:[#allocation11 + $0x22c] sm:$0xf]  ;;  %v5816_v26 = vld [vmem:[#allocation11 + $0x238] sm:$0xf0]  ;;  %v5943_v11 = vor.u32 %v7043_v37, %v5942_v23  ;;  %v7126_v18 = vld [vmem:[#allocation13 + $0x1cc] sm:$0xf0] }
 0x1fc   :  { %v6271_v44 = vor.u32 %v7126_v18, %v6270_v16  ;;  %v6254_v23 = vld [vmem:[#allocation13 + $0x1a0] sm:$0xf]  ;;  %v7076_v18 = vld [vmem:[#allocation13 + $0x44] sm:$0xf] }
 0x1fd   :  { %v2165_v39 = vmax.f32 %v2159_v31, 0.0  ;;  %v7005_v31 = vld [vmem:[#allocation11 + $0x20c] sm:$0xf]  ;;  %v6350_v16 = vld [vmem:[#allocation13 + $0x260] sm:$0xf] }
 0x1fe   :  { %3111 = vmatpush.bf16.msrb.mxu0 %v5547_v28  ;;  %3120 = vmatpush.bf16.msrb.mxu1 %v5739_v32  ;;  %v5819_v28 = vor.u32 %v7009_v24, %v5816_v26  ;;  %v5800_v32 = vld [vmem:[#allocation11 + $0x218] sm:$0xf0]  ;;  %v7122_v24 = vld [vmem:[#allocation13 + $0x1ac] sm:$0xf0] }
 0x1ff   :  { %v7751_v41 = vpack.c.bf16 %v2165_v39, %v2165_v39  ;;  %3085 = vmatpush.bf16.msra.mxu2 %v5799_v3  ;;  %v6027_v39 = vor.u32 %v7061_v36, %v6024_v38  ;;  %v7057_v3 = vld [vmem:[#allocation11 + $0x3ac] sm:$0xf]  ;;  %v6414_v36 = vld [vmem:[#allocation13 + $0x2e0] sm:$0xf] }
 0x201   :  { %2995 = vmatmul.bf16.vlgmr.msra.gmra.mxu3 %v7751_v41  ;;  %3112 = vmatmul.bf16.vlgmr.msrb.gmra.mxu0 %v7723_v51  ;;  %v5691_v51 = vor.u32 %v6977_v25, %v5688_v53  ;;  %v6142_v25 = vld [vmem:[#allocation13 + $0xc0] sm:$0xf]  ;;  %v7094_v53 = vld [vmem:[#allocation13 + $0xcc] sm:$0xf0] }
 0x202   :  { %3091 = vmatpush.bf16.msra.mxu3 %v6039_v40  ;;  %v2160_v47 = vpop.f32.mrf.mxu3  ;;  %3121 = vmatpush.bf16.msrb.mxu1 %v5723_v42  ;;  %v6008_v40 = vld [vmem:[#allocation11 + $0x3b8] sm:$0xf0]  ;;  %v6143_v55 = vor.u32 %v7094_v53, %v6142_v25  ;;  %v6382_v25 = vld [vmem:[#allocation13 + $0x2a0] sm:$0xf] }
 0x203   :  { %3130 = vmatpush.bf16.msrb.mxu2 %v5915_v43  ;;  %v6011_v42 = vor.u32 %v7057_v3, %v6008_v40  ;;  %v7053_v43 = vld [vmem:[#allocation11 + $0x38c] sm:$0xf]  ;;  %v6159_v47 = vor.u32 %v7098_v46, %v6158_v12  ;;  %v7092_v3 = vld [vmem:[#allocation13 + $0xc4] sm:$0xf]  ;;  %v6144_v40 = vld [vmem:[#allocation13 + $0xd0] sm:$0xf0] }
 0x204   :  { %3086 = vmatmul.bf16.vlgmr.msra.gmra.mxu2 %v7740_v20  ;;  %v5995_v45 = vor.u32 %v7053_v43, %v5992_v57  ;;  %v6398_v12 = vld [vmem:[#allocation13 + $0x2c0] sm:$0xf] }
 0x205   :  { %3942 = vmatpush.bf16.msra.mxu0 %v6159_v47  ;;  %v7158_v47 = vld [vmem:[#allocation13 + $0x2cc] sm:$0xf0] }
 0x206   :  { %3092 = vmatpush.bf16.msra.mxu3 %v6023_v60  ;;  %3122 = vmatpush.bf16.msrb.mxu1 %v5707_v48  ;;  %v5979_v60 = vor.u32 %v7049_v50, %v5976_v56  ;;  %v7045_v48 = vld [vmem:[#allocation11 + $0x34c] sm:$0xf]  ;;  %v6206_v50 = vld [vmem:[#allocation13 + $0x140] sm:$0xf]  ;;  %v7110_v56 = vld [vmem:[#allocation13 + $0x14c] sm:$0xf0] }
 0x207   :  { %3131 = vmatpush.bf16.msrb.mxu2 %v5899_v49  ;;  %v5960_v49 = vld [vmem:[#allocation11 + $0x358] sm:$0xf0]  ;;  %v6207_v46 = vor.u32 %v7110_v56, %v6206_v50  ;;  %v6240_v50 = vld [vmem:[#allocation13 + $0x190] sm:$0xf0] }
 0x208   :  { %v5963_v58 = vor.u32 %v7045_v48, %v5960_v49  ;;  %v6128_v48 = vld [vmem:[#allocation13 + $0xb0] sm:$0xf0]  ;;  %v6399_v49 = vor.u32 %v7158_v47, %v6398_v12  ;;  %v7134_v47 = vld [vmem:[#allocation13 + $0x20c] sm:$0xf0] }
 0x209   :  { %3943 = vmatpush.bf16.msra.mxu0 %v6143_v55  ;;  %v7084_v55 = vld [vmem:[#allocation13 + $0x84] sm:$0xf] }
 0x20a   :  { %3093 = vmatpush.bf16.msra.mxu3 %v6007_v59  ;;  %3123 = vmatpush.bf16.msrb.mxu1 %v5691_v51  ;;  %v6126_v59 = vld [vmem:[#allocation13 + $0xa0] sm:$0xf]  ;;  %v7090_v51 = vld [vmem:[#allocation13 + $0xac] sm:$0xf0] }
 0x20b   :  { %3132 = vmatpush.bf16.msrb.mxu2 %v5883_v63  ;;  %v7037_v63 = vld [vmem:[#allocation11 + $0x30c] sm:$0xf]  ;;  %v6127_v0 = vor.u32 %v7090_v51, %v6126_v59  ;;  %v6112_v59 = vld [vmem:[#allocation13 + $0x90] sm:$0xf0] }
 0x20c   :  { %v5931_v2 = vor.u32 %v7037_v63, %v5928_v33 }
 0x20d   :  { %3944 = vmatpush.bf16.msra.mxu0 %v6127_v0  ;;  %v6115_v0 = vor.u32 %v7084_v55, %v6112_v59 }
 0x20e   :  { %3094 = vmatpush.bf16.msra.mxu3 %v5991_v6  ;;  %3124 = vmatpush.bf16.msrb.mxu1 %v5675_v7  ;;  %v6111_v6 = vor.u32 %v7086_v4, %v6110_v27  ;;  %v7082_v7 = vld [vmem:[#allocation13 + $0x6c] sm:$0xf0]  ;;  %v6366_v4 = vld [vmem:[#allocation13 + $0x280] sm:$0xf] }
 0x20f   :  { %3133 = vmatpush.bf16.msrb.mxu2 %v5867_v8  ;;  %v6286_v8 = vld [vmem:[#allocation13 + $0x1e0] sm:$0xf]  ;;  %v6095_v10 = vor.u32 %v7082_v7, %v6094_v5  ;;  %v7102_v27 = vld [vmem:[#allocation13 + $0x10c] sm:$0xf0] }
 0x210   :  { %v6287_v9 = vor.u32 %v7130_v1, %v6286_v8  ;;  %v7150_v5 = vld [vmem:[#allocation13 + $0x28c] sm:$0xf0]  ;;  %v7080_v8 = vld [vmem:[#allocation13 + $0x64] sm:$0xf]  ;;  %v6096_v1 = vld [vmem:[#allocation13 + $0x70] sm:$0xf0] }
 0x211   :  { %3047 = vmatmul.bf16.vlgmr.msrb.gmra.mxu3 %v7751_v41  ;;  %3125 = vmatmul.bf16.vlgmr.msrb.gmra.mxu1 %v7730_v62  ;;  %v5803_v62 = vor.u32 %v7005_v31, %v5800_v32  ;;  %v7118_v31 = vld [vmem:[#allocation13 + $0x18c] sm:$0xf0]  ;;  %v7096_v32 = vld [vmem:[#allocation13 + $0xe4] sm:$0xf]  ;;  %v6367_v7 = vor.u32 %v7150_v5, %v6366_v4 }
 0x212   :  { %3095 = vmatpush.bf16.msra.mxu3 %v5975_v61  ;;  %3945 = vmatpush.bf16.msra.mxu0 %v6111_v6  ;;  %v6078_v61 = vld [vmem:[#allocation13 + $0x40] sm:$0xf]  ;;  %v6239_v34 = vor.u32 %v7118_v31, %v6238_v30  ;;  %v6064_v31 = vld [vmem:[#allocation13 + $0x30] sm:$0xf0] }
 0x213   :  { %3134 = vmatpush.bf16.msrb.mxu2 %v5851_v15  ;;  %3955 = vmatpush.bf16.msra.mxu1 %v6287_v9  ;;  %v7078_v15 = vld [vmem:[#allocation13 + $0x4c] sm:$0xf0]  ;;  %v7128_v9 = vld [vmem:[#allocation13 + $0x1e4] sm:$0xf] }
 0x214   :  { %v6079_v17 = vor.u32 %v7078_v15, %v6078_v61  ;;  %v6288_v61 = vld [vmem:[#allocation13 + $0x1f0] sm:$0xf0] }
 0x215   :  { %v6291_v15 = vor.u32 %v7128_v9, %v6288_v61  ;;  %v6192_v61 = vld [vmem:[#allocation13 + $0x130] sm:$0xf0] }
 0x216   :  { %3096 = vmatpush.bf16.msra.mxu3 %v5959_v19  ;;  %3946 = vmatpush.bf16.msra.mxu0 %v6095_v10  ;;  %v6062_v19 = vld [vmem:[#allocation13 + $0x20] sm:$0xf]  ;;  %v6099_v10 = vor.u32 %v7080_v8, %v6096_v1  ;;  %v7186_v1 = vld [vmem:[#allocation13 + $0x3ac] sm:$0xf0] }
 0x217   :  { %3135 = vmatpush.bf16.msrb.mxu2 %v5835_v22  ;;  %3956 = vmatpush.bf16.msra.mxu1 %v6271_v44  ;;  %v7074_v22 = vld [vmem:[#allocation13 + $0x2c] sm:$0xf0]  ;;  %v6510_v8 = vld [vmem:[#allocation13 + $0x3a0] sm:$0xf] }
 0x218   :  { %v6063_v37 = vor.u32 %v7074_v22, %v6062_v19  ;;  %v6080_v19 = vld [vmem:[#allocation13 + $0x50] sm:$0xf0]  ;;  %v7124_v22 = vld [vmem:[#allocation13 + $0x1c4] sm:$0xf]  ;;  %v6511_v9 = vor.u32 %v7186_v1, %v6510_v8  ;;  %v6150_v8 = vld [vmem:[#allocation13 + $0xc8] sm:$0xf] }
 0x219   :  { %v7095_v1 = vld [vmem:[#allocation13 + $0xd4] sm:$0xf0] }
 0x21a   :  { %3097 = vmatpush.bf16.msra.mxu3 %v5943_v11  ;;  %3947 = vmatpush.bf16.msra.mxu0 %v6079_v17  ;;  %v6255_v11 = vor.u32 %v7122_v24, %v6254_v23  ;;  %v7146_v17 = vld [vmem:[#allocation13 + $0x26c] sm:$0xf0]  ;;  %v6272_v23 = vld [vmem:[#allocation13 + $0x1d0] sm:$0xf0]  ;;  %v6083_v24 = vor.u32 %v7076_v18, %v6080_v19 }
 0x21b   :  { %3136 = vmatpush.bf16.msrb.mxu2 %v5819_v28  ;;  %v7070_v28 = vld [vmem:[#allocation13 + $0xc] sm:$0xf0]  ;;  %v6351_v44 = vor.u32 %v7146_v17, %v6350_v16  ;;  %v6384_v17 = vld [vmem:[#allocation13 + $0x2b0] sm:$0xf0] }
 0x21c   :  { %3957 = vmatpush.bf16.msra.mxu1 %v6255_v11 }
 0x21e   :  { %3098 = vmatpush.bf16.msra.mxu3 %v5927_v35  ;;  %3948 = vmatpush.bf16.msra.mxu0 %v6063_v37  ;;  %v6163_v35 = vor.u32 %v7096_v32, %v6160_v21  ;;  %v7120_v32 = vld [vmem:[#allocation13 + $0x1a4] sm:$0xf] }
 0x21f   :  { %3137 = vmatpush.bf16.msrb.mxu2 %v5803_v62  ;;  %v6222_v62 = vld [vmem:[#allocation13 + $0x160] sm:$0xf] }
 0x220   :  { %3958 = vmatpush.bf16.msra.mxu1 %v6239_v34  ;;  %v6256_v34 = vld [vmem:[#allocation13 + $0x1b0] sm:$0xf0] }
 0x221   :  { %3099 = vmatmul.bf16.vlgmr.msra.gmra.mxu3 %v7751_v41 }
 0x222   :  { %3143 = vmatpush.bf16.msrb.mxu3 %v6043_v14  ;;  %3138 = vmatmul.bf16.vlgmr.msrb.gmra.mxu2 %v7740_v20  ;;  %v5944_v20 = vld [vmem:[#allocation11 + $0x338] sm:$0xf0]  ;;  %v7114_v14 = vld [vmem:[#allocation13 + $0x16c] sm:$0xf0] }
 0x223   :  { %v5947_v54 = vor.u32 %v7041_v52, %v5944_v20  ;;  %v6223_v38 = vor.u32 %v7114_v14, %v6222_v62  ;;  %v6190_v52 = vld [vmem:[#allocation13 + $0x120] sm:$0xf]  ;;  %v7106_v20 = vld [vmem:[#allocation13 + $0x12c] sm:$0xf0] }
 0x224   :  { %v6191_v53 = vor.u32 %v7106_v20, %v6190_v52  ;;  %v6318_v14 = vld [vmem:[#allocation13 + $0x220] sm:$0xf]  ;;  %v6224_v52 = vld [vmem:[#allocation13 + $0x170] sm:$0xf0] }
 0x225   :  { %3959 = vmatpush.bf16.msra.mxu1 %v6223_v38 }
 0x226   :  { %3144 = vmatpush.bf16.msrb.mxu3 %v6027_v39  ;;  %v7162_v39 = vld [vmem:[#allocation13 + $0x2ec] sm:$0xf0] }
 0x227   :  { %v6415_v57 = vor.u32 %v7162_v39, %v6414_v36  ;;  %v7138_v36 = vld [vmem:[#allocation13 + $0x22c] sm:$0xf0]  ;;  %v7068_v39 = vld [vmem:[#allocation13 + $0x4] sm:$0xf] }
 0x228   :  { %v6319_v38 = vor.u32 %v7138_v36, %v6318_v14  ;;  %v7144_v36 = vld [vmem:[#allocation13 + $0x264] sm:$0xf] }
 0x229   :  { %3968 = vmatpush.bf16.msra.mxu2 %v6415_v57  ;;  %3960 = vmatpush.bf16.msra.mxu1 %v6207_v46  ;;  %v6302_v46 = vld [vmem:[#allocation13 + $0x200] sm:$0xf] }
 0x22a   :  { %3145 = vmatpush.bf16.msrb.mxu3 %v6011_v42 }
 0x22d   :  { %3969 = vmatpush.bf16.msra.mxu2 %v6399_v49  ;;  %3961 = vmatpush.bf16.msra.mxu1 %v6191_v53  ;;  %v7194_v49 = vld [vmem:[#allocation13 + $0x3ec] sm:$0xf0]  ;;  %v7160_v53 = vld [vmem:[#allocation13 + $0x2e4] sm:$0xf] }
 0x22e   :  { %3146 = vmatpush.bf16.msrb.mxu3 %v5995_v45  ;;  %v6147_v45 = vor.u32 %v7092_v3, %v6144_v40  ;;  %v6048_v3 = vld [vmem:[#allocation13 + $0x10] sm:$0xf0]  ;;  %v7116_v40 = vld [vmem:[#allocation13 + $0x184] sm:$0xf] }
 0x22f   :  { %v6243_v12 = vor.u32 %v7116_v40, %v6240_v50  ;;  %v7174_v50 = vld [vmem:[#allocation13 + $0x34c] sm:$0xf0] }
 0x232   :  { %3147 = vmatpush.bf16.msrb.mxu3 %v5979_v60  ;;  %v7088_v60 = vld [vmem:[#allocation13 + $0xa4] sm:$0xf] }
 0x236   :  { %3148 = vmatpush.bf16.msrb.mxu3 %v5963_v58  ;;  %v6131_v58 = vor.u32 %v7088_v60, %v6128_v48  ;;  %v6542_v60 = vld [vmem:[#allocation13 + $0x3e0] sm:$0xf]  ;;  %v6303_v48 = vor.u32 %v7134_v47, %v6302_v46  ;;  %v6336_v46 = vld [vmem:[#allocation13 + $0x250] sm:$0xf0] }
 0x237   :  { %v6543_v20 = vor.u32 %v7194_v49, %v6542_v60  ;;  %v6446_v49 = vld [vmem:[#allocation13 + $0x320] sm:$0xf] }
 0x23a   :  { %3149 = vmatpush.bf16.msrb.mxu3 %v5947_v54  ;;  %v7154_v54 = vld [vmem:[#allocation13 + $0x2ac] sm:$0xf0] }
 0x23b   :  { %v6383_v33 = vor.u32 %v7154_v54, %v6382_v25  ;;  %v6416_v54 = vld [vmem:[#allocation13 + $0x2f0] sm:$0xf0] }
 0x23c   :  { %v6419_v55 = vor.u32 %v7160_v53, %v6416_v54  ;;  %v6166_v54 = vld [vmem:[#allocation13 + $0xe8] sm:$0xf] }
 0x23d   :  { %3970 = vmatpush.bf16.msra.mxu2 %v6383_v33 }
 0x23e   :  { %3150 = vmatpush.bf16.msrb.mxu3 %v5931_v2  ;;  %v7761_v13 = vpop.f32.mrf.mxu0  ;;  %v6174_v2 = vld [vmem:[#allocation13 + $0x100] sm:$0xf] }
 0x23f   :  { %v6175_v6 = vor.u32 %v7102_v27, %v6174_v2  ;;  %v6208_v2 = vld [vmem:[#allocation13 + $0x150] sm:$0xf0]  ;;  %v7156_v27 = vld [vmem:[#allocation13 + $0x2c4] sm:$0xf] }
 0x241   :  { %3151 = vmatmul.bf16.vlgmr.msrb.gmra.mxu3 %v7751_v41  ;;  %v6046_v41 = vld [vmem:[#allocation13] sm:$0xf]  ;;  %3962 = vmatpush.bf16.msra.mxu1 %v6175_v6  ;;  %v6400_v6 = vld [vmem:[#allocation13 + $0x2d0] sm:$0xf0] }
 0x242   :  { %v6047_v29 = vor.u32 %v7070_v28, %v6046_v41  ;;  %3971 = vmatpush.bf16.msra.mxu2 %v6367_v7  ;;  %v6334_v41 = vld [vmem:[#allocation13 + $0x240] sm:$0xf]  ;;  %v7142_v28 = vld [vmem:[#allocation13 + $0x24c] sm:$0xf0]  ;;  %3981 = vmatpush.bf16.msra.mxu3 %v6543_v20  ;;  %v6403_v7 = vor.u32 %v7156_v27, %v6400_v6  ;;  %v7132_v27 = vld [vmem:[#allocation13 + $0x204] sm:$0xf] }
 0x243   :  { %v6335_v30 = vor.u32 %v7142_v28, %v6334_v41  ;;  %v6176_v41 = vld [vmem:[#allocation13 + $0x110] sm:$0xf0]  ;;  %v7148_v28 = vld [vmem:[#allocation13 + $0x284] sm:$0xf] }
 0x244   :  { %3949 = vmatpush.bf16.msra.mxu0 %v6047_v29  ;;  %v7072_v29 = vld [vmem:[#allocation13 + $0x24] sm:$0xf] }
 0x245   :  { %4007 = vmatpush.bf16.msrb.mxu1 %v6291_v15  ;;  %v6067_v21 = vor.u32 %v7072_v29, %v6064_v31  ;;  %v7152_v15 = vld [vmem:[#allocation13 + $0x2a4] sm:$0xf]  ;;  %v6368_v31 = vld [vmem:[#allocation13 + $0x290] sm:$0xf0] }
 0x246   :  { %v2959_v26 = vpop.f32.mrf.mxu0  ;;  %3972 = vmatpush.bf16.msra.mxu2 %v6351_v44  ;;  %v6387_v18 = vor.u32 %v7152_v15, %v6384_v17  ;;  %v7778_v44 = vld [vmem:[%s7860_s6] sm:$0xf]  ;;  %v7192_v6 = vld [vmem:[#allocation13 + $0x3e4] sm:$0xf]  ;;  %v6151_v17 = vor.u32 %v7095_v1, %v6150_v8  ;;  %s7535_s6 = smov [#allocation17]  }
 0x247   :  { %v6275_v26 = vor.u32 %v7124_v22, %v6272_v23  ;;  %v6494_v22 = vld [vmem:[#allocation13 + $0x380] sm:$0xf]  ;;  %v7182_v23 = vld [vmem:[#allocation13 + $0x38c] sm:$0xf0]  ;;  %v2301_v15 = vperm.slane %v7778_v44, 1  ;;  %s4476_s30 = sshll.u32 %s7535_s6, 4  ;;  %s4477_s30 = int_to_ptr.vmem [resolvable:$true] %s4476_s30 }
 0x248   :  { %3994 = vmatpush.bf16.msrb.mxu0 %v6163_v35  ;;  %v6259_v35 = vor.u32 %v7120_v32, %v6256_v34  ;;  %v6371_v32 = vor.u32 %v7148_v28, %v6368_v31  ;;  %v6478_v34 = vld [vmem:[#allocation13 + $0x360] sm:$0xf]  ;;  %v6118_v31 = vld [vmem:[#allocation13 + $0x88] sm:$0xf] }
 0x249   :  { %4008 = vmatpush.bf16.msrb.mxu1 %v6275_v26  ;;  %v7100_v26 = vld [vmem:[#allocation13 + $0x104] sm:$0xf] }
 0x24a   :  { %3973 = vmatpush.bf16.msra.mxu2 %v6335_v30  ;;  %v6179_v29 = vor.u32 %v7100_v26, %v6176_v41 }
 0x24c   :  { %3995 = vmatpush.bf16.msrb.mxu0 %v6147_v45  ;;  %v6051_v45 = vor.u32 %v7068_v39, %v6048_v3 }
 0x24d   :  { %4009 = vmatpush.bf16.msrb.mxu1 %v6259_v35  ;;  %v7178_v35 = vld [vmem:[#allocation13 + $0x36c] sm:$0xf0] }
 0x24e   :  { %v7763_v42 = vpop.f32.mrf.mxu1  ;;  %v7765_v43 = vpop.f32.mrf.mxu0  ;;  %3974 = vmatpush.bf16.msra.mxu2 %v6319_v38  ;;  %v6479_v14 = vor.u32 %v7178_v35, %v6478_v34  ;;  %v6352_v38 = vld [vmem:[#allocation13 + $0x270] sm:$0xf0]  ;;  %v7184_v34 = vld [vmem:[#allocation13 + $0x3a4] sm:$0xf] }
 0x24f   :  { %v6355_v39 = vor.u32 %v7144_v36, %v6352_v38  ;;  %v3010_v41 = vadd.f32 %v7765_v43, %v2301_v15  ;;  %v6512_v35 = vld [vmem:[#allocation13 + $0x3b0] sm:$0xf0]  ;;  %v7083_v43 = vld [vmem:[#allocation13 + $0x74] sm:$0xf0] }
 0x250   :  { %3996 = vmatpush.bf16.msrb.mxu0 %v6131_v58  ;;  %v7112_v58 = vld [vmem:[#allocation13 + $0x164] sm:$0xf] }
 0x251   :  { %4010 = vmatpush.bf16.msrb.mxu1 %v6243_v12  ;;  %v6227_v25 = vor.u32 %v7112_v58, %v6224_v52  ;;  %v7140_v12 = vld [vmem:[#allocation13 + $0x244] sm:$0xf]  ;;  %v7170_v58 = vld [vmem:[#allocation13 + $0x32c] sm:$0xf0] }
 0x252   :  { %3975 = vmatpush.bf16.msra.mxu2 %v6303_v48  ;;  %v6339_v60 = vor.u32 %v7140_v12, %v6336_v46  ;;  %v6447_v20 = vor.u32 %v7170_v58, %v6446_v49  ;;  %v6496_v12 = vld [vmem:[#allocation13 + $0x390] sm:$0xf0]  ;;  %v6086_v49 = vld [vmem:[#allocation13 + $0x48] sm:$0xf]  ;;  %v7079_v58 = vld [vmem:[#allocation13 + $0x54] sm:$0xf0] }
 0x254   :  { %3997 = vmatpush.bf16.msrb.mxu0 %v6115_v0  ;;  %v7108_v0 = vld [vmem:[#allocation13 + $0x144] sm:$0xf] }
 0x255   :  { %4011 = vmatpush.bf16.msrb.mxu1 %v6227_v25  ;;  %v6211_v5 = vor.u32 %v7108_v0, %v6208_v2  ;;  %v6320_v25 = vld [vmem:[#allocation13 + $0x230] sm:$0xf0] }
 0x256   :  { %v2972_v51 = vpop.f32.mrf.mxu1  ;;  %v3011_v63 = vpop.f32.mrf.mxu0  ;;  %4020 = vmatpush.bf16.msrb.mxu2 %v6419_v55  ;;  %v7099_v55 = vld [vmem:[#allocation13 + $0xf4] sm:$0xf0] }
 0x257   :  { %v6526_v51 = vld [vmem:[#allocation13 + $0x3c0] sm:$0xf]  ;;  %v7190_v63 = vld [vmem:[#allocation13 + $0x3cc] sm:$0xf0] }
 0x258   :  { %3998 = vmatpush.bf16.msrb.mxu0 %v6099_v10  ;;  %v6527_v33 = vor.u32 %v7190_v63, %v6526_v51  ;;  %v7104_v10 = vld [vmem:[#allocation13 + $0x124] sm:$0xf] }
 0x259   :  { %4012 = vmatpush.bf16.msrb.mxu1 %v6211_v5  ;;  %v6195_v16 = vor.u32 %v7104_v10, %v6192_v61  ;;  %v6304_v5 = vld [vmem:[#allocation13 + $0x210] sm:$0xf0] }
 0x25a   :  { %3982 = vmatpush.bf16.msra.mxu3 %v6527_v33  ;;  %4021 = vmatpush.bf16.msrb.mxu2 %v6403_v7  ;;  %v6430_v33 = vld [vmem:[#allocation13 + $0x300] sm:$0xf]  ;;  %v6544_v10 = vld [vmem:[#allocation13 + $0x3f0] sm:$0xf0] }
 0x25b   :  { %v6547_v61 = vor.u32 %v7192_v6, %v6544_v10  ;;  %v7071_v10 = vld [vmem:[#allocation13 + $0x14] sm:$0xf0] }
 0x25c   :  { %3999 = vmatpush.bf16.msrb.mxu0 %v6083_v24  ;;  %v6495_v24 = vor.u32 %v7182_v23, %v6494_v22  ;;  %v7091_v22 = vld [vmem:[#allocation13 + $0xb4] sm:$0xf0]  ;;  %v7188_v23 = vld [vmem:[#allocation13 + $0x3c4] sm:$0xf] }
 0x25d   :  { %4013 = vmatpush.bf16.msrb.mxu1 %v6195_v16 }
 0x25e   :  { %v7767_v37 = vpop.f32.mrf.mxu1  ;;  %3983 = vmatpush.bf16.msra.mxu3 %v6511_v9  ;;  %4022 = vmatpush.bf16.msrb.mxu2 %v6387_v18  ;;  %v6307_v9 = vor.u32 %v7132_v27, %v6304_v5  ;;  %v6134_v18 = vld [vmem:[#allocation13 + $0xa8] sm:$0xf]  ;;  %v6464_v27 = vld [vmem:[#allocation13 + $0x350] sm:$0xf0] }
 0x260   :  { %v7769_v11 = vpop.f32.mrf.mxu0  ;;  %4000 = vmatpush.bf16.msrb.mxu0 %v6067_v21  ;;  %v2300_v21 = vperm.slane %v7778_v44, 0 }
 0x261   :  { %4014 = vmatpush.bf16.msrb.mxu1 %v6179_v29  ;;  %v6135_v29 = vor.u32 %v7091_v22, %v6134_v18  ;;  %v6448_v18 = vld [vmem:[#allocation13 + $0x330] sm:$0xf0]  ;;  %v7097_v22 = vld [vmem:[#allocation13 + $0xec] sm:$0xf] }
 0x262   :  { %3984 = vmatpush.bf16.msra.mxu3 %v6495_v24  ;;  %4023 = vmatpush.bf16.msrb.mxu2 %v6371_v32  ;;  %v2958_v40 = vadd.f32 %v7761_v13, %v2300_v21  ;;  %v7136_v13 = vld [vmem:[#allocation13 + $0x224] sm:$0xf]  ;;  %v6528_v24 = vld [vmem:[#allocation13 + $0x3d0] sm:$0xf0]  ;;  %v3023_v32 = vadd.f32 %v7767_v37, %v3010_v41  ;;  %v7087_v21 = vld [vmem:[#allocation13 + $0x94] sm:$0xf0] }
 0x263   :  { %v6531_v26 = vor.u32 %v7188_v23, %v6528_v24  ;;  %v6168_v23 = vld [vmem:[#allocation13 + $0xf8] sm:$0xf0] }
 0x264   :  { %v7771_v62 = vpop.f32.mrf.mxu2  ;;  %4001 = vmatpush.bf16.msrb.mxu0 %v6051_v45  ;;  %v6462_v45 = vld [vmem:[#allocation13 + $0x340] sm:$0xf]  ;;  %v2971_v47 = vadd.f32 %v7763_v42, %v2958_v40  ;;  %v7166_v42 = vld [vmem:[#allocation13 + $0x30c] sm:$0xf0]  ;;  %v6102_v40 = vld [vmem:[#allocation13 + $0x68] sm:$0xf] }
 0x265   :  { %v6431_v2 = vor.u32 %v7166_v42, %v6430_v33  ;;  %v7075_v33 = vld [vmem:[#allocation13 + $0x34] sm:$0xf0]  ;;  %v6262_v42 = vld [vmem:[#allocation13 + $0x1a8] sm:$0xf] }
 0x266   :  { %v3024_v57 = vpop.f32.mrf.mxu1  ;;  %3985 = vmatpush.bf16.msra.mxu3 %v6479_v14  ;;  %4024 = vmatpush.bf16.msrb.mxu2 %v6355_v39  ;;  %v2984_v48 = vadd.f32 %v7771_v62, %v2971_v47  ;;  %v6167_v62 = vor.u32 %v7099_v55, %v6166_v54  ;;  %v6515_v14 = vor.u32 %v7184_v34, %v6512_v35  ;;  %v2302_v54 = vperm.slane %v7778_v44, 2  ;;  %v6422_v34 = vld [vmem:[#allocation13 + $0x2e8] sm:$0xf]  ;;  %v7164_v35 = vld [vmem:[#allocation13 + $0x304] sm:$0xf] }
 0x267   :  { %v6119_v39 = vor.u32 %v7087_v21, %v6118_v31  ;;  %v7115_v31 = vld [vmem:[#allocation13 + $0x174] sm:$0xf0] }
 0x268   :  { %v3063_v56 = vpop.f32.mrf.mxu0  ;;  %v3062_v6 = vadd.f32 %v7769_v11, %v2302_v54  ;;  %v7155_v54 = vld [vmem:[#allocation13 + $0x2b4] sm:$0xf0] }
 0x269   :  { %v6463_v56 = vor.u32 %v7174_v50, %v6462_v45  ;;  %v7131_v50 = vld [vmem:[#allocation13 + $0x1f4] sm:$0xf0] }
 0x26a   :  { %4025 = vmatpush.bf16.msrb.mxu2 %v6339_v60  ;;  %v6103_v60 = vor.u32 %v7083_v43, %v6102_v40 }
 0x26b   :  { %3986 = vmatpush.bf16.msra.mxu3 %v6463_v56  ;;  %v7180_v56 = vld [vmem:[#allocation13 + $0x384] sm:$0xf] }
 0x26c   :  { %v2985_v59 = vpop.f32.mrf.mxu2  ;;  %v6499_v46 = vor.u32 %v7180_v56, %v6496_v12  ;;  %v6214_v56 = vld [vmem:[#allocation13 + $0x148] sm:$0xf]  ;;  %v7111_v12 = vld [vmem:[#allocation13 + $0x154] sm:$0xf0] }
 0x26d   :  { %v6323_v59 = vor.u32 %v7136_v13, %v6320_v25  ;;  %v7176_v13 = vld [vmem:[#allocation13 + $0x364] sm:$0xf]  ;;  %v6480_v25 = vld [vmem:[#allocation13 + $0x370] sm:$0xf0] }
 0x26e   :  { %v7773_v4 = vpop.f32.mrf.mxu1 }
 0x26f   :  { %3987 = vmatpush.bf16.msra.mxu3 %v6447_v20  ;;  %4026 = vmatpush.bf16.msrb.mxu2 %v6323_v59  ;;  %v7127_v20 = vld [vmem:[#allocation13 + $0x1d4] sm:$0xf0]  ;;  %v6087_v59 = vor.u32 %v7079_v58, %v6086_v49  ;;  %v3075_v15 = vadd.f32 %v7773_v4, %v3062_v6  ;;  %v6171_v4 = vor.u32 %v7097_v22, %v6168_v23  ;;  %v6104_v6 = vld [vmem:[#allocation13 + $0x78] sm:$0xf0]  ;;  %v7125_v23 = vld [vmem:[#allocation13 + $0x1cc] sm:$0xf] }
 0x270   :  { %v6215_v49 = vor.u32 %v7111_v12, %v6214_v56  ;;  %v6088_v22 = vld [vmem:[#allocation13 + $0x58] sm:$0xf0] }
 0x271   :  { %v6248_v56 = vld [vmem:[#allocation13 + $0x198] sm:$0xf0] }
 0x273   :  { %3988 = vmatpush.bf16.msra.mxu3 %v6431_v2  ;;  %4027 = vmatpush.bf16.msrb.mxu2 %v6307_v9  ;;  %v7172_v2 = vld [vmem:[#allocation13 + $0x344] sm:$0xf]  ;;  %v6054_v9 = vld [vmem:[#allocation13 + $0x8] sm:$0xf] }
 0x274   :  { %v7780_v19 = vpop.f32.mrf.mxu2  ;;  %v6467_v5 = vor.u32 %v7172_v2, %v6464_v27  ;;  %v6055_v41 = vor.u32 %v7071_v10, %v6054_v9  ;;  %v6374_v2 = vld [vmem:[#allocation13 + $0x288] sm:$0xf]  ;;  %v7151_v27 = vld [vmem:[#allocation13 + $0x294] sm:$0xf0] }
 0x275   :  { %v3036_v36 = vadd.f32 %v7780_v19, %v3023_v32  ;;  %v6278_v19 = vld [vmem:[#allocation13 + $0x1c8] sm:$0xf]  ;;  %v6375_v10 = vor.u32 %v7151_v27, %v6374_v2  ;;  %v7157_v2 = vld [vmem:[#allocation13 + $0x2cc] sm:$0xf]  ;;  %v6408_v27 = vld [vmem:[#allocation13 + $0x2d8] sm:$0xf0] }
 0x276   :  { %v3076_v30 = vpop.f32.mrf.mxu1 }
 0x277   :  { %4033 = vmatpush.bf16.msrb.mxu3 %v6547_v61  ;;  %v6246_v61 = vld [vmem:[#allocation13 + $0x188] sm:$0xf] }
 0x27b   :  { %4034 = vmatpush.bf16.msrb.mxu3 %v6531_v26 }
 0x27c   :  { %v3037_v57 = vpop.f32.mrf.mxu2 }
 0x27d   :  { %v6294_v57 = vld [vmem:[#allocation13 + $0x1e8] sm:$0xf] }
 0x27e   :  { %v7783_v3 = vpop.f32.mrf.mxu0 }
 0x27f   :  { %4035 = vmatpush.bf16.msrb.mxu3 %v6515_v14  ;;  %v6432_v14 = vld [vmem:[#allocation13 + $0x310] sm:$0xf0] }
 0x280   :  { %v6435_v40 = vor.u32 %v7164_v35, %v6432_v14  ;;  %v6264_v35 = vld [vmem:[#allocation13 + $0x1b8] sm:$0xf0] }
 0x283   :  { %4036 = vmatpush.bf16.msrb.mxu3 %v6499_v46  ;;  %v6406_v46 = vld [vmem:[#allocation13 + $0x2c8] sm:$0xf] }
 0x284   :  { %v2996_v52 = vpop.f32.mrf.mxu3 }
 0x285   :  { %v2997_v53 = vadd.f32 %v2996_v52, %v2984_v48  ;;  %v6295_v48 = vor.u32 %v7131_v50, %v6294_v57 }
 0x286   :  { %v3115_v51 = vpop.f32.mrf.mxu0 }
 0x287   :  { %v3156_v63 = vmax.f32 %v2997_v53, 0.0  ;;  %v7788_v0 = vpop.f32.mrf.mxu2  ;;  %v6483_v53 = vor.u32 %v7176_v13, %v6480_v25  ;;  %v6279_v51 = vor.u32 %v7127_v20, %v6278_v19  ;;  %v6198_v13 = vld [vmem:[#allocation13 + $0x128] sm:$0xf]  ;;  %v7107_v25 = vld [vmem:[#allocation13 + $0x134] sm:$0xf0] }
 0x288   :  { %v3088_v26 = vadd.f32 %v7788_v0, %v3075_v15  ;;  %v6358_v15 = vld [vmem:[#allocation13 + $0x268] sm:$0xf] }
 0x289   :  { %v7790_v7 = vpack.c.bf16 %v3156_v63, %v3156_v63  ;;  %v6070_v63 = vld [vmem:[#allocation13 + $0x28] sm:$0xf]  ;;  %4037 = vmatpush.bf16.msrb.mxu3 %v6483_v53 }
 0x28a   :  { %v6071_v8 = vor.u32 %v7075_v33, %v6070_v63  ;;  %v6390_v53 = vld [vmem:[#allocation13 + $0x2a8] sm:$0xf] }
 0x28b   :  { %3950 = vmatmul.bf16.vlgmr.msra.gmra.mxu0 %v7790_v7  ;;  %v6391_v63 = vor.u32 %v7155_v54, %v6390_v53 }
 0x28c   :  { %4046 = vmatpush.bf16.msra.mxu0 %v6167_v62  ;;  %v2998_v16 = vpop.f32.mrf.mxu3  ;;  %v7123_v62 = vld [vmem:[#allocation13 + $0x1b4] sm:$0xf0] }
 0x28d   :  { %v6263_v1 = vor.u32 %v7123_v62, %v6262_v42  ;;  %v7119_v16 = vld [vmem:[#allocation13 + $0x194] sm:$0xf0]  ;;  %4038 = vmatpush.bf16.msrb.mxu3 %v6467_v5  ;;  %v6182_v42 = vld [vmem:[#allocation13 + $0x108] sm:$0xf]  ;;  %v7081_v5 = vld [vmem:[#allocation13 + $0x6c] sm:$0xf] }
 0x28e   :  { %v7795_v28 = vpop.f32.mrf.mxu1  ;;  %v7103_v62 = vld [vmem:[#allocation13 + $0x114] sm:$0xf0] }
 0x28f   :  { %v3089_v30 = vpop.f32.mrf.mxu2  ;;  %v6183_v9 = vor.u32 %v7103_v62, %v6182_v42  ;;  %v7109_v42 = vld [vmem:[#allocation13 + $0x14c] sm:$0xf]  ;;  %v6216_v62 = vld [vmem:[#allocation13 + $0x158] sm:$0xf0] }
 0x290   :  { %4047 = vmatpush.bf16.msra.mxu0 %v6151_v17  ;;  %v7168_v17 = vld [vmem:[#allocation13 + $0x324] sm:$0xf]  ;;  %v6247_v30 = vor.u32 %v7119_v16, %v6246_v61  ;;  %v6107_v61 = vor.u32 %v7081_v5, %v6104_v6 }
 0x291   :  { %v6451_v24 = vor.u32 %v7168_v17, %v6448_v18  ;;  %v7147_v17 = vld [vmem:[#allocation13 + $0x274] sm:$0xf0]  ;;  %v7077_v18 = vld [vmem:[#allocation13 + $0x4c] sm:$0xf] }
 0x293   :  { %4039 = vmatpush.bf16.msrb.mxu3 %v6451_v24  ;;  %v6280_v24 = vld [vmem:[#allocation13 + $0x1d8] sm:$0xf0] }
 0x294   :  { %4048 = vmatpush.bf16.msra.mxu0 %v6135_v29  ;;  %v3048_v38 = vpop.f32.mrf.mxu3  ;;  %v6230_v29 = vld [vmem:[#allocation13 + $0x168] sm:$0xf] }
 0x295   :  { %v3049_v45 = vadd.f32 %v3048_v38, %v3036_v36  ;;  %v7163_v36 = vld [vmem:[#allocation13 + $0x2f4] sm:$0xf0]  ;;  %v7093_v38 = vld [vmem:[#allocation13 + $0xcc] sm:$0xf]  ;;  %v6231_v43 = vor.u32 %v7115_v31, %v6230_v29  ;;  %v6283_v29 = vor.u32 %v7125_v23, %v6280_v24  ;;  %v6502_v23 = vld [vmem:[#allocation13 + $0x388] sm:$0xf] }
 0x296   :  { %v3128_v47 = vpop.f32.mrf.mxu1  ;;  %v7143_v31 = vld [vmem:[#allocation13 + $0x254] sm:$0xf0] }
 0x297   :  { %v3157_v37 = vmax.f32 %v3049_v45, 0.0  ;;  %v6423_v45 = vor.u32 %v7163_v36, %v6422_v34  ;;  %4040 = vmatpush.bf16.msrb.mxu3 %v6435_v40  ;;  %v7089_v47 = vld [vmem:[#allocation13 + $0xac] sm:$0xf]  ;;  %v7183_v24 = vld [vmem:[#allocation13 + $0x394] sm:$0xf0] }
 0x298   :  { %4049 = vmatpush.bf16.msra.mxu0 %v6119_v39  ;;  %v6152_v39 = vld [vmem:[#allocation13 + $0xd8] sm:$0xf0]  ;;  %v7121_v34 = vld [vmem:[#allocation13 + $0x1ac] sm:$0xf] }
 0x299   :  { %v7799_v52 = vpack.c.bf16 %v3157_v37, %v3157_v37  ;;  %v6155_v50 = vor.u32 %v7093_v38, %v6152_v39  ;;  %v7159_v37 = vld [vmem:[#allocation13 + $0x2d4] sm:$0xf0]  ;;  %v6326_v38 = vld [vmem:[#allocation13 + $0x228] sm:$0xf]  ;;  %v6267_v40 = vor.u32 %v7121_v34, %v6264_v35  ;;  %v7145_v35 = vld [vmem:[#allocation13 + $0x26c] sm:$0xf] }
 0x29a   :  { %v6407_v19 = vor.u32 %v7159_v37, %v6406_v46  ;;  %v7179_v34 = vld [vmem:[#allocation13 + $0x374] sm:$0xf0] }
 0x29b   :  { %3963 = vmatmul.bf16.vlgmr.msra.gmra.mxu1 %v7799_v52  ;;  %4002 = vmatmul.bf16.vlgmr.msrb.gmra.mxu0 %v7790_v7 }
 0x29c   :  { %4050 = vmatpush.bf16.msra.mxu0 %v6103_v60  ;;  %4059 = vmatpush.bf16.msra.mxu1 %v6295_v48  ;;  %v3050_v55 = vpop.f32.mrf.mxu3  ;;  %v6136_v60 = vld [vmem:[#allocation13 + $0xb8] sm:$0xf0] }
 0x29d   :  { %v6139_v20 = vor.u32 %v7089_v47, %v6136_v60  ;;  %v7085_v55 = vld [vmem:[#allocation13 + $0x8c] sm:$0xf]  ;;  %v6310_v47 = vld [vmem:[#allocation13 + $0x208] sm:$0xf]  ;;  %v7135_v60 = vld [vmem:[#allocation13 + $0x214] sm:$0xf0] }
 0x2a0   :  { %4051 = vmatpush.bf16.msra.mxu0 %v6087_v59  ;;  %4060 = vmatpush.bf16.msra.mxu1 %v6279_v51  ;;  %v6120_v59 = vld [vmem:[#allocation13 + $0x98] sm:$0xf0]  ;;  %v6199_v51 = vor.u32 %v7107_v25, %v6198_v13  ;;  %v7161_v13 = vld [vmem:[#allocation13 + $0x2ec] sm:$0xf] }
 0x2a1   :  { %v6123_v33 = vor.u32 %v7085_v55, %v6120_v59  ;;  %v6424_v25 = vld [vmem:[#allocation13 + $0x2f8] sm:$0xf0] }
 0x2a4   :  { %4052 = vmatpush.bf16.msra.mxu0 %v6071_v8  ;;  %4061 = vmatpush.bf16.msra.mxu1 %v6263_v1  ;;  %v3100_v11 = vpop.f32.mrf.mxu3  ;;  %v7129_v8 = vld [vmem:[#allocation13 + $0x1ec] sm:$0xf]  ;;  %v6296_v1 = vld [vmem:[#allocation13 + $0x1f8] sm:$0xf0] }
 0x2a5   :  { %v3101_v32 = vadd.f32 %v3100_v11, %v3088_v26  ;;  %v7807_v21 = vpop.f32.mrf.mxu2  ;;  %v6299_v16 = vor.u32 %v7129_v8, %v6296_v1  ;;  %v2303_v26 = vperm.slane %v7778_v44, 3  ;;  %v6359_v11 = vor.u32 %v7147_v17, %v6358_v15  ;;  %v6200_v15 = vld [vmem:[#allocation13 + $0x138] sm:$0xf0] }
 0x2a6   :  { %v6219_v8 = vor.u32 %v7109_v42, %v6216_v62  ;;  %v6411_v1 = vor.u32 %v7157_v2, %v6408_v27  ;;  %v6392_v17 = vld [vmem:[#allocation13 + $0x2b8] sm:$0xf0]  ;;  %v7177_v42 = vld [vmem:[#allocation13 + $0x36c] sm:$0xf] }
 0x2a7   :  { %v3158_v0 = vmax.f32 %v3101_v32, 0.0  ;;  %v7073_v32 = vld [vmem:[#allocation13 + $0x2c] sm:$0xf]  ;;  %v3114_v14 = vadd.f32 %v7783_v3, %v2303_v26  ;;  %v6488_v62 = vld [vmem:[#allocation13 + $0x378] sm:$0xf0] }
 0x2a8   :  { %4053 = vmatpush.bf16.msra.mxu0 %v6055_v41  ;;  %4062 = vmatpush.bf16.msra.mxu1 %v6247_v30  ;;  %v6091_v41 = vor.u32 %v7077_v18, %v6088_v22  ;;  %v6342_v30 = vld [vmem:[#allocation13 + $0x248] sm:$0xf]  ;;  %v7101_v26 = vld [vmem:[#allocation13 + $0x10c] sm:$0xf]  ;;  %v6491_v2 = vor.u32 %v7177_v42, %v6488_v62  ;;  %v7226_v42 = vld [vmem:[#allocation16 + $0xf0] sm:$0xff] }
 0x2a9   :  { %v7809_v57 = vpack.c.bf16 %v3158_v0, %v3158_v0  ;;  %v6343_v44 = vor.u32 %v7143_v31, %v6342_v30  ;;  %v3127_v39 = vadd.f32 %v7795_v28, %v3114_v14  ;;  %v7139_v0 = vld [vmem:[#allocation13 + $0x234] sm:$0xf0]  ;;  %v6550_v28 = vld [vmem:[#allocation13 + $0x3e8] sm:$0xf]  ;;  %v6376_v30 = vld [vmem:[#allocation13 + $0x298] sm:$0xf0] }
 0x2aa   :  { %v6327_v3 = vor.u32 %v7139_v0, %v6326_v38  ;;  %v6360_v14 = vld [vmem:[#allocation13 + $0x278] sm:$0xf0]  ;;  %v6470_v38 = vld [vmem:[#allocation13 + $0x348] sm:$0xf]  ;;  %v7173_v27 = vld [vmem:[#allocation13 + $0x34c] sm:$0xf] }
 0x2ab   :  { %3976 = vmatmul.bf16.vlgmr.msra.gmra.mxu2 %v7809_v57  ;;  %4015 = vmatmul.bf16.vlgmr.msrb.gmra.mxu1 %v7799_v52  ;;  %v3140_v12 = vadd.f32 %v7807_v21, %v3127_v39  ;;  %v6311_v21 = vor.u32 %v7135_v60, %v6310_v47  ;;  %v7175_v39 = vld [vmem:[#allocation13 + $0x354] sm:$0xf0]  ;;  %v6344_v0 = vld [vmem:[#allocation13 + $0x258] sm:$0xf0]  ;;  %v6438_v47 = vld [vmem:[#allocation13 + $0x308] sm:$0xf] }
 0x2ac   :  { %4098 = vmatpush.bf16.msrb.mxu0 %v6171_v4  ;;  %4063 = vmatpush.bf16.msra.mxu1 %v6231_v43  ;;  %v3102_v48 = vpop.f32.mrf.mxu3  ;;  %v6072_v4 = vld [vmem:[#allocation13 + $0x38] sm:$0xf0]  ;;  %v7069_v43 = vld [vmem:[#allocation13 + $0xc] sm:$0xf]  ;;  %v7167_v60 = vld [vmem:[#allocation13 + $0x314] sm:$0xf0] }
 0x2ad   :  { %4054 = vmatmul.bf16.vlgmr.msra.gmra.mxu0 %v7790_v7  ;;  %4072 = vmatpush.bf16.msra.mxu2 %v6423_v45  ;;  %v3141_v58 = vpop.f32.mrf.mxu2  ;;  %v6075_v36 = vor.u32 %v7073_v32, %v6072_v4  ;;  %v6056_v45 = vld [vmem:[#allocation13 + $0x18] sm:$0xf0]  ;;  %v6486_v4 = vld [vmem:[#allocation13 + $0x368] sm:$0xf] }
 0x2ae   :  { %v6059_v37 = vor.u32 %v7069_v43, %v6056_v45  ;;  %v7195_v58 = vld [vmem:[#allocation13 + $0x3f4] sm:$0xf0]  ;;  %v6471_v43 = vor.u32 %v7175_v39, %v6470_v38  ;;  %v7207_v38 = vld [vmem:[#allocation16 + $0x58] sm:$0xff] }
 0x2af   :  { %v6551_v54 = vor.u32 %v7195_v58, %v6550_v28  ;;  %v7193_v28 = vld [vmem:[#allocation13 + $0x3ec] sm:$0xf]  ;;  %v6552_v58 = vld [vmem:[#allocation13 + $0x3f8] sm:$0xf0] }
 0x2b0   :  { %4099 = vmatpush.bf16.msrb.mxu0 %v6155_v50  ;;  %4064 = vmatpush.bf16.msra.mxu1 %v6215_v49  ;;  %v7117_v50 = vld [vmem:[#allocation13 + $0x18c] sm:$0xf]  ;;  %v7219_v39 = vld [vmem:[#allocation16 + $0xb8] sm:$0xff] }
 0x2b1   :  { %4073 = vmatpush.bf16.msra.mxu2 %v6407_v19  ;;  %v6251_v49 = vor.u32 %v7117_v50, %v6248_v56  ;;  %v7113_v19 = vld [vmem:[#allocation13 + $0x16c] sm:$0xf]  ;;  %v6454_v50 = vld [vmem:[#allocation13 + $0x328] sm:$0xf]  ;;  %v7171_v56 = vld [vmem:[#allocation13 + $0x334] sm:$0xf0] }
 0x2b4   :  { %4100 = vmatpush.bf16.msrb.mxu0 %v6139_v20  ;;  %4065 = vmatpush.bf16.msra.mxu1 %v6199_v51  ;;  %v6232_v20 = vld [vmem:[#allocation13 + $0x178] sm:$0xf0]  ;;  %v6427_v51 = vor.u32 %v7161_v13, %v6424_v25  ;;  %v7189_v13 = vld [vmem:[#allocation13 + $0x3cc] sm:$0xf] }
 0x2b5   :  { %4074 = vmatpush.bf16.msra.mxu2 %v6391_v63  ;;  %v6235_v59 = vor.u32 %v7113_v19, %v6232_v20  ;;  %v6534_v63 = vld [vmem:[#allocation13 + $0x3c8] sm:$0xf]  ;;  %v6439_v19 = vor.u32 %v7167_v60, %v6438_v47  ;;  %v6555_v20 = vor.u32 %v7193_v28, %v6552_v58  ;;  %v6536_v25 = vld [vmem:[#allocation13 + $0x3d8] sm:$0xf0]  ;;  %v7836_v47 = vld [vmem:[#allocation14] sm:$0xf] }
 0x2b6   :  { %v7214_v28 = vld [vmem:[#allocation16 + $0x90] sm:$0xff]  ;;  %v3295_v62 = vperm.slane %v7836_v47, 1 }
 0x2b8   :  { %4101 = vmatpush.bf16.msrb.mxu0 %v6123_v33  ;;  %4066 = vmatpush.bf16.msra.mxu1 %v6183_v9  ;;  %v7191_v33 = vld [vmem:[#allocation13 + $0x3d4] sm:$0xf0]  ;;  %v6518_v9 = vld [vmem:[#allocation13 + $0x3a8] sm:$0xf] }
 0x2b9   :  { %4075 = vmatpush.bf16.msra.mxu2 %v6375_v10  ;;  %v6535_v6 = vor.u32 %v7191_v33, %v6534_v63  ;;  %v7187_v10 = vld [vmem:[#allocation13 + $0x3b4] sm:$0xf0]  ;;  %v6504_v63 = vld [vmem:[#allocation13 + $0x398] sm:$0xf0] }
 0x2ba   :  { %v6519_v18 = vor.u32 %v7187_v10, %v6518_v9  ;;  %v7165_v10 = vld [vmem:[#allocation13 + $0x30c] sm:$0xf] }
 0x2bb   :  { %4028 = vmatmul.bf16.vlgmr.msrb.gmra.mxu2 %v7809_v57  ;;  %4067 = vmatmul.bf16.vlgmr.msra.gmra.mxu1 %v7799_v52 }
 0x2bc   :  { %4102 = vmatpush.bf16.msrb.mxu0 %v6107_v61  ;;  %4111 = vmatpush.bf16.msrb.mxu1 %v6299_v16  ;;  %v7105_v61 = vld [vmem:[#allocation13 + $0x12c] sm:$0xf] }
 0x2bd   :  { %4076 = vmatpush.bf16.msra.mxu2 %v6359_v11  ;;  %v7153_v16 = vld [vmem:[#allocation13 + $0x2ac] sm:$0xf]  ;;  %v6184_v11 = vld [vmem:[#allocation13 + $0x118] sm:$0xf0] }
 0x2be   :  { %v6395_v22 = vor.u32 %v7153_v16, %v6392_v17  ;;  %v6187_v31 = vor.u32 %v7101_v26, %v6184_v11  ;;  %v7203_v17 = vld [vmem:[#allocation16 + $0x38] sm:$0xff] }
 0x2c0   :  { %4103 = vmatpush.bf16.msrb.mxu0 %v6091_v41  ;;  %4112 = vmatpush.bf16.msrb.mxu1 %v6283_v29  ;;  %v7149_v41 = vld [vmem:[#allocation13 + $0x28c] sm:$0xf]  ;;  %v6503_v29 = vor.u32 %v7183_v24, %v6502_v23  ;;  %v7200_v24 = vld [vmem:[#allocation16 + $0x20] sm:$0xff] }
 0x2c1   :  { %4077 = vmatpush.bf16.msra.mxu2 %v6343_v44  ;;  %v6379_v32 = vor.u32 %v7149_v41, %v6376_v30  ;;  %v6487_v44 = vor.u32 %v7179_v34, %v6486_v4  ;;  %v7201_v23 = vld [vmem:[#allocation16 + $0x28] sm:$0xff]  ;;  %v7199_v41 = vld [vmem:[#allocation16 + $0x18] sm:$0xff] }
 0x2c2   :  { %v7211_v30 = vld [vmem:[#allocation16 + $0x78] sm:$0xff] }
 0x2c4   :  { %v3152_v46 = vpop.f32.mrf.mxu3  ;;  %4104 = vmatpush.bf16.msrb.mxu0 %v6075_v36  ;;  %4113 = vmatpush.bf16.msrb.mxu1 %v6267_v40  ;;  %v6363_v36 = vor.u32 %v7145_v35, %v6360_v14  ;;  %v7141_v40 = vld [vmem:[#allocation13 + $0x24c] sm:$0xf]  ;;  %v7196_v35 = vld [vmem:[#allocation16] sm:$0xff] }
 0x2c5   :  { %v3153_v48 = vadd.f32 %v3152_v46, %v3140_v12  ;;  %4078 = vmatpush.bf16.msra.mxu2 %v6327_v3  ;;  %v6347_v45 = vor.u32 %v7141_v40, %v6344_v0  ;;  %v7137_v12 = vld [vmem:[#allocation13 + $0x22c] sm:$0xf]  ;;  %v6328_v46 = vld [vmem:[#allocation13 + $0x238] sm:$0xf0]  ;;  %v6455_v3 = vor.u32 %v7171_v56, %v6454_v50  ;;  %v7208_v14 = vld [vmem:[#allocation16 + $0x60] sm:$0xff] }
 0x2c6   :  { %v7206_v0 = vld [vmem:[#allocation16 + $0x50] sm:$0xff]  ;;  %v7205_v50 = vld [vmem:[#allocation16 + $0x48] sm:$0xff] }
 0x2c7   :  { %v3159_v53 = vmax.f32 %v3153_v48, 0.0  ;;  %v7133_v48 = vld [vmem:[#allocation13 + $0x20c] sm:$0xf] }
 0x2c8   :  { %4105 = vmatpush.bf16.msrb.mxu0 %v6059_v37  ;;  %4114 = vmatpush.bf16.msrb.mxu1 %v6251_v49  ;;  %v6331_v37 = vor.u32 %v7137_v12, %v6328_v46  ;;  %v6312_v49 = vld [vmem:[#allocation13 + $0x218] sm:$0xf0]  ;;  %v7217_v56 = vld [vmem:[#allocation16 + $0xa8] sm:$0xff]  ;;  %v7204_v46 = vld [vmem:[#allocation16 + $0x40] sm:$0xff] }
 0x2c9   :  { %v7820_v55 = vpack.c.bf16 %v3159_v53, %v3159_v53  ;;  %4079 = vmatpush.bf16.msra.mxu2 %v6311_v21  ;;  %v6539_v53 = vor.u32 %v7189_v13, %v6536_v25  ;;  %v7185_v21 = vld [vmem:[#allocation13 + $0x3ac] sm:$0xf] }
 0x2cb   :  { %3989 = vmatmul.bf16.vlgmr.msra.gmra.mxu3 %v7820_v55  ;;  %4106 = vmatmul.bf16.vlgmr.msrb.gmra.mxu0 %v7790_v7  ;;  %v6203_v7 = vor.u32 %v7105_v61, %v6200_v15 }
 0x2cc   :  { %4085 = vmatpush.bf16.msra.mxu3 %v6551_v54  ;;  %v3154_v5 = vpop.f32.mrf.mxu3  ;;  %4115 = vmatpush.bf16.msrb.mxu1 %v6235_v59  ;;  %v6520_v54 = vld [vmem:[#allocation13 + $0x3b8] sm:$0xf0] }
 0x2cd   :  { %4124 = vmatpush.bf16.msrb.mxu2 %v6427_v51  ;;  %v6523_v59 = vor.u32 %v7185_v21, %v6520_v54  ;;  %v7181_v51 = vld [vmem:[#allocation13 + $0x38c] sm:$0xf]  ;;  %v6472_v5 = vld [vmem:[#allocation13 + $0x358] sm:$0xf0]  ;;  %4418 = vmatpush.bf16.msra.mxu0 %v7203_v17  ;;  %v7212_v54 = vld [vmem:[#allocation16 + $0x80] sm:$0xff] }
 0x2ce   :  { %4080 = vmatmul.bf16.vlgmr.msra.gmra.mxu2 %v7809_v57  ;;  %v6507_v33 = vor.u32 %v7181_v51, %v6504_v63 }
 0x2d0   :  { %4086 = vmatpush.bf16.msra.mxu3 %v6535_v6  ;;  %4116 = vmatpush.bf16.msrb.mxu1 %v6219_v8  ;;  %v6475_v6 = vor.u32 %v7173_v27, %v6472_v5  ;;  %v7169_v8 = vld [vmem:[#allocation13 + $0x32c] sm:$0xf] }
 0x2d1   :  { %4125 = vmatpush.bf16.msrb.mxu2 %v6411_v1  ;;  %v6456_v1 = vld [vmem:[#allocation13 + $0x338] sm:$0xf0]  ;;  %v7225_v27 = vld [vmem:[#allocation16 + $0xe8] sm:$0xff] }
 0x2d2   :  { %v6459_v9 = vor.u32 %v7169_v8, %v6456_v1  ;;  %v7224_v8 = vld [vmem:[#allocation16 + $0xe0] sm:$0xff] }
 0x2d4   :  { %4087 = vmatpush.bf16.msra.mxu3 %v6519_v18  ;;  %4117 = vmatpush.bf16.msrb.mxu1 %v6203_v7  ;;  %v7202_v18 = vld [vmem:[#allocation16 + $0x30] sm:$0xff] }
 0x2d5   :  { %4126 = vmatpush.bf16.msrb.mxu2 %v6395_v22  ;;  %4419 = vmatpush.bf16.msra.mxu0 %v7202_v18  ;;  %v7222_v18 = vld [vmem:[#allocation16 + $0xd0] sm:$0xff] }
 0x2d8   :  { %4088 = vmatpush.bf16.msra.mxu3 %v6503_v29  ;;  %4118 = vmatpush.bf16.msrb.mxu1 %v6187_v31  ;;  %v7210_v29 = vld [vmem:[#allocation16 + $0x70] sm:$0xff]  ;;  %v7197_v31 = vld [vmem:[#allocation16 + $0x8] sm:$0xff] }
 0x2d9   :  { %4127 = vmatpush.bf16.msrb.mxu2 %v6379_v32  ;;  %4420 = vmatpush.bf16.msra.mxu0 %v7201_v23  ;;  %v7209_v32 = vld [vmem:[#allocation16 + $0x68] sm:$0xff] }
 0x2db   :  { %4041 = vmatmul.bf16.vlgmr.msrb.gmra.mxu3 %v7820_v55  ;;  %4119 = vmatmul.bf16.vlgmr.msrb.gmra.mxu1 %v7799_v52  ;;  %v6315_v52 = vor.u32 %v7133_v48, %v6312_v49  ;;  %v7215_v48 = vld [vmem:[#allocation16 + $0x98] sm:$0xff]  ;;  %v3294_v49 = vperm.slane %v7836_v47, 0 }
 0x2dc   :  { %4089 = vmatpush.bf16.msra.mxu3 %v6487_v44  ;;  %4431 = vmatpush.bf16.msra.mxu1 %v7211_v30 }
 0x2dd   :  { %4128 = vmatpush.bf16.msrb.mxu2 %v6363_v36  ;;  %4421 = vmatpush.bf16.msra.mxu0 %v7200_v24 }
 0x2e0   :  { %4090 = vmatpush.bf16.msra.mxu3 %v6471_v43  ;;  %4432 = vmatpush.bf16.msra.mxu1 %v7210_v29  ;;  %v7218_v43 = vld [vmem:[#allocation16 + $0xb0] sm:$0xff] }
 0x2e1   :  { %4129 = vmatpush.bf16.msrb.mxu2 %v6347_v45  ;;  %4422 = vmatpush.bf16.msra.mxu0 %v7199_v41 }
 0x2e4   :  { %4091 = vmatpush.bf16.msra.mxu3 %v6455_v3  ;;  %4433 = vmatpush.bf16.msra.mxu1 %v7209_v32  ;;  %v7216_v3 = vld [vmem:[#allocation16 + $0xa0] sm:$0xff] }
 0x2e5   :  { %4130 = vmatpush.bf16.msrb.mxu2 %v6331_v37 }
 0x2e8   :  { %4092 = vmatpush.bf16.msra.mxu3 %v6439_v19  ;;  %4434 = vmatpush.bf16.msra.mxu1 %v7208_v14 }
 0x2e9   :  { %4131 = vmatpush.bf16.msrb.mxu2 %v6315_v52 }
 0x2eb   :  { %4093 = vmatmul.bf16.vlgmr.msra.gmra.mxu3 %v7820_v55 }
 0x2ec   :  { %4137 = vmatpush.bf16.msrb.mxu3 %v6555_v20  ;;  %4132 = vmatmul.bf16.vlgmr.msrb.gmra.mxu2 %v7809_v57  ;;  %v6440_v57 = vld [vmem:[#allocation13 + $0x318] sm:$0xf0]  ;;  %v7213_v20 = vld [vmem:[#allocation16 + $0x88] sm:$0xff] }
 0x2ed   :  { %v6443_v61 = vor.u32 %v7165_v10, %v6440_v57  ;;  %4435 = vmatpush.bf16.msra.mxu1 %v7207_v38  ;;  %4444 = vmatpush.bf16.msra.mxu2 %v7219_v39  ;;  %v7223_v57 = vld [vmem:[#allocation16 + $0xd8] sm:$0xff] }
 0x2f0   :  { %4138 = vmatpush.bf16.msrb.mxu3 %v6539_v53 }
 0x2f1   :  { %4436 = vmatpush.bf16.msra.mxu1 %v7206_v0  ;;  %4445 = vmatpush.bf16.msra.mxu2 %v7218_v43 }
 0x2f4   :  { %4139 = vmatpush.bf16.msrb.mxu3 %v6523_v59  ;;  %v7227_v59 = vld [vmem:[#allocation16 + $0xf8] sm:$0xff] }
 0x2f5   :  { %4437 = vmatpush.bf16.msra.mxu1 %v7205_v50  ;;  %4446 = vmatpush.bf16.msra.mxu2 %v7217_v56 }
 0x2f8   :  { %4140 = vmatpush.bf16.msrb.mxu3 %v6507_v33 }
 0x2f9   :  { %4438 = vmatpush.bf16.msra.mxu1 %v7204_v46  ;;  %4447 = vmatpush.bf16.msra.mxu2 %v7216_v3  ;;  %v7243_v46 = vld [vmem:[%s7864_s10] ss:$0 sm:$0xff] }
 0x2fc   :  { %4141 = vmatpush.bf16.msrb.mxu3 %v6491_v2 }
 0x2fd   :  { %4448 = vmatpush.bf16.msra.mxu2 %v7215_v48 }
 0x300   :  { %4142 = vmatpush.bf16.msrb.mxu3 %v6475_v6 }
 0x301   :  { %4449 = vmatpush.bf16.msra.mxu2 %v7214_v28 }
 0x304   :  { %4143 = vmatpush.bf16.msrb.mxu3 %v6459_v9 }
 0x305   :  { %4450 = vmatpush.bf16.msra.mxu2 %v7213_v20 }
 0x308   :  { %4144 = vmatpush.bf16.msrb.mxu3 %v6443_v61  ;;  %v3951_v15 = vpop.f32.mrf.mxu0 }
 0x309   :  { %v3952_v19 = vadd.f32 %v3951_v15, %v3294_v49  ;;  %4451 = vmatpush.bf16.msra.mxu2 %v7212_v54 }
 0x30b   :  { %4145 = vmatmul.bf16.vlgmr.msrb.gmra.mxu3 %v7820_v55  ;;  %v7198_v55 = vld [vmem:[#allocation16 + $0x10] sm:$0xff] }
 0x30c   :  { %4423 = vmatpush.bf16.msra.mxu0 %v7198_v55  ;;  %4457 = vmatpush.bf16.msra.mxu3 %v7227_v59 }
 0x310   :  { %v3953_v16 = vpop.f32.mrf.mxu0  ;;  %4424 = vmatpush.bf16.msra.mxu0 %v7197_v31  ;;  %4458 = vmatpush.bf16.msra.mxu3 %v7226_v42 }
 0x314   :  { %4425 = vmatpush.bf16.msra.mxu0 %v7196_v35  ;;  %4459 = vmatpush.bf16.msra.mxu3 %v7225_v27  ;;  %v3297_v35 = vperm.slane %v7836_v47, 3 }
 0x318   :  { %v3964_v7 = vpop.f32.mrf.mxu1  ;;  %v7830_v22 = vpop.f32.mrf.mxu0  ;;  %4460 = vmatpush.bf16.msra.mxu3 %v7224_v8 }
 0x319   :  { %v3965_v13 = vadd.f32 %v3964_v7, %v3952_v19  ;;  %v4004_v5 = vadd.f32 %v7830_v22, %v3295_v62  ;;  %v3296_v7 = vperm.slane %v7836_v47, 2  ;;  %v7221_v22 = vld [vmem:[#allocation16 + $0xc8] sm:$0xff] }
 0x31c   :  { %4461 = vmatpush.bf16.msra.mxu3 %v7223_v57 }
 0x320   :  { %v3966_v26 = vpop.f32.mrf.mxu1  ;;  %v4005_v11 = vpop.f32.mrf.mxu0  ;;  %4462 = vmatpush.bf16.msra.mxu3 %v7222_v18 }
 0x321   :  { %v7220_v11 = vld [vmem:[#allocation16 + $0xc0] sm:$0xff] }
 0x324   :  { %4463 = vmatpush.bf16.msra.mxu3 %v7221_v22 }
 0x328   :  { %v7832_v4 = vpop.f32.mrf.mxu1  ;;  %4464 = vmatpush.bf16.msra.mxu3 %v7220_v11 }
 0x329   :  { %v4017_v9 = vadd.f32 %v7832_v4, %v4004_v5 }
 0x32a   :  { %v7834_v34 = vpop.f32.mrf.mxu0 }
 0x32b   :  { %v4056_v24 = vadd.f32 %v7834_v34, %v3296_v7 }
 0x32e   :  { %v3977_v44 = vpop.f32.mrf.mxu2 }
 0x32f   :  { %v3978_v25 = vadd.f32 %v3977_v44, %v3965_v13 }
 0x330   :  { %v4018_v36 = vpop.f32.mrf.mxu1 }
 0x332   :  { %v4057_v40 = vpop.f32.mrf.mxu0 }
 0x336   :  { %v3979_v45 = vpop.f32.mrf.mxu2 }
 0x338   :  { %v4068_v12 = vpop.f32.mrf.mxu1 }
 0x339   :  { %v4069_v26 = vadd.f32 %v4068_v12, %v4056_v24 }
 0x33e   :  { %v4029_v37 = vpop.f32.mrf.mxu2 }
 0x33f   :  { %v4030_v10 = vadd.f32 %v4029_v37, %v4017_v9 }
 0x340   :  { %v4070_v60 = vpop.f32.mrf.mxu1 }
 0x346   :  { %v4031_v52 = vpop.f32.mrf.mxu2 }
 0x348   :  { %v4107_v58 = vpop.f32.mrf.mxu0 }
 0x349   :  { %v4108_v14 = vadd.f32 %v4107_v58, %v3297_v35 }
 0x34e   :  { %v3990_v53 = vpop.f32.mrf.mxu3 }
 0x34f   :  { %v3991_v21 = vadd.f32 %v3990_v53, %v3978_v25 }
 0x350   :  { %v4109_v51 = vpop.f32.mrf.mxu0 }
 0x351   :  { %4150 = vst [vmem:[#allocation17] sm:$0xff] %v3991_v21  ;;  %v4154_v63 = vpack.c.bf16 %v3991_v21, %v3991_v21  ;;  %v4081_v33 = vpop.f32.mrf.mxu2 }
 0x352   :  { %v4082_v41 = vadd.f32 %v4081_v33, %v4069_v26 }
 0x353   :  { %4426 = vmatmul.bf16.vlgmr.msra.gmra.mxu0 %v4154_v63 }
 0x356   :  { %v3992_v2 = vpop.f32.mrf.mxu3 }
 0x358   :  { %v4120_v6 = vpop.f32.mrf.mxu1 }
 0x359   :  { %v4083_v1 = vpop.f32.mrf.mxu2  ;;  %v4121_v44 = vadd.f32 %v4120_v6, %v4108_v14 }
 0x35e   :  { %v4042_v61 = vpop.f32.mrf.mxu3 }
 0x35f   :  { %v4043_v15 = vadd.f32 %v4042_v61, %v4030_v10 }
 0x360   :  { %v4122_v17 = vpop.f32.mrf.mxu1 }
 0x361   :  { %4151 = vst [vmem:[#allocation17 + $0x8] sm:$0xff] %v4043_v15  ;;  %v4155_v16 = vpack.c.bf16 %v4043_v15, %v4043_v15 }
 0x363   :  { %4439 = vmatmul.bf16.vlgmr.msra.gmra.mxu1 %v4155_v16 }
 0x366   :  { %v4044_v23 = vpop.f32.mrf.mxu3 }
 0x36e   :  { %v4094_v30 = vpop.f32.mrf.mxu3 }
 0x36f   :  { %v4095_v55 = vadd.f32 %v4094_v30, %v4082_v41  ;;  %v4133_v29 = vpop.f32.mrf.mxu2 }
 0x370   :  { %v4134_v36 = vadd.f32 %v4133_v29, %v4121_v44 }
 0x371   :  { %4152 = vst [vmem:[#allocation17 + $0x10] sm:$0xff] %v4095_v55  ;;  %v4156_v31 = vpack.c.bf16 %v4095_v55, %v4095_v55 }
 0x373   :  { %4452 = vmatmul.bf16.vlgmr.msra.gmra.mxu2 %v4156_v31 }
 0x376   :  { %v4096_v32 = vpop.f32.mrf.mxu3 }
 0x377   :  { %v4135_v4 = vpop.f32.mrf.mxu2 }
 0x38e   :  { %v4146_v38 = vpop.f32.mrf.mxu3 }
 0x38f   :  { %v4147_v34 = vadd.f32 %v4146_v38, %v4134_v36 }
 0x391   :  { %4153 = vst [vmem:[#allocation17 + $0x18] sm:$0xff] %v4147_v34  ;;  %v4157_v39 = vpack.c.bf16 %v4147_v34, %v4147_v34 }
 0x392   :  { %4481 = dma.vmem_to_hbm [thread:$0]  %s4477_s30, 512, %s4479_s8, [#allocation4]  }
 0x393   :  { %4465 = vmatmul.bf16.vlgmr.msra.gmra.mxu3 %v4157_v39 }
 0x396   :  { %v4148_v40 = vpop.f32.mrf.mxu3 }
 0x3d0   :  { %v4427_v0 = vpop.f32.mrf.mxu0 }
 0x3d1   :  { %v4428_v3 = vadd.f32 %v7243_v46, %v4427_v0 }
 0x3d8   :  { %v4429_v43 = vpop.f32.mrf.mxu0 }
 0x3e0   :  { %v4440_v45 = vpop.f32.mrf.mxu1 }
 0x3e1   :  { %v4441_v37 = vadd.f32 %v4440_v45, %v4428_v3 }
 0x3e8   :  { %v4442_v50 = vpop.f32.mrf.mxu1 }
 0x3f6   :  { %v4453_v56 = vpop.f32.mrf.mxu2 }
 0x3f7   :  { %v4454_v47 = vadd.f32 %v4453_v56, %v4441_v37 }
 0x3fe   :  { %v4455_v12 = vpop.f32.mrf.mxu2 }
 0x416   :  { %v4466_v60 = vpop.f32.mrf.mxu3 }
 0x417   :  { %v4467_v48 = vadd.f32 %v4466_v60, %v4454_v47 }
 0x419   :  { %4470 = vst [vmem:[#allocation18] sm:$0xff] %v4467_v48 }
 0x41a   :  { %4492 = dma.vmem_to_hbm [thread:$0]  %s4488_s14, 128, %s4490_s11, [#allocation19]  }
 0x41e   :  { %v4468_v49 = vpop.f32.mrf.mxu3 }
 0x41f   :  { %7518 = dma.done.wait [#allocation4], 512  }
 0x420   :  { %7519 = vsyncadd [#allocation4], 4294966784 }
 0x421   :  { %7520 = dma.done.wait [#allocation19], 128  }
 0x422   :  { %7521 = vsyncadd [#allocation19], 4294967168 }
 0x423   :  { %4501 = vsyncpa [#allocation3], 1 }
 0x424   :  { %4502 = vsyncpa [#allocation6], 1 }
 0x425   :  { %4503 = vsyncpa [#allocation9], 1 }
 0x426   :  { %4504 = vsyncpa [#allocation12], 1 }
 0x427   :  { %4505 = vsyncpa [#allocation15], 1 }
 0x428   :  { %4506 = vsyncpa [#allocation4], 1 }
 0x429   :  { %4507 = vsyncpa [#allocation19], 1 }

</bundles_post_ra>
